<compile_context>
chip_gen: v5e
topology: v5e:2x2
jax: 0.10.0
libtpu: 0.0.40
codegen_flags: <defaults>
</compile_context>

<pallas_src>
import jax
import jax.numpy as jnp
from jax.experimental import pallas as pl
from jax.experimental.pallas import tpu as pltpu


def _tensorcores_per_chip() -> int:
    """Best-effort TensorCore count reachable by one pallas_call.

    v7x has 2 TCs per chip (v4/v5p expose a megacore pair); v5e/v6e have 1.
    Defaults to 1 (collapsed grid) when unknown — always correct, and optimal
    for single-TC chips.
    """
    try:
        kind = jax.devices()[0].device_kind.lower()
    except Exception:
        return 1
    if ("v7" in kind) or ("v4" in kind) or ("v5p" in kind):
        return 2
    return 1


def _make_conv3x3_kernel(B, H, W, D, Cin, Cout):
    """3x3 SAME conv over (H, W) applied to every D depth slice of B batches.

    Block layouts (per grid step):
      x_ref: (B, Cin,  H, W*D)  VMEM, f32
      w_ref: (9*Cin*Cout,)      SMEM, f32  (HWIO order, flattened)
      b_ref: (Cout,)            SMEM, f32
      o_ref: (B, Cout, H, W*D)  VMEM, f32
    """
    WD = W * D
    R = Cin * H  # channel-stacked sublane extent (H=16 keeps slices vreg-aligned)

    def kernel(x_ref, w_ref, b_ref, o_ref):
        # Loop-invariant boundary masks, hoisted out of all tap loops.
        row = jax.lax.broadcasted_iota(jnp.int32, (R, WD), 0)
        col = jax.lax.broadcasted_iota(jnp.int32, (R, WD), 1)
        rloc = jax.lax.rem(row, H)
        m_up = rloc < (H - 1)   # valid rows when sampling h+1  (oh == +1)
        m_dn = rloc >= 1        # valid rows when sampling h-1  (oh == -1)
        m_rt = col < (WD - D)   # valid lanes when sampling w+1 (ow == +1)
        m_lf = col >= D         # valid lanes when sampling w-1 (ow == -1)

        for n in range(B):
            # Channel-stacked plane: one set of rolls serves all input channels.
            # Rows that would wrap across channel boundaries are exactly the
            # rows the H-boundary masks zero out, so stacking is safe.
            xstack = x_ref[n].reshape(R, WD)
            acc = [None] * Cout

            for oh in (-1, 0, 1):
                if oh == 0:
                    xh = xstack
                else:
                    xh = pltpu.roll(xstack, shift=(-oh) % R, axis=0)
                    xh = jnp.where(m_up if oh > 0 else m_dn, xh, 0.0)
                for ow in (-1, 0, 1):
                    if ow == 0:
                        tap = xh
                    else:
                        # Shift along W == shift by D within the flattened W*D
                        # lane axis; depth slices never mix.
                        tap = pltpu.roll(xh, shift=(-ow * D) % WD, axis=1)
                        tap = jnp.where(m_rt if ow > 0 else m_lf, tap, 0.0)
                    dh, dw = oh + 1, ow + 1
                    for ci in range(Cin):
                        t = tap[ci * H:(ci + 1) * H, :]  # static, sublane-aligned
                        base = ((dh * 3 + dw) * Cin + ci) * Cout
                        for co in range(Cout):
                            wv = w_ref[base + co]        # scalar weight from SMEM
                            if acc[co] is None:
                                acc[co] = t * wv + b_ref[co]   # bias folded in
                            else:
                                acc[co] = acc[co] + t * wv
            for co in range(Cout):
                o_ref[n, co] = acc[co].astype(o_ref.dtype)  # full (16,128) stores

    return kernel


def wrapped_model_2d_forward(x, w_hwio, b):
    """Forward pass matching WrappedModel2D.forward semantics.

    x: (N, C, H, W, D)  -> returns (N, Cout, H, W, D)

    The reshape2D -> net -> reshape3D round-trip is equivalent to running the
    2D conv on every (n, d) slice; since D is the minormost axis, viewing x as
    (N, C, H, W*D) is a free (contiguous) reshape and the output comes back in
    exactly the module's output layout.
    """
    N, C, H, W, D = x.shape
    Cout = w_hwio.shape[3]
    WD = W * D

    x4 = x.reshape(N, C, H, WD)   # free, no data movement
    w_flat = w_hwio.reshape(-1)   # HWIO -> ((dh*3+dw)*Cin + ci)*Cout + co

    # Grid selection: one step per TensorCore. Single-TC chips (v5e/v6e) get a
    # single collapsed step (halves per-step overhead); v7x keeps N split so
    # both cores are busy.
    cores = _tensorcores_per_chip()
    num_steps = cores if (cores > 1 and N % cores == 0) else 1
    b_blk = N // num_steps

    kernel = _make_conv3x3_kernel(b_blk, H, W, D, C, Cout)

    bytes_accessed = (x4.size + N * Cout * H * WD) * 4 + (w_flat.size + b.size) * 4
    flops = 2 * N * H * W * D * C * Cout * 9

    y4 = pl.pallas_call(
        kernel,
        out_shape=jax.ShapeDtypeStruct((N, Cout, H, WD), x.dtype),
        grid=(num_steps,),
        in_specs=[
            pl.BlockSpec((b_blk, C, H, WD), lambda n: (n, 0, 0, 0)),
            pl.BlockSpec(memory_space=pltpu.MemorySpace.SMEM),
            pl.BlockSpec(memory_space=pltpu.MemorySpace.SMEM),
        ],
        out_specs=pl.BlockSpec((b_blk, Cout, H, WD), lambda n: (n, 0, 0, 0)),
        compiler_params=pltpu.CompilerParams(
            dimension_semantics=("parallel",)),
        cost_estimate=pl.CostEstimate(
            flops=flops, transcendentals=0, bytes_accessed=bytes_accessed),
    )(x4, w_flat, b)

    return y4.reshape(N, Cout, H, W, D)   # free, no data movement


def _ref_forward(x, w_hwio, b):
    """Pure-JAX reference reproducing the module's reshape2D/net/reshape3D path."""
    N, C, H, W, D = x.shape
    x2d_nchw = jnp.transpose(x, (0, 4, 1, 2, 3)).reshape(N * D, C, H, W)
    x2d_nhwc = jnp.transpose(x2d_nchw, (0, 2, 3, 1))
    y = jax.lax.conv_general_dilated(
        x2d_nhwc, w_hwio, window_strides=(1, 1), padding="SAME",
        dimension_numbers=("NHWC", "HWIO", "NHWC"),
        precision=jax.lax.Precision.HIGHEST) + b
    Cout = y.shape[-1]
    y_nchw = jnp.transpose(y, (0, 3, 1, 2))
    return y_nchw.reshape(N, D, Cout, H, W).transpose(0, 2, 3, 4, 1)


if __name__ == "__main__":
    # Small shapes consistent with the module: batch=2, channels=4,
    # spatial H=W=16, depth D=8  -> x is the PyTorch-style 5D NCHWD tensor.
    N, C, H, W, D = 2, 4, 16, 16, 8
    Cout = C

    key = jax.random.PRNGKey(0)
    kx, kw, kb = jax.random.split(key, 3)
    x = jax.random.normal(kx, (N, C, H, W, D), dtype=jnp.float32)
    # Deterministic synthetic Conv2d(C, C, 3, padding=1) parameters (HWIO).
    w_hwio = 0.1 * jax.random.normal(kw, (3, 3, C, Cout), dtype=jnp.float32)
    b = 0.1 * jax.random.normal(kb, (Cout,), dtype=jnp.float32)

    out = jax.jit(wrapped_model_2d_forward)(x, w_hwio, b)
    out = jax.block_until_ready(out)

    ref = jax.block_until_ready(_ref_forward(x, w_hwio, b))
    assert out.shape == (N, Cout, H, W, D), out.shape
    max_err = float(jnp.max(jnp.abs(out - ref)))
    if max_err > 1e-3:
        raise AssertionError(f"mismatch vs reference, max abs err={max_err}")

    print("KERNEL_OK")
</pallas_src>

<mosaic_0001>
module attributes {stable_mosaic.version = 11 : i64} {
  func.func @kernel(%arg0: i32, %arg1: memref<2x4x16x128xf32, #tpu.memory_space<vmem>>, %arg2: memref<144xf32, #tpu.memory_space<smem>>, %arg3: memref<4xf32, #tpu.memory_space<smem>>, %arg4: memref<2x4x16x128xf32, #tpu.memory_space<vmem>>) attributes {dimension_semantics = [#tpu.dimension_semantics<parallel>], iteration_bounds = array<i64: 1>, scalar_prefetch = 0 : i64, scratch_operands = 0 : i64, tpu.core_type = #tpu.core_type<tc>, window_params = [{transform_indices = @transform_0, window_bounds = array<i64: 2, 4, 16, 128>}, {transform_indices = @transform_1, window_bounds = array<i64: 144>}, {transform_indices = @transform_2, window_bounds = array<i64: 4>}, {transform_indices = @transform_3, window_bounds = array<i64: 2, 4, 16, 128>}]} {
    %0 = tpu.iota {dimensions = array<i32: 0>} : vector<64x128xi32>
    %1 = tpu.iota {dimensions = array<i32: 1>} : vector<64x128xi32>
    %c16_i32 = arith.constant 16 : i32
    %2 = vector.broadcast %c16_i32 : i32 to vector<64x128xi32>
    %3 = arith.remsi %0, %2 : vector<64x128xi32>
    %c15_i32 = arith.constant 15 : i32
    %4 = vector.broadcast %c15_i32 : i32 to vector<64x128xi32>
    %5 = arith.cmpi slt, %3, %4 : vector<64x128xi32>
    %c1_i32 = arith.constant 1 : i32
    %6 = vector.broadcast %c1_i32 : i32 to vector<64x128xi32>
    %7 = arith.cmpi sge, %3, %6 : vector<64x128xi32>
    %c120_i32 = arith.constant 120 : i32
    %8 = vector.broadcast %c120_i32 : i32 to vector<64x128xi32>
    %9 = arith.cmpi slt, %1, %8 : vector<64x128xi32>
    %c8_i32 = arith.constant 8 : i32
    %10 = vector.broadcast %c8_i32 : i32 to vector<64x128xi32>
    %11 = arith.cmpi sge, %1, %10 : vector<64x128xi32>
    %c0 = arith.constant 0 : index
    %c0_0 = arith.constant 0 : index
    %c0_1 = arith.constant 0 : index
    %c0_2 = arith.constant 0 : index
    %12 = vector.load %arg1[%c0, %c0_0, %c0_1, %c0_2] : memref<2x4x16x128xf32, #tpu.memory_space<vmem>>, vector<1x4x16x128xf32>
    %13 = vector.shape_cast %12 : vector<1x4x16x128xf32> to vector<4x16x128xf32>
    %14 = vector.shape_cast %13 : vector<4x16x128xf32> to vector<64x128xf32>
    %c1_i32_3 = arith.constant 1 : i32
    %15 = tpu.dynamic_rotate %14 by %c1_i32_3 dim 0 : vector<64x128xf32>, i32 -> vector<64x128xf32>
    %cst = arith.constant 0.000000e+00 : f32
    %16 = vector.broadcast %cst : f32 to vector<64x128xf32>
    %17 = arith.select %7, %15, %16 : vector<64x128xi1>, vector<64x128xf32>
    %c8_i32_4 = arith.constant 8 : i32
    %18 = tpu.dynamic_rotate %17 by %c8_i32_4 dim 1 : vector<64x128xf32>, i32 -> vector<64x128xf32>
    %cst_5 = arith.constant 0.000000e+00 : f32
    %19 = vector.broadcast %cst_5 : f32 to vector<64x128xf32>
    %20 = arith.select %11, %18, %19 : vector<64x128xi1>, vector<64x128xf32>
    %21 = vector.extract_strided_slice %20 {offsets = [0, 0], sizes = [16, 128], strides = [1, 1]} : vector<64x128xf32> to vector<16x128xf32>
    %c0_6 = arith.constant 0 : index
    %22 = memref.load %arg2[%c0_6] : memref<144xf32, #tpu.memory_space<smem>>
    %23 = vector.broadcast %22 : f32 to vector<16x128xf32>
    %24 = arith.mulf %21, %23 : vector<16x128xf32>
    %c0_7 = arith.constant 0 : index
    %25 = memref.load %arg3[%c0_7] : memref<4xf32, #tpu.memory_space<smem>>
    %26 = vector.broadcast %25 : f32 to vector<16x128xf32>
    %27 = arith.addf %24, %26 : vector<16x128xf32>
    %c1 = arith.constant 1 : index
    %28 = memref.load %arg2[%c1] : memref<144xf32, #tpu.memory_space<smem>>
    %29 = vector.broadcast %28 : f32 to vector<16x128xf32>
    %30 = arith.mulf %21, %29 : vector<16x128xf32>
    %c1_8 = arith.constant 1 : index
    %31 = memref.load %arg3[%c1_8] : memref<4xf32, #tpu.memory_space<smem>>
    %32 = vector.broadcast %31 : f32 to vector<16x128xf32>
    %33 = arith.addf %30, %32 : vector<16x128xf32>
    %c2 = arith.constant 2 : index
    %34 = memref.load %arg2[%c2] : memref<144xf32, #tpu.memory_space<smem>>
    %35 = vector.broadcast %34 : f32 to vector<16x128xf32>
    %36 = arith.mulf %21, %35 : vector<16x128xf32>
    %c2_9 = arith.constant 2 : index
    %37 = memref.load %arg3[%c2_9] : memref<4xf32, #tpu.memory_space<smem>>
    %38 = vector.broadcast %37 : f32 to vector<16x128xf32>
    %39 = arith.addf %36, %38 : vector<16x128xf32>
    %c3 = arith.constant 3 : index
    %40 = memref.load %arg2[%c3] : memref<144xf32, #tpu.memory_space<smem>>
    %41 = vector.broadcast %40 : f32 to vector<16x128xf32>
    %42 = arith.mulf %21, %41 : vector<16x128xf32>
    %c3_10 = arith.constant 3 : index
    %43 = memref.load %arg3[%c3_10] : memref<4xf32, #tpu.memory_space<smem>>
    %44 = vector.broadcast %43 : f32 to vector<16x128xf32>
    %45 = arith.addf %42, %44 : vector<16x128xf32>
    %46 = vector.extract_strided_slice %20 {offsets = [16, 0], sizes = [16, 128], strides = [1, 1]} : vector<64x128xf32> to vector<16x128xf32>
    %c4 = arith.constant 4 : index
    %47 = memref.load %arg2[%c4] : memref<144xf32, #tpu.memory_space<smem>>
    %48 = vector.broadcast %47 : f32 to vector<16x128xf32>
    %49 = arith.mulf %46, %48 : vector<16x128xf32>
    %50 = arith.addf %27, %49 : vector<16x128xf32>
    %c5 = arith.constant 5 : index
    %51 = memref.load %arg2[%c5] : memref<144xf32, #tpu.memory_space<smem>>
    %52 = vector.broadcast %51 : f32 to vector<16x128xf32>
    %53 = arith.mulf %46, %52 : vector<16x128xf32>
    %54 = arith.addf %33, %53 : vector<16x128xf32>
    %c6 = arith.constant 6 : index
    %55 = memref.load %arg2[%c6] : memref<144xf32, #tpu.memory_space<smem>>
    %56 = vector.broadcast %55 : f32 to vector<16x128xf32>
    %57 = arith.mulf %46, %56 : vector<16x128xf32>
    %58 = arith.addf %39, %57 : vector<16x128xf32>
    %c7 = arith.constant 7 : index
    %59 = memref.load %arg2[%c7] : memref<144xf32, #tpu.memory_space<smem>>
    %60 = vector.broadcast %59 : f32 to vector<16x128xf32>
    %61 = arith.mulf %46, %60 : vector<16x128xf32>
    %62 = arith.addf %45, %61 : vector<16x128xf32>
    %63 = vector.extract_strided_slice %20 {offsets = [32, 0], sizes = [16, 128], strides = [1, 1]} : vector<64x128xf32> to vector<16x128xf32>
    %c8 = arith.constant 8 : index
    %64 = memref.load %arg2[%c8] : memref<144xf32, #tpu.memory_space<smem>>
    %65 = vector.broadcast %64 : f32 to vector<16x128xf32>
    %66 = arith.mulf %63, %65 : vector<16x128xf32>
    %67 = arith.addf %50, %66 : vector<16x128xf32>
    %c9 = arith.constant 9 : index
    %68 = memref.load %arg2[%c9] : memref<144xf32, #tpu.memory_space<smem>>
    %69 = vector.broadcast %68 : f32 to vector<16x128xf32>
    %70 = arith.mulf %63, %69 : vector<16x128xf32>
    %71 = arith.addf %54, %70 : vector<16x128xf32>
    %c10 = arith.constant 10 : index
    %72 = memref.load %arg2[%c10] : memref<144xf32, #tpu.memory_space<smem>>
    %73 = vector.broadcast %72 : f32 to vector<16x128xf32>
    %74 = arith.mulf %63, %73 : vector<16x128xf32>
    %75 = arith.addf %58, %74 : vector<16x128xf32>
    %c11 = arith.constant 11 : index
    %76 = memref.load %arg2[%c11] : memref<144xf32, #tpu.memory_space<smem>>
    %77 = vector.broadcast %76 : f32 to vector<16x128xf32>
    %78 = arith.mulf %63, %77 : vector<16x128xf32>
    %79 = arith.addf %62, %78 : vector<16x128xf32>
    %80 = vector.extract_strided_slice %20 {offsets = [48, 0], sizes = [16, 128], strides = [1, 1]} : vector<64x128xf32> to vector<16x128xf32>
    %c12 = arith.constant 12 : index
    %81 = memref.load %arg2[%c12] : memref<144xf32, #tpu.memory_space<smem>>
    %82 = vector.broadcast %81 : f32 to vector<16x128xf32>
    %83 = arith.mulf %80, %82 : vector<16x128xf32>
    %84 = arith.addf %67, %83 : vector<16x128xf32>
    %c13 = arith.constant 13 : index
    %85 = memref.load %arg2[%c13] : memref<144xf32, #tpu.memory_space<smem>>
    %86 = vector.broadcast %85 : f32 to vector<16x128xf32>
    %87 = arith.mulf %80, %86 : vector<16x128xf32>
    %88 = arith.addf %71, %87 : vector<16x128xf32>
    %c14 = arith.constant 14 : index
    %89 = memref.load %arg2[%c14] : memref<144xf32, #tpu.memory_space<smem>>
    %90 = vector.broadcast %89 : f32 to vector<16x128xf32>
    %91 = arith.mulf %80, %90 : vector<16x128xf32>
    %92 = arith.addf %75, %91 : vector<16x128xf32>
    %c15 = arith.constant 15 : index
    %93 = memref.load %arg2[%c15] : memref<144xf32, #tpu.memory_space<smem>>
    %94 = vector.broadcast %93 : f32 to vector<16x128xf32>
    %95 = arith.mulf %80, %94 : vector<16x128xf32>
    %96 = arith.addf %79, %95 : vector<16x128xf32>
    %97 = vector.extract_strided_slice %17 {offsets = [0, 0], sizes = [16, 128], strides = [1, 1]} : vector<64x128xf32> to vector<16x128xf32>
    %c16 = arith.constant 16 : index
    %98 = memref.load %arg2[%c16] : memref<144xf32, #tpu.memory_space<smem>>
    %99 = vector.broadcast %98 : f32 to vector<16x128xf32>
    %100 = arith.mulf %97, %99 : vector<16x128xf32>
    %101 = arith.addf %84, %100 : vector<16x128xf32>
    %c17 = arith.constant 17 : index
    %102 = memref.load %arg2[%c17] : memref<144xf32, #tpu.memory_space<smem>>
    %103 = vector.broadcast %102 : f32 to vector<16x128xf32>
    %104 = arith.mulf %97, %103 : vector<16x128xf32>
    %105 = arith.addf %88, %104 : vector<16x128xf32>
    %c18 = arith.constant 18 : index
    %106 = memref.load %arg2[%c18] : memref<144xf32, #tpu.memory_space<smem>>
    %107 = vector.broadcast %106 : f32 to vector<16x128xf32>
    %108 = arith.mulf %97, %107 : vector<16x128xf32>
    %109 = arith.addf %92, %108 : vector<16x128xf32>
    %c19 = arith.constant 19 : index
    %110 = memref.load %arg2[%c19] : memref<144xf32, #tpu.memory_space<smem>>
    %111 = vector.broadcast %110 : f32 to vector<16x128xf32>
    %112 = arith.mulf %97, %111 : vector<16x128xf32>
    %113 = arith.addf %96, %112 : vector<16x128xf32>
    %114 = vector.extract_strided_slice %17 {offsets = [16, 0], sizes = [16, 128], strides = [1, 1]} : vector<64x128xf32> to vector<16x128xf32>
    %c20 = arith.constant 20 : index
    %115 = memref.load %arg2[%c20] : memref<144xf32, #tpu.memory_space<smem>>
    %116 = vector.broadcast %115 : f32 to vector<16x128xf32>
    %117 = arith.mulf %114, %116 : vector<16x128xf32>
    %118 = arith.addf %101, %117 : vector<16x128xf32>
    %c21 = arith.constant 21 : index
    %119 = memref.load %arg2[%c21] : memref<144xf32, #tpu.memory_space<smem>>
    %120 = vector.broadcast %119 : f32 to vector<16x128xf32>
    %121 = arith.mulf %114, %120 : vector<16x128xf32>
    %122 = arith.addf %105, %121 : vector<16x128xf32>
    %c22 = arith.constant 22 : index
    %123 = memref.load %arg2[%c22] : memref<144xf32, #tpu.memory_space<smem>>
    %124 = vector.broadcast %123 : f32 to vector<16x128xf32>
    %125 = arith.mulf %114, %124 : vector<16x128xf32>
    %126 = arith.addf %109, %125 : vector<16x128xf32>
    %c23 = arith.constant 23 : index
    %127 = memref.load %arg2[%c23] : memref<144xf32, #tpu.memory_space<smem>>
    %128 = vector.broadcast %127 : f32 to vector<16x128xf32>
    %129 = arith.mulf %114, %128 : vector<16x128xf32>
    %130 = arith.addf %113, %129 : vector<16x128xf32>
    %131 = vector.extract_strided_slice %17 {offsets = [32, 0], sizes = [16, 128], strides = [1, 1]} : vector<64x128xf32> to vector<16x128xf32>
    %c24 = arith.constant 24 : index
    %132 = memref.load %arg2[%c24] : memref<144xf32, #tpu.memory_space<smem>>
    %133 = vector.broadcast %132 : f32 to vector<16x128xf32>
    %134 = arith.mulf %131, %133 : vector<16x128xf32>
    %135 = arith.addf %118, %134 : vector<16x128xf32>
    %c25 = arith.constant 25 : index
    %136 = memref.load %arg2[%c25] : memref<144xf32, #tpu.memory_space<smem>>
    %137 = vector.broadcast %136 : f32 to vector<16x128xf32>
    %138 = arith.mulf %131, %137 : vector<16x128xf32>
    %139 = arith.addf %122, %138 : vector<16x128xf32>
    %c26 = arith.constant 26 : index
    %140 = memref.load %arg2[%c26] : memref<144xf32, #tpu.memory_space<smem>>
    %141 = vector.broadcast %140 : f32 to vector<16x128xf32>
    %142 = arith.mulf %131, %141 : vector<16x128xf32>
    %143 = arith.addf %126, %142 : vector<16x128xf32>
    %c27 = arith.constant 27 : index
    %144 = memref.load %arg2[%c27] : memref<144xf32, #tpu.memory_space<smem>>
    %145 = vector.broadcast %144 : f32 to vector<16x128xf32>
    %146 = arith.mulf %131, %145 : vector<16x128xf32>
    %147 = arith.addf %130, %146 : vector<16x128xf32>
    %148 = vector.extract_strided_slice %17 {offsets = [48, 0], sizes = [16, 128], strides = [1, 1]} : vector<64x128xf32> to vector<16x128xf32>
    %c28 = arith.constant 28 : index
    %149 = memref.load %arg2[%c28] : memref<144xf32, #tpu.memory_space<smem>>
    %150 = vector.broadcast %149 : f32 to vector<16x128xf32>
    %151 = arith.mulf %148, %150 : vector<16x128xf32>
    %152 = arith.addf %135, %151 : vector<16x128xf32>
    %c29 = arith.constant 29 : index
    %153 = memref.load %arg2[%c29] : memref<144xf32, #tpu.memory_space<smem>>
    %154 = vector.broadcast %153 : f32 to vector<16x128xf32>
    %155 = arith.mulf %148, %154 : vector<16x128xf32>
    %156 = arith.addf %139, %155 : vector<16x128xf32>
    %c30 = arith.constant 30 : index
    %157 = memref.load %arg2[%c30] : memref<144xf32, #tpu.memory_space<smem>>
    %158 = vector.broadcast %157 : f32 to vector<16x128xf32>
    %159 = arith.mulf %148, %158 : vector<16x128xf32>
    %160 = arith.addf %143, %159 : vector<16x128xf32>
    %c31 = arith.constant 31 : index
    %161 = memref.load %arg2[%c31] : memref<144xf32, #tpu.memory_space<smem>>
    %162 = vector.broadcast %161 : f32 to vector<16x128xf32>
    %163 = arith.mulf %148, %162 : vector<16x128xf32>
    %164 = arith.addf %147, %163 : vector<16x128xf32>
    %c120_i32_11 = arith.constant 120 : i32
    %165 = tpu.dynamic_rotate %17 by %c120_i32_11 dim 1 : vector<64x128xf32>, i32 -> vector<64x128xf32>
    %cst_12 = arith.constant 0.000000e+00 : f32
    %166 = vector.broadcast %cst_12 : f32 to vector<64x128xf32>
    %167 = arith.select %9, %165, %166 : vector<64x128xi1>, vector<64x128xf32>
    %168 = vector.extract_strided_slice %167 {offsets = [0, 0], sizes = [16, 128], strides = [1, 1]} : vector<64x128xf32> to vector<16x128xf32>
    %c32 = arith.constant 32 : index
    %169 = memref.load %arg2[%c32] : memref<144xf32, #tpu.memory_space<smem>>
    %170 = vector.broadcast %169 : f32 to vector<16x128xf32>
    %171 = arith.mulf %168, %170 : vector<16x128xf32>
    %172 = arith.addf %152, %171 : vector<16x128xf32>
    %c33 = arith.constant 33 : index
    %173 = memref.load %arg2[%c33] : memref<144xf32, #tpu.memory_space<smem>>
    %174 = vector.broadcast %173 : f32 to vector<16x128xf32>
    %175 = arith.mulf %168, %174 : vector<16x128xf32>
    %176 = arith.addf %156, %175 : vector<16x128xf32>
    %c34 = arith.constant 34 : index
    %177 = memref.load %arg2[%c34] : memref<144xf32, #tpu.memory_space<smem>>
    %178 = vector.broadcast %177 : f32 to vector<16x128xf32>
    %179 = arith.mulf %168, %178 : vector<16x128xf32>
    %180 = arith.addf %160, %179 : vector<16x128xf32>
    %c35 = arith.constant 35 : index
    %181 = memref.load %arg2[%c35] : memref<144xf32, #tpu.memory_space<smem>>
    %182 = vector.broadcast %181 : f32 to vector<16x128xf32>
    %183 = arith.mulf %168, %182 : vector<16x128xf32>
    %184 = arith.addf %164, %183 : vector<16x128xf32>
    %185 = vector.extract_strided_slice %167 {offsets = [16, 0], sizes = [16, 128], strides = [1, 1]} : vector<64x128xf32> to vector<16x128xf32>
    %c36 = arith.constant 36 : index
    %186 = memref.load %arg2[%c36] : memref<144xf32, #tpu.memory_space<smem>>
    %187 = vector.broadcast %186 : f32 to vector<16x128xf32>
    %188 = arith.mulf %185, %187 : vector<16x128xf32>
    %189 = arith.addf %172, %188 : vector<16x128xf32>
    %c37 = arith.constant 37 : index
    %190 = memref.load %arg2[%c37] : memref<144xf32, #tpu.memory_space<smem>>
    %191 = vector.broadcast %190 : f32 to vector<16x128xf32>
    %192 = arith.mulf %185, %191 : vector<16x128xf32>
    %193 = arith.addf %176, %192 : vector<16x128xf32>
    %c38 = arith.constant 38 : index
    %194 = memref.load %arg2[%c38] : memref<144xf32, #tpu.memory_space<smem>>
    %195 = vector.broadcast %194 : f32 to vector<16x128xf32>
    %196 = arith.mulf %185, %195 : vector<16x128xf32>
    %197 = arith.addf %180, %196 : vector<16x128xf32>
    %c39 = arith.constant 39 : index
    %198 = memref.load %arg2[%c39] : memref<144xf32, #tpu.memory_space<smem>>
    %199 = vector.broadcast %198 : f32 to vector<16x128xf32>
    %200 = arith.mulf %185, %199 : vector<16x128xf32>
    %201 = arith.addf %184, %200 : vector<16x128xf32>
    %202 = vector.extract_strided_slice %167 {offsets = [32, 0], sizes = [16, 128], strides = [1, 1]} : vector<64x128xf32> to vector<16x128xf32>
    %c40 = arith.constant 40 : index
    %203 = memref.load %arg2[%c40] : memref<144xf32, #tpu.memory_space<smem>>
    %204 = vector.broadcast %203 : f32 to vector<16x128xf32>
    %205 = arith.mulf %202, %204 : vector<16x128xf32>
    %206 = arith.addf %189, %205 : vector<16x128xf32>
    %c41 = arith.constant 41 : index
    %207 = memref.load %arg2[%c41] : memref<144xf32, #tpu.memory_space<smem>>
    %208 = vector.broadcast %207 : f32 to vector<16x128xf32>
    %209 = arith.mulf %202, %208 : vector<16x128xf32>
    %210 = arith.addf %193, %209 : vector<16x128xf32>
    %c42 = arith.constant 42 : index
    %211 = memref.load %arg2[%c42] : memref<144xf32, #tpu.memory_space<smem>>
    %212 = vector.broadcast %211 : f32 to vector<16x128xf32>
    %213 = arith.mulf %202, %212 : vector<16x128xf32>
    %214 = arith.addf %197, %213 : vector<16x128xf32>
    %c43 = arith.constant 43 : index
    %215 = memref.load %arg2[%c43] : memref<144xf32, #tpu.memory_space<smem>>
    %216 = vector.broadcast %215 : f32 to vector<16x128xf32>
    %217 = arith.mulf %202, %216 : vector<16x128xf32>
    %218 = arith.addf %201, %217 : vector<16x128xf32>
    %219 = vector.extract_strided_slice %167 {offsets = [48, 0], sizes = [16, 128], strides = [1, 1]} : vector<64x128xf32> to vector<16x128xf32>
    %c44 = arith.constant 44 : index
    %220 = memref.load %arg2[%c44] : memref<144xf32, #tpu.memory_space<smem>>
    %221 = vector.broadcast %220 : f32 to vector<16x128xf32>
    %222 = arith.mulf %219, %221 : vector<16x128xf32>
    %223 = arith.addf %206, %222 : vector<16x128xf32>
    %c45 = arith.constant 45 : index
    %224 = memref.load %arg2[%c45] : memref<144xf32, #tpu.memory_space<smem>>
    %225 = vector.broadcast %224 : f32 to vector<16x128xf32>
    %226 = arith.mulf %219, %225 : vector<16x128xf32>
    %227 = arith.addf %210, %226 : vector<16x128xf32>
    %c46 = arith.constant 46 : index
    %228 = memref.load %arg2[%c46] : memref<144xf32, #tpu.memory_space<smem>>
    %229 = vector.broadcast %228 : f32 to vector<16x128xf32>
    %230 = arith.mulf %219, %229 : vector<16x128xf32>
    %231 = arith.addf %214, %230 : vector<16x128xf32>
    %c47 = arith.constant 47 : index
    %232 = memref.load %arg2[%c47] : memref<144xf32, #tpu.memory_space<smem>>
    %233 = vector.broadcast %232 : f32 to vector<16x128xf32>
    %234 = arith.mulf %219, %233 : vector<16x128xf32>
    %235 = arith.addf %218, %234 : vector<16x128xf32>
    %c8_i32_13 = arith.constant 8 : i32
    %236 = tpu.dynamic_rotate %14 by %c8_i32_13 dim 1 : vector<64x128xf32>, i32 -> vector<64x128xf32>
    %cst_14 = arith.constant 0.000000e+00 : f32
    %237 = vector.broadcast %cst_14 : f32 to vector<64x128xf32>
    %238 = arith.select %11, %236, %237 : vector<64x128xi1>, vector<64x128xf32>
    %239 = vector.extract_strided_slice %238 {offsets = [0, 0], sizes = [16, 128], strides = [1, 1]} : vector<64x128xf32> to vector<16x128xf32>
    %c48 = arith.constant 48 : index
    %240 = memref.load %arg2[%c48] : memref<144xf32, #tpu.memory_space<smem>>
    %241 = vector.broadcast %240 : f32 to vector<16x128xf32>
    %242 = arith.mulf %239, %241 : vector<16x128xf32>
    %243 = arith.addf %223, %242 : vector<16x128xf32>
    %c49 = arith.constant 49 : index
    %244 = memref.load %arg2[%c49] : memref<144xf32, #tpu.memory_space<smem>>
    %245 = vector.broadcast %244 : f32 to vector<16x128xf32>
    %246 = arith.mulf %239, %245 : vector<16x128xf32>
    %247 = arith.addf %227, %246 : vector<16x128xf32>
    %c50 = arith.constant 50 : index
    %248 = memref.load %arg2[%c50] : memref<144xf32, #tpu.memory_space<smem>>
    %249 = vector.broadcast %248 : f32 to vector<16x128xf32>
    %250 = arith.mulf %239, %249 : vector<16x128xf32>
    %251 = arith.addf %231, %250 : vector<16x128xf32>
    %c51 = arith.constant 51 : index
    %252 = memref.load %arg2[%c51] : memref<144xf32, #tpu.memory_space<smem>>
    %253 = vector.broadcast %252 : f32 to vector<16x128xf32>
    %254 = arith.mulf %239, %253 : vector<16x128xf32>
    %255 = arith.addf %235, %254 : vector<16x128xf32>
    %256 = vector.extract_strided_slice %238 {offsets = [16, 0], sizes = [16, 128], strides = [1, 1]} : vector<64x128xf32> to vector<16x128xf32>
    %c52 = arith.constant 52 : index
    %257 = memref.load %arg2[%c52] : memref<144xf32, #tpu.memory_space<smem>>
    %258 = vector.broadcast %257 : f32 to vector<16x128xf32>
    %259 = arith.mulf %256, %258 : vector<16x128xf32>
    %260 = arith.addf %243, %259 : vector<16x128xf32>
    %c53 = arith.constant 53 : index
    %261 = memref.load %arg2[%c53] : memref<144xf32, #tpu.memory_space<smem>>
    %262 = vector.broadcast %261 : f32 to vector<16x128xf32>
    %263 = arith.mulf %256, %262 : vector<16x128xf32>
    %264 = arith.addf %247, %263 : vector<16x128xf32>
    %c54 = arith.constant 54 : index
    %265 = memref.load %arg2[%c54] : memref<144xf32, #tpu.memory_space<smem>>
    %266 = vector.broadcast %265 : f32 to vector<16x128xf32>
    %267 = arith.mulf %256, %266 : vector<16x128xf32>
    %268 = arith.addf %251, %267 : vector<16x128xf32>
    %c55 = arith.constant 55 : index
    %269 = memref.load %arg2[%c55] : memref<144xf32, #tpu.memory_space<smem>>
    %270 = vector.broadcast %269 : f32 to vector<16x128xf32>
    %271 = arith.mulf %256, %270 : vector<16x128xf32>
    %272 = arith.addf %255, %271 : vector<16x128xf32>
    %273 = vector.extract_strided_slice %238 {offsets = [32, 0], sizes = [16, 128], strides = [1, 1]} : vector<64x128xf32> to vector<16x128xf32>
    %c56 = arith.constant 56 : index
    %274 = memref.load %arg2[%c56] : memref<144xf32, #tpu.memory_space<smem>>
    %275 = vector.broadcast %274 : f32 to vector<16x128xf32>
    %276 = arith.mulf %273, %275 : vector<16x128xf32>
    %277 = arith.addf %260, %276 : vector<16x128xf32>
    %c57 = arith.constant 57 : index
    %278 = memref.load %arg2[%c57] : memref<144xf32, #tpu.memory_space<smem>>
    %279 = vector.broadcast %278 : f32 to vector<16x128xf32>
    %280 = arith.mulf %273, %279 : vector<16x128xf32>
    %281 = arith.addf %264, %280 : vector<16x128xf32>
    %c58 = arith.constant 58 : index
    %282 = memref.load %arg2[%c58] : memref<144xf32, #tpu.memory_space<smem>>
    %283 = vector.broadcast %282 : f32 to vector<16x128xf32>
    %284 = arith.mulf %273, %283 : vector<16x128xf32>
    %285 = arith.addf %268, %284 : vector<16x128xf32>
    %c59 = arith.constant 59 : index
    %286 = memref.load %arg2[%c59] : memref<144xf32, #tpu.memory_space<smem>>
    %287 = vector.broadcast %286 : f32 to vector<16x128xf32>
    %288 = arith.mulf %273, %287 : vector<16x128xf32>
    %289 = arith.addf %272, %288 : vector<16x128xf32>
    %290 = vector.extract_strided_slice %238 {offsets = [48, 0], sizes = [16, 128], strides = [1, 1]} : vector<64x128xf32> to vector<16x128xf32>
    %c60 = arith.constant 60 : index
    %291 = memref.load %arg2[%c60] : memref<144xf32, #tpu.memory_space<smem>>
    %292 = vector.broadcast %291 : f32 to vector<16x128xf32>
    %293 = arith.mulf %290, %292 : vector<16x128xf32>
    %294 = arith.addf %277, %293 : vector<16x128xf32>
    %c61 = arith.constant 61 : index
    %295 = memref.load %arg2[%c61] : memref<144xf32, #tpu.memory_space<smem>>
    %296 = vector.broadcast %295 : f32 to vector<16x128xf32>
    %297 = arith.mulf %290, %296 : vector<16x128xf32>
    %298 = arith.addf %281, %297 : vector<16x128xf32>
    %c62 = arith.constant 62 : index
    %299 = memref.load %arg2[%c62] : memref<144xf32, #tpu.memory_space<smem>>
    %300 = vector.broadcast %299 : f32 to vector<16x128xf32>
    %301 = arith.mulf %290, %300 : vector<16x128xf32>
    %302 = arith.addf %285, %301 : vector<16x128xf32>
    %c63 = arith.constant 63 : index
    %303 = memref.load %arg2[%c63] : memref<144xf32, #tpu.memory_space<smem>>
    %304 = vector.broadcast %303 : f32 to vector<16x128xf32>
    %305 = arith.mulf %290, %304 : vector<16x128xf32>
    %306 = arith.addf %289, %305 : vector<16x128xf32>
    %307 = vector.extract_strided_slice %14 {offsets = [0, 0], sizes = [16, 128], strides = [1, 1]} : vector<64x128xf32> to vector<16x128xf32>
    %c64 = arith.constant 64 : index
    %308 = memref.load %arg2[%c64] : memref<144xf32, #tpu.memory_space<smem>>
    %309 = vector.broadcast %308 : f32 to vector<16x128xf32>
    %310 = arith.mulf %307, %309 : vector<16x128xf32>
    %311 = arith.addf %294, %310 : vector<16x128xf32>
    %c65 = arith.constant 65 : index
    %312 = memref.load %arg2[%c65] : memref<144xf32, #tpu.memory_space<smem>>
    %313 = vector.broadcast %312 : f32 to vector<16x128xf32>
    %314 = arith.mulf %307, %313 : vector<16x128xf32>
    %315 = arith.addf %298, %314 : vector<16x128xf32>
    %c66 = arith.constant 66 : index
    %316 = memref.load %arg2[%c66] : memref<144xf32, #tpu.memory_space<smem>>
    %317 = vector.broadcast %316 : f32 to vector<16x128xf32>
    %318 = arith.mulf %307, %317 : vector<16x128xf32>
    %319 = arith.addf %302, %318 : vector<16x128xf32>
    %c67 = arith.constant 67 : index
    %320 = memref.load %arg2[%c67] : memref<144xf32, #tpu.memory_space<smem>>
    %321 = vector.broadcast %320 : f32 to vector<16x128xf32>
    %322 = arith.mulf %307, %321 : vector<16x128xf32>
    %323 = arith.addf %306, %322 : vector<16x128xf32>
    %324 = vector.extract_strided_slice %14 {offsets = [16, 0], sizes = [16, 128], strides = [1, 1]} : vector<64x128xf32> to vector<16x128xf32>
    %c68 = arith.constant 68 : index
    %325 = memref.load %arg2[%c68] : memref<144xf32, #tpu.memory_space<smem>>
    %326 = vector.broadcast %325 : f32 to vector<16x128xf32>
    %327 = arith.mulf %324, %326 : vector<16x128xf32>
    %328 = arith.addf %311, %327 : vector<16x128xf32>
    %c69 = arith.constant 69 : index
    %329 = memref.load %arg2[%c69] : memref<144xf32, #tpu.memory_space<smem>>
    %330 = vector.broadcast %329 : f32 to vector<16x128xf32>
    %331 = arith.mulf %324, %330 : vector<16x128xf32>
    %332 = arith.addf %315, %331 : vector<16x128xf32>
    %c70 = arith.constant 70 : index
    %333 = memref.load %arg2[%c70] : memref<144xf32, #tpu.memory_space<smem>>
    %334 = vector.broadcast %333 : f32 to vector<16x128xf32>
    %335 = arith.mulf %324, %334 : vector<16x128xf32>
    %336 = arith.addf %319, %335 : vector<16x128xf32>
    %c71 = arith.constant 71 : index
    %337 = memref.load %arg2[%c71] : memref<144xf32, #tpu.memory_space<smem>>
    %338 = vector.broadcast %337 : f32 to vector<16x128xf32>
    %339 = arith.mulf %324, %338 : vector<16x128xf32>
    %340 = arith.addf %323, %339 : vector<16x128xf32>
    %341 = vector.extract_strided_slice %14 {offsets = [32, 0], sizes = [16, 128], strides = [1, 1]} : vector<64x128xf32> to vector<16x128xf32>
    %c72 = arith.constant 72 : index
    %342 = memref.load %arg2[%c72] : memref<144xf32, #tpu.memory_space<smem>>
    %343 = vector.broadcast %342 : f32 to vector<16x128xf32>
    %344 = arith.mulf %341, %343 : vector<16x128xf32>
    %345 = arith.addf %328, %344 : vector<16x128xf32>
    %c73 = arith.constant 73 : index
    %346 = memref.load %arg2[%c73] : memref<144xf32, #tpu.memory_space<smem>>
    %347 = vector.broadcast %346 : f32 to vector<16x128xf32>
    %348 = arith.mulf %341, %347 : vector<16x128xf32>
    %349 = arith.addf %332, %348 : vector<16x128xf32>
    %c74 = arith.constant 74 : index
    %350 = memref.load %arg2[%c74] : memref<144xf32, #tpu.memory_space<smem>>
    %351 = vector.broadcast %350 : f32 to vector<16x128xf32>
    %352 = arith.mulf %341, %351 : vector<16x128xf32>
    %353 = arith.addf %336, %352 : vector<16x128xf32>
    %c75 = arith.constant 75 : index
    %354 = memref.load %arg2[%c75] : memref<144xf32, #tpu.memory_space<smem>>
    %355 = vector.broadcast %354 : f32 to vector<16x128xf32>
    %356 = arith.mulf %341, %355 : vector<16x128xf32>
    %357 = arith.addf %340, %356 : vector<16x128xf32>
    %358 = vector.extract_strided_slice %14 {offsets = [48, 0], sizes = [16, 128], strides = [1, 1]} : vector<64x128xf32> to vector<16x128xf32>
    %c76 = arith.constant 76 : index
    %359 = memref.load %arg2[%c76] : memref<144xf32, #tpu.memory_space<smem>>
    %360 = vector.broadcast %359 : f32 to vector<16x128xf32>
    %361 = arith.mulf %358, %360 : vector<16x128xf32>
    %362 = arith.addf %345, %361 : vector<16x128xf32>
    %c77 = arith.constant 77 : index
    %363 = memref.load %arg2[%c77] : memref<144xf32, #tpu.memory_space<smem>>
    %364 = vector.broadcast %363 : f32 to vector<16x128xf32>
    %365 = arith.mulf %358, %364 : vector<16x128xf32>
    %366 = arith.addf %349, %365 : vector<16x128xf32>
    %c78 = arith.constant 78 : index
    %367 = memref.load %arg2[%c78] : memref<144xf32, #tpu.memory_space<smem>>
    %368 = vector.broadcast %367 : f32 to vector<16x128xf32>
    %369 = arith.mulf %358, %368 : vector<16x128xf32>
    %370 = arith.addf %353, %369 : vector<16x128xf32>
    %c79 = arith.constant 79 : index
    %371 = memref.load %arg2[%c79] : memref<144xf32, #tpu.memory_space<smem>>
    %372 = vector.broadcast %371 : f32 to vector<16x128xf32>
    %373 = arith.mulf %358, %372 : vector<16x128xf32>
    %374 = arith.addf %357, %373 : vector<16x128xf32>
    %c120_i32_15 = arith.constant 120 : i32
    %375 = tpu.dynamic_rotate %14 by %c120_i32_15 dim 1 : vector<64x128xf32>, i32 -> vector<64x128xf32>
    %cst_16 = arith.constant 0.000000e+00 : f32
    %376 = vector.broadcast %cst_16 : f32 to vector<64x128xf32>
    %377 = arith.select %9, %375, %376 : vector<64x128xi1>, vector<64x128xf32>
    %378 = vector.extract_strided_slice %377 {offsets = [0, 0], sizes = [16, 128], strides = [1, 1]} : vector<64x128xf32> to vector<16x128xf32>
    %c80 = arith.constant 80 : index
    %379 = memref.load %arg2[%c80] : memref<144xf32, #tpu.memory_space<smem>>
    %380 = vector.broadcast %379 : f32 to vector<16x128xf32>
    %381 = arith.mulf %378, %380 : vector<16x128xf32>
    %382 = arith.addf %362, %381 : vector<16x128xf32>
    %c81 = arith.constant 81 : index
    %383 = memref.load %arg2[%c81] : memref<144xf32, #tpu.memory_space<smem>>
    %384 = vector.broadcast %383 : f32 to vector<16x128xf32>
    %385 = arith.mulf %378, %384 : vector<16x128xf32>
    %386 = arith.addf %366, %385 : vector<16x128xf32>
    %c82 = arith.constant 82 : index
    %387 = memref.load %arg2[%c82] : memref<144xf32, #tpu.memory_space<smem>>
    %388 = vector.broadcast %387 : f32 to vector<16x128xf32>
    %389 = arith.mulf %378, %388 : vector<16x128xf32>
    %390 = arith.addf %370, %389 : vector<16x128xf32>
    %c83 = arith.constant 83 : index
    %391 = memref.load %arg2[%c83] : memref<144xf32, #tpu.memory_space<smem>>
    %392 = vector.broadcast %391 : f32 to vector<16x128xf32>
    %393 = arith.mulf %378, %392 : vector<16x128xf32>
    %394 = arith.addf %374, %393 : vector<16x128xf32>
    %395 = vector.extract_strided_slice %377 {offsets = [16, 0], sizes = [16, 128], strides = [1, 1]} : vector<64x128xf32> to vector<16x128xf32>
    %c84 = arith.constant 84 : index
    %396 = memref.load %arg2[%c84] : memref<144xf32, #tpu.memory_space<smem>>
    %397 = vector.broadcast %396 : f32 to vector<16x128xf32>
    %398 = arith.mulf %395, %397 : vector<16x128xf32>
    %399 = arith.addf %382, %398 : vector<16x128xf32>
    %c85 = arith.constant 85 : index
    %400 = memref.load %arg2[%c85] : memref<144xf32, #tpu.memory_space<smem>>
    %401 = vector.broadcast %400 : f32 to vector<16x128xf32>
    %402 = arith.mulf %395, %401 : vector<16x128xf32>
    %403 = arith.addf %386, %402 : vector<16x128xf32>
    %c86 = arith.constant 86 : index
    %404 = memref.load %arg2[%c86] : memref<144xf32, #tpu.memory_space<smem>>
    %405 = vector.broadcast %404 : f32 to vector<16x128xf32>
    %406 = arith.mulf %395, %405 : vector<16x128xf32>
    %407 = arith.addf %390, %406 : vector<16x128xf32>
    %c87 = arith.constant 87 : index
    %408 = memref.load %arg2[%c87] : memref<144xf32, #tpu.memory_space<smem>>
    %409 = vector.broadcast %408 : f32 to vector<16x128xf32>
    %410 = arith.mulf %395, %409 : vector<16x128xf32>
    %411 = arith.addf %394, %410 : vector<16x128xf32>
    %412 = vector.extract_strided_slice %377 {offsets = [32, 0], sizes = [16, 128], strides = [1, 1]} : vector<64x128xf32> to vector<16x128xf32>
    %c88 = arith.constant 88 : index
    %413 = memref.load %arg2[%c88] : memref<144xf32, #tpu.memory_space<smem>>
    %414 = vector.broadcast %413 : f32 to vector<16x128xf32>
    %415 = arith.mulf %412, %414 : vector<16x128xf32>
    %416 = arith.addf %399, %415 : vector<16x128xf32>
    %c89 = arith.constant 89 : index
    %417 = memref.load %arg2[%c89] : memref<144xf32, #tpu.memory_space<smem>>
    %418 = vector.broadcast %417 : f32 to vector<16x128xf32>
    %419 = arith.mulf %412, %418 : vector<16x128xf32>
    %420 = arith.addf %403, %419 : vector<16x128xf32>
    %c90 = arith.constant 90 : index
    %421 = memref.load %arg2[%c90] : memref<144xf32, #tpu.memory_space<smem>>
    %422 = vector.broadcast %421 : f32 to vector<16x128xf32>
    %423 = arith.mulf %412, %422 : vector<16x128xf32>
    %424 = arith.addf %407, %423 : vector<16x128xf32>
    %c91 = arith.constant 91 : index
    %425 = memref.load %arg2[%c91] : memref<144xf32, #tpu.memory_space<smem>>
    %426 = vector.broadcast %425 : f32 to vector<16x128xf32>
    %427 = arith.mulf %412, %426 : vector<16x128xf32>
    %428 = arith.addf %411, %427 : vector<16x128xf32>
    %429 = vector.extract_strided_slice %377 {offsets = [48, 0], sizes = [16, 128], strides = [1, 1]} : vector<64x128xf32> to vector<16x128xf32>
    %c92 = arith.constant 92 : index
    %430 = memref.load %arg2[%c92] : memref<144xf32, #tpu.memory_space<smem>>
    %431 = vector.broadcast %430 : f32 to vector<16x128xf32>
    %432 = arith.mulf %429, %431 : vector<16x128xf32>
    %433 = arith.addf %416, %432 : vector<16x128xf32>
    %c93 = arith.constant 93 : index
    %434 = memref.load %arg2[%c93] : memref<144xf32, #tpu.memory_space<smem>>
    %435 = vector.broadcast %434 : f32 to vector<16x128xf32>
    %436 = arith.mulf %429, %435 : vector<16x128xf32>
    %437 = arith.addf %420, %436 : vector<16x128xf32>
    %c94 = arith.constant 94 : index
    %438 = memref.load %arg2[%c94] : memref<144xf32, #tpu.memory_space<smem>>
    %439 = vector.broadcast %438 : f32 to vector<16x128xf32>
    %440 = arith.mulf %429, %439 : vector<16x128xf32>
    %441 = arith.addf %424, %440 : vector<16x128xf32>
    %c95 = arith.constant 95 : index
    %442 = memref.load %arg2[%c95] : memref<144xf32, #tpu.memory_space<smem>>
    %443 = vector.broadcast %442 : f32 to vector<16x128xf32>
    %444 = arith.mulf %429, %443 : vector<16x128xf32>
    %445 = arith.addf %428, %444 : vector<16x128xf32>
    %c63_i32 = arith.constant 63 : i32
    %446 = tpu.dynamic_rotate %14 by %c63_i32 dim 0 : vector<64x128xf32>, i32 -> vector<64x128xf32>
    %cst_17 = arith.constant 0.000000e+00 : f32
    %447 = vector.broadcast %cst_17 : f32 to vector<64x128xf32>
    %448 = arith.select %5, %446, %447 : vector<64x128xi1>, vector<64x128xf32>
    %c8_i32_18 = arith.constant 8 : i32
    %449 = tpu.dynamic_rotate %448 by %c8_i32_18 dim 1 : vector<64x128xf32>, i32 -> vector<64x128xf32>
    %cst_19 = arith.constant 0.000000e+00 : f32
    %450 = vector.broadcast %cst_19 : f32 to vector<64x128xf32>
    %451 = arith.select %11, %449, %450 : vector<64x128xi1>, vector<64x128xf32>
    %452 = vector.extract_strided_slice %451 {offsets = [0, 0], sizes = [16, 128], strides = [1, 1]} : vector<64x128xf32> to vector<16x128xf32>
    %c96 = arith.constant 96 : index
    %453 = memref.load %arg2[%c96] : memref<144xf32, #tpu.memory_space<smem>>
    %454 = vector.broadcast %453 : f32 to vector<16x128xf32>
    %455 = arith.mulf %452, %454 : vector<16x128xf32>
    %456 = arith.addf %433, %455 : vector<16x128xf32>
    %c97 = arith.constant 97 : index
    %457 = memref.load %arg2[%c97] : memref<144xf32, #tpu.memory_space<smem>>
    %458 = vector.broadcast %457 : f32 to vector<16x128xf32>
    %459 = arith.mulf %452, %458 : vector<16x128xf32>
    %460 = arith.addf %437, %459 : vector<16x128xf32>
    %c98 = arith.constant 98 : index
    %461 = memref.load %arg2[%c98] : memref<144xf32, #tpu.memory_space<smem>>
    %462 = vector.broadcast %461 : f32 to vector<16x128xf32>
    %463 = arith.mulf %452, %462 : vector<16x128xf32>
    %464 = arith.addf %441, %463 : vector<16x128xf32>
    %c99 = arith.constant 99 : index
    %465 = memref.load %arg2[%c99] : memref<144xf32, #tpu.memory_space<smem>>
    %466 = vector.broadcast %465 : f32 to vector<16x128xf32>
    %467 = arith.mulf %452, %466 : vector<16x128xf32>
    %468 = arith.addf %445, %467 : vector<16x128xf32>
    %469 = vector.extract_strided_slice %451 {offsets = [16, 0], sizes = [16, 128], strides = [1, 1]} : vector<64x128xf32> to vector<16x128xf32>
    %c100 = arith.constant 100 : index
    %470 = memref.load %arg2[%c100] : memref<144xf32, #tpu.memory_space<smem>>
    %471 = vector.broadcast %470 : f32 to vector<16x128xf32>
    %472 = arith.mulf %469, %471 : vector<16x128xf32>
    %473 = arith.addf %456, %472 : vector<16x128xf32>
    %c101 = arith.constant 101 : index
    %474 = memref.load %arg2[%c101] : memref<144xf32, #tpu.memory_space<smem>>
    %475 = vector.broadcast %474 : f32 to vector<16x128xf32>
    %476 = arith.mulf %469, %475 : vector<16x128xf32>
    %477 = arith.addf %460, %476 : vector<16x128xf32>
    %c102 = arith.constant 102 : index
    %478 = memref.load %arg2[%c102] : memref<144xf32, #tpu.memory_space<smem>>
    %479 = vector.broadcast %478 : f32 to vector<16x128xf32>
    %480 = arith.mulf %469, %479 : vector<16x128xf32>
    %481 = arith.addf %464, %480 : vector<16x128xf32>
    %c103 = arith.constant 103 : index
    %482 = memref.load %arg2[%c103] : memref<144xf32, #tpu.memory_space<smem>>
    %483 = vector.broadcast %482 : f32 to vector<16x128xf32>
    %484 = arith.mulf %469, %483 : vector<16x128xf32>
    %485 = arith.addf %468, %484 : vector<16x128xf32>
    %486 = vector.extract_strided_slice %451 {offsets = [32, 0], sizes = [16, 128], strides = [1, 1]} : vector<64x128xf32> to vector<16x128xf32>
    %c104 = arith.constant 104 : index
    %487 = memref.load %arg2[%c104] : memref<144xf32, #tpu.memory_space<smem>>
    %488 = vector.broadcast %487 : f32 to vector<16x128xf32>
    %489 = arith.mulf %486, %488 : vector<16x128xf32>
    %490 = arith.addf %473, %489 : vector<16x128xf32>
    %c105 = arith.constant 105 : index
    %491 = memref.load %arg2[%c105] : memref<144xf32, #tpu.memory_space<smem>>
    %492 = vector.broadcast %491 : f32 to vector<16x128xf32>
    %493 = arith.mulf %486, %492 : vector<16x128xf32>
    %494 = arith.addf %477, %493 : vector<16x128xf32>
    %c106 = arith.constant 106 : index
    %495 = memref.load %arg2[%c106] : memref<144xf32, #tpu.memory_space<smem>>
    %496 = vector.broadcast %495 : f32 to vector<16x128xf32>
    %497 = arith.mulf %486, %496 : vector<16x128xf32>
    %498 = arith.addf %481, %497 : vector<16x128xf32>
    %c107 = arith.constant 107 : index
    %499 = memref.load %arg2[%c107] : memref<144xf32, #tpu.memory_space<smem>>
    %500 = vector.broadcast %499 : f32 to vector<16x128xf32>
    %501 = arith.mulf %486, %500 : vector<16x128xf32>
    %502 = arith.addf %485, %501 : vector<16x128xf32>
    %503 = vector.extract_strided_slice %451 {offsets = [48, 0], sizes = [16, 128], strides = [1, 1]} : vector<64x128xf32> to vector<16x128xf32>
    %c108 = arith.constant 108 : index
    %504 = memref.load %arg2[%c108] : memref<144xf32, #tpu.memory_space<smem>>
    %505 = vector.broadcast %504 : f32 to vector<16x128xf32>
    %506 = arith.mulf %503, %505 : vector<16x128xf32>
    %507 = arith.addf %490, %506 : vector<16x128xf32>
    %c109 = arith.constant 109 : index
    %508 = memref.load %arg2[%c109] : memref<144xf32, #tpu.memory_space<smem>>
    %509 = vector.broadcast %508 : f32 to vector<16x128xf32>
    %510 = arith.mulf %503, %509 : vector<16x128xf32>
    %511 = arith.addf %494, %510 : vector<16x128xf32>
    %c110 = arith.constant 110 : index
    %512 = memref.load %arg2[%c110] : memref<144xf32, #tpu.memory_space<smem>>
    %513 = vector.broadcast %512 : f32 to vector<16x128xf32>
    %514 = arith.mulf %503, %513 : vector<16x128xf32>
    %515 = arith.addf %498, %514 : vector<16x128xf32>
    %c111 = arith.constant 111 : index
    %516 = memref.load %arg2[%c111] : memref<144xf32, #tpu.memory_space<smem>>
    %517 = vector.broadcast %516 : f32 to vector<16x128xf32>
    %518 = arith.mulf %503, %517 : vector<16x128xf32>
    %519 = arith.addf %502, %518 : vector<16x128xf32>
    %520 = vector.extract_strided_slice %448 {offsets = [0, 0], sizes = [16, 128], strides = [1, 1]} : vector<64x128xf32> to vector<16x128xf32>
    %c112 = arith.constant 112 : index
    %521 = memref.load %arg2[%c112] : memref<144xf32, #tpu.memory_space<smem>>
    %522 = vector.broadcast %521 : f32 to vector<16x128xf32>
    %523 = arith.mulf %520, %522 : vector<16x128xf32>
    %524 = arith.addf %507, %523 : vector<16x128xf32>
    %c113 = arith.constant 113 : index
    %525 = memref.load %arg2[%c113] : memref<144xf32, #tpu.memory_space<smem>>
    %526 = vector.broadcast %525 : f32 to vector<16x128xf32>
    %527 = arith.mulf %520, %526 : vector<16x128xf32>
    %528 = arith.addf %511, %527 : vector<16x128xf32>
    %c114 = arith.constant 114 : index
    %529 = memref.load %arg2[%c114] : memref<144xf32, #tpu.memory_space<smem>>
    %530 = vector.broadcast %529 : f32 to vector<16x128xf32>
    %531 = arith.mulf %520, %530 : vector<16x128xf32>
    %532 = arith.addf %515, %531 : vector<16x128xf32>
    %c115 = arith.constant 115 : index
    %533 = memref.load %arg2[%c115] : memref<144xf32, #tpu.memory_space<smem>>
    %534 = vector.broadcast %533 : f32 to vector<16x128xf32>
    %535 = arith.mulf %520, %534 : vector<16x128xf32>
    %536 = arith.addf %519, %535 : vector<16x128xf32>
    %537 = vector.extract_strided_slice %448 {offsets = [16, 0], sizes = [16, 128], strides = [1, 1]} : vector<64x128xf32> to vector<16x128xf32>
    %c116 = arith.constant 116 : index
    %538 = memref.load %arg2[%c116] : memref<144xf32, #tpu.memory_space<smem>>
    %539 = vector.broadcast %538 : f32 to vector<16x128xf32>
    %540 = arith.mulf %537, %539 : vector<16x128xf32>
    %541 = arith.addf %524, %540 : vector<16x128xf32>
    %c117 = arith.constant 117 : index
    %542 = memref.load %arg2[%c117] : memref<144xf32, #tpu.memory_space<smem>>
    %543 = vector.broadcast %542 : f32 to vector<16x128xf32>
    %544 = arith.mulf %537, %543 : vector<16x128xf32>
    %545 = arith.addf %528, %544 : vector<16x128xf32>
    %c118 = arith.constant 118 : index
    %546 = memref.load %arg2[%c118] : memref<144xf32, #tpu.memory_space<smem>>
    %547 = vector.broadcast %546 : f32 to vector<16x128xf32>
    %548 = arith.mulf %537, %547 : vector<16x128xf32>
    %549 = arith.addf %532, %548 : vector<16x128xf32>
    %c119 = arith.constant 119 : index
    %550 = memref.load %arg2[%c119] : memref<144xf32, #tpu.memory_space<smem>>
    %551 = vector.broadcast %550 : f32 to vector<16x128xf32>
    %552 = arith.mulf %537, %551 : vector<16x128xf32>
    %553 = arith.addf %536, %552 : vector<16x128xf32>
    %554 = vector.extract_strided_slice %448 {offsets = [32, 0], sizes = [16, 128], strides = [1, 1]} : vector<64x128xf32> to vector<16x128xf32>
    %c120 = arith.constant 120 : index
    %555 = memref.load %arg2[%c120] : memref<144xf32, #tpu.memory_space<smem>>
    %556 = vector.broadcast %555 : f32 to vector<16x128xf32>
    %557 = arith.mulf %554, %556 : vector<16x128xf32>
    %558 = arith.addf %541, %557 : vector<16x128xf32>
    %c121 = arith.constant 121 : index
    %559 = memref.load %arg2[%c121] : memref<144xf32, #tpu.memory_space<smem>>
    %560 = vector.broadcast %559 : f32 to vector<16x128xf32>
    %561 = arith.mulf %554, %560 : vector<16x128xf32>
    %562 = arith.addf %545, %561 : vector<16x128xf32>
    %c122 = arith.constant 122 : index
    %563 = memref.load %arg2[%c122] : memref<144xf32, #tpu.memory_space<smem>>
    %564 = vector.broadcast %563 : f32 to vector<16x128xf32>
    %565 = arith.mulf %554, %564 : vector<16x128xf32>
    %566 = arith.addf %549, %565 : vector<16x128xf32>
    %c123 = arith.constant 123 : index
    %567 = memref.load %arg2[%c123] : memref<144xf32, #tpu.memory_space<smem>>
    %568 = vector.broadcast %567 : f32 to vector<16x128xf32>
    %569 = arith.mulf %554, %568 : vector<16x128xf32>
    %570 = arith.addf %553, %569 : vector<16x128xf32>
    %571 = vector.extract_strided_slice %448 {offsets = [48, 0], sizes = [16, 128], strides = [1, 1]} : vector<64x128xf32> to vector<16x128xf32>
    %c124 = arith.constant 124 : index
    %572 = memref.load %arg2[%c124] : memref<144xf32, #tpu.memory_space<smem>>
    %573 = vector.broadcast %572 : f32 to vector<16x128xf32>
    %574 = arith.mulf %571, %573 : vector<16x128xf32>
    %575 = arith.addf %558, %574 : vector<16x128xf32>
    %c125 = arith.constant 125 : index
    %576 = memref.load %arg2[%c125] : memref<144xf32, #tpu.memory_space<smem>>
    %577 = vector.broadcast %576 : f32 to vector<16x128xf32>
    %578 = arith.mulf %571, %577 : vector<16x128xf32>
    %579 = arith.addf %562, %578 : vector<16x128xf32>
    %c126 = arith.constant 126 : index
    %580 = memref.load %arg2[%c126] : memref<144xf32, #tpu.memory_space<smem>>
    %581 = vector.broadcast %580 : f32 to vector<16x128xf32>
    %582 = arith.mulf %571, %581 : vector<16x128xf32>
    %583 = arith.addf %566, %582 : vector<16x128xf32>
    %c127 = arith.constant 127 : index
    %584 = memref.load %arg2[%c127] : memref<144xf32, #tpu.memory_space<smem>>
    %585 = vector.broadcast %584 : f32 to vector<16x128xf32>
    %586 = arith.mulf %571, %585 : vector<16x128xf32>
    %587 = arith.addf %570, %586 : vector<16x128xf32>
    %c120_i32_20 = arith.constant 120 : i32
    %588 = tpu.dynamic_rotate %448 by %c120_i32_20 dim 1 : vector<64x128xf32>, i32 -> vector<64x128xf32>
    %cst_21 = arith.constant 0.000000e+00 : f32
    %589 = vector.broadcast %cst_21 : f32 to vector<64x128xf32>
    %590 = arith.select %9, %588, %589 : vector<64x128xi1>, vector<64x128xf32>
    %591 = vector.extract_strided_slice %590 {offsets = [0, 0], sizes = [16, 128], strides = [1, 1]} : vector<64x128xf32> to vector<16x128xf32>
    %c128 = arith.constant 128 : index
    %592 = memref.load %arg2[%c128] : memref<144xf32, #tpu.memory_space<smem>>
    %593 = vector.broadcast %592 : f32 to vector<16x128xf32>
    %594 = arith.mulf %591, %593 : vector<16x128xf32>
    %595 = arith.addf %575, %594 : vector<16x128xf32>
    %c129 = arith.constant 129 : index
    %596 = memref.load %arg2[%c129] : memref<144xf32, #tpu.memory_space<smem>>
    %597 = vector.broadcast %596 : f32 to vector<16x128xf32>
    %598 = arith.mulf %591, %597 : vector<16x128xf32>
    %599 = arith.addf %579, %598 : vector<16x128xf32>
    %c130 = arith.constant 130 : index
    %600 = memref.load %arg2[%c130] : memref<144xf32, #tpu.memory_space<smem>>
    %601 = vector.broadcast %600 : f32 to vector<16x128xf32>
    %602 = arith.mulf %591, %601 : vector<16x128xf32>
    %603 = arith.addf %583, %602 : vector<16x128xf32>
    %c131 = arith.constant 131 : index
    %604 = memref.load %arg2[%c131] : memref<144xf32, #tpu.memory_space<smem>>
    %605 = vector.broadcast %604 : f32 to vector<16x128xf32>
    %606 = arith.mulf %591, %605 : vector<16x128xf32>
    %607 = arith.addf %587, %606 : vector<16x128xf32>
    %608 = vector.extract_strided_slice %590 {offsets = [16, 0], sizes = [16, 128], strides = [1, 1]} : vector<64x128xf32> to vector<16x128xf32>
    %c132 = arith.constant 132 : index
    %609 = memref.load %arg2[%c132] : memref<144xf32, #tpu.memory_space<smem>>
    %610 = vector.broadcast %609 : f32 to vector<16x128xf32>
    %611 = arith.mulf %608, %610 : vector<16x128xf32>
    %612 = arith.addf %595, %611 : vector<16x128xf32>
    %c133 = arith.constant 133 : index
    %613 = memref.load %arg2[%c133] : memref<144xf32, #tpu.memory_space<smem>>
    %614 = vector.broadcast %613 : f32 to vector<16x128xf32>
    %615 = arith.mulf %608, %614 : vector<16x128xf32>
    %616 = arith.addf %599, %615 : vector<16x128xf32>
    %c134 = arith.constant 134 : index
    %617 = memref.load %arg2[%c134] : memref<144xf32, #tpu.memory_space<smem>>
    %618 = vector.broadcast %617 : f32 to vector<16x128xf32>
    %619 = arith.mulf %608, %618 : vector<16x128xf32>
    %620 = arith.addf %603, %619 : vector<16x128xf32>
    %c135 = arith.constant 135 : index
    %621 = memref.load %arg2[%c135] : memref<144xf32, #tpu.memory_space<smem>>
    %622 = vector.broadcast %621 : f32 to vector<16x128xf32>
    %623 = arith.mulf %608, %622 : vector<16x128xf32>
    %624 = arith.addf %607, %623 : vector<16x128xf32>
    %625 = vector.extract_strided_slice %590 {offsets = [32, 0], sizes = [16, 128], strides = [1, 1]} : vector<64x128xf32> to vector<16x128xf32>
    %c136 = arith.constant 136 : index
    %626 = memref.load %arg2[%c136] : memref<144xf32, #tpu.memory_space<smem>>
    %627 = vector.broadcast %626 : f32 to vector<16x128xf32>
    %628 = arith.mulf %625, %627 : vector<16x128xf32>
    %629 = arith.addf %612, %628 : vector<16x128xf32>
    %c137 = arith.constant 137 : index
    %630 = memref.load %arg2[%c137] : memref<144xf32, #tpu.memory_space<smem>>
    %631 = vector.broadcast %630 : f32 to vector<16x128xf32>
    %632 = arith.mulf %625, %631 : vector<16x128xf32>
    %633 = arith.addf %616, %632 : vector<16x128xf32>
    %c138 = arith.constant 138 : index
    %634 = memref.load %arg2[%c138] : memref<144xf32, #tpu.memory_space<smem>>
    %635 = vector.broadcast %634 : f32 to vector<16x128xf32>
    %636 = arith.mulf %625, %635 : vector<16x128xf32>
    %637 = arith.addf %620, %636 : vector<16x128xf32>
    %c139 = arith.constant 139 : index
    %638 = memref.load %arg2[%c139] : memref<144xf32, #tpu.memory_space<smem>>
    %639 = vector.broadcast %638 : f32 to vector<16x128xf32>
    %640 = arith.mulf %625, %639 : vector<16x128xf32>
    %641 = arith.addf %624, %640 : vector<16x128xf32>
    %642 = vector.extract_strided_slice %590 {offsets = [48, 0], sizes = [16, 128], strides = [1, 1]} : vector<64x128xf32> to vector<16x128xf32>
    %c140 = arith.constant 140 : index
    %643 = memref.load %arg2[%c140] : memref<144xf32, #tpu.memory_space<smem>>
    %644 = vector.broadcast %643 : f32 to vector<16x128xf32>
    %645 = arith.mulf %642, %644 : vector<16x128xf32>
    %646 = arith.addf %629, %645 : vector<16x128xf32>
    %c141 = arith.constant 141 : index
    %647 = memref.load %arg2[%c141] : memref<144xf32, #tpu.memory_space<smem>>
    %648 = vector.broadcast %647 : f32 to vector<16x128xf32>
    %649 = arith.mulf %642, %648 : vector<16x128xf32>
    %650 = arith.addf %633, %649 : vector<16x128xf32>
    %c142 = arith.constant 142 : index
    %651 = memref.load %arg2[%c142] : memref<144xf32, #tpu.memory_space<smem>>
    %652 = vector.broadcast %651 : f32 to vector<16x128xf32>
    %653 = arith.mulf %642, %652 : vector<16x128xf32>
    %654 = arith.addf %637, %653 : vector<16x128xf32>
    %c143 = arith.constant 143 : index
    %655 = memref.load %arg2[%c143] : memref<144xf32, #tpu.memory_space<smem>>
    %656 = vector.broadcast %655 : f32 to vector<16x128xf32>
    %657 = arith.mulf %642, %656 : vector<16x128xf32>
    %658 = arith.addf %641, %657 : vector<16x128xf32>
    %c0_22 = arith.constant 0 : index
    %c0_23 = arith.constant 0 : index
    %c0_24 = arith.constant 0 : index
    %c0_25 = arith.constant 0 : index
    %659 = vector.load %arg4[%c0_22, %c0_23, %c0_24, %c0_25] : memref<2x4x16x128xf32, #tpu.memory_space<vmem>>, vector<1x1x16x128xf32>
    %660 = vector.shape_cast %659 : vector<1x1x16x128xf32> to vector<16x128xf32>
    %661 = vector.shape_cast %646 : vector<16x128xf32> to vector<1x1x16x128xf32>
    tpu.vector_store %arg4[%c0_22, %c0_23, %c0_24, %c0_25], %661 {strides = array<i32>} : memref<2x4x16x128xf32, #tpu.memory_space<vmem>>, vector<1x1x16x128xf32>,
    %c0_26 = arith.constant 0 : index
    %c1_27 = arith.constant 1 : index
    %c0_28 = arith.constant 0 : index
    %c0_29 = arith.constant 0 : index
    %662 = vector.load %arg4[%c0_26, %c1_27, %c0_28, %c0_29] : memref<2x4x16x128xf32, #tpu.memory_space<vmem>>, vector<1x1x16x128xf32>
    %663 = vector.shape_cast %662 : vector<1x1x16x128xf32> to vector<16x128xf32>
    %664 = vector.shape_cast %650 : vector<16x128xf32> to vector<1x1x16x128xf32>
    tpu.vector_store %arg4[%c0_26, %c1_27, %c0_28, %c0_29], %664 {strides = array<i32>} : memref<2x4x16x128xf32, #tpu.memory_space<vmem>>, vector<1x1x16x128xf32>,
    %c0_30 = arith.constant 0 : index
    %c2_31 = arith.constant 2 : index
    %c0_32 = arith.constant 0 : index
    %c0_33 = arith.constant 0 : index
    %665 = vector.load %arg4[%c0_30, %c2_31, %c0_32, %c0_33] : memref<2x4x16x128xf32, #tpu.memory_space<vmem>>, vector<1x1x16x128xf32>
    %666 = vector.shape_cast %665 : vector<1x1x16x128xf32> to vector<16x128xf32>
    %667 = vector.shape_cast %654 : vector<16x128xf32> to vector<1x1x16x128xf32>
    tpu.vector_store %arg4[%c0_30, %c2_31, %c0_32, %c0_33], %667 {strides = array<i32>} : memref<2x4x16x128xf32, #tpu.memory_space<vmem>>, vector<1x1x16x128xf32>,
    %c0_34 = arith.constant 0 : index
    %c3_35 = arith.constant 3 : index
    %c0_36 = arith.constant 0 : index
    %c0_37 = arith.constant 0 : index
    %668 = vector.load %arg4[%c0_34, %c3_35, %c0_36, %c0_37] : memref<2x4x16x128xf32, #tpu.memory_space<vmem>>, vector<1x1x16x128xf32>
    %669 = vector.shape_cast %668 : vector<1x1x16x128xf32> to vector<16x128xf32>
    %670 = vector.shape_cast %658 : vector<16x128xf32> to vector<1x1x16x128xf32>
    tpu.vector_store %arg4[%c0_34, %c3_35, %c0_36, %c0_37], %670 {strides = array<i32>} : memref<2x4x16x128xf32, #tpu.memory_space<vmem>>, vector<1x1x16x128xf32>,
    %c1_38 = arith.constant 1 : index
    %c0_39 = arith.constant 0 : index
    %c0_40 = arith.constant 0 : index
    %c0_41 = arith.constant 0 : index
    %671 = vector.load %arg1[%c1_38, %c0_39, %c0_40, %c0_41] : memref<2x4x16x128xf32, #tpu.memory_space<vmem>>, vector<1x4x16x128xf32>
    %672 = vector.shape_cast %671 : vector<1x4x16x128xf32> to vector<4x16x128xf32>
    %673 = vector.shape_cast %672 : vector<4x16x128xf32> to vector<64x128xf32>
    %c1_i32_42 = arith.constant 1 : i32
    %674 = tpu.dynamic_rotate %673 by %c1_i32_42 dim 0 : vector<64x128xf32>, i32 -> vector<64x128xf32>
    %cst_43 = arith.constant 0.000000e+00 : f32
    %675 = vector.broadcast %cst_43 : f32 to vector<64x128xf32>
    %676 = arith.select %7, %674, %675 : vector<64x128xi1>, vector<64x128xf32>
    %c8_i32_44 = arith.constant 8 : i32
    %677 = tpu.dynamic_rotate %676 by %c8_i32_44 dim 1 : vector<64x128xf32>, i32 -> vector<64x128xf32>
    %cst_45 = arith.constant 0.000000e+00 : f32
    %678 = vector.broadcast %cst_45 : f32 to vector<64x128xf32>
    %679 = arith.select %11, %677, %678 : vector<64x128xi1>, vector<64x128xf32>
    %680 = vector.extract_strided_slice %679 {offsets = [0, 0], sizes = [16, 128], strides = [1, 1]} : vector<64x128xf32> to vector<16x128xf32>
    %c0_46 = arith.constant 0 : index
    %681 = memref.load %arg2[%c0_46] : memref<144xf32, #tpu.memory_space<smem>>
    %682 = vector.broadcast %681 : f32 to vector<16x128xf32>
    %683 = arith.mulf %680, %682 : vector<16x128xf32>
    %c0_47 = arith.constant 0 : index
    %684 = memref.load %arg3[%c0_47] : memref<4xf32, #tpu.memory_space<smem>>
    %685 = vector.broadcast %684 : f32 to vector<16x128xf32>
    %686 = arith.addf %683, %685 : vector<16x128xf32>
    %c1_48 = arith.constant 1 : index
    %687 = memref.load %arg2[%c1_48] : memref<144xf32, #tpu.memory_space<smem>>
    %688 = vector.broadcast %687 : f32 to vector<16x128xf32>
    %689 = arith.mulf %680, %688 : vector<16x128xf32>
    %c1_49 = arith.constant 1 : index
    %690 = memref.load %arg3[%c1_49] : memref<4xf32, #tpu.memory_space<smem>>
    %691 = vector.broadcast %690 : f32 to vector<16x128xf32>
    %692 = arith.addf %689, %691 : vector<16x128xf32>
    %c2_50 = arith.constant 2 : index
    %693 = memref.load %arg2[%c2_50] : memref<144xf32, #tpu.memory_space<smem>>
    %694 = vector.broadcast %693 : f32 to vector<16x128xf32>
    %695 = arith.mulf %680, %694 : vector<16x128xf32>
    %c2_51 = arith.constant 2 : index
    %696 = memref.load %arg3[%c2_51] : memref<4xf32, #tpu.memory_space<smem>>
    %697 = vector.broadcast %696 : f32 to vector<16x128xf32>
    %698 = arith.addf %695, %697 : vector<16x128xf32>
    %c3_52 = arith.constant 3 : index
    %699 = memref.load %arg2[%c3_52] : memref<144xf32, #tpu.memory_space<smem>>
    %700 = vector.broadcast %699 : f32 to vector<16x128xf32>
    %701 = arith.mulf %680, %700 : vector<16x128xf32>
    %c3_53 = arith.constant 3 : index
    %702 = memref.load %arg3[%c3_53] : memref<4xf32, #tpu.memory_space<smem>>
    %703 = vector.broadcast %702 : f32 to vector<16x128xf32>
    %704 = arith.addf %701, %703 : vector<16x128xf32>
    %705 = vector.extract_strided_slice %679 {offsets = [16, 0], sizes = [16, 128], strides = [1, 1]} : vector<64x128xf32> to vector<16x128xf32>
    %c4_54 = arith.constant 4 : index
    %706 = memref.load %arg2[%c4_54] : memref<144xf32, #tpu.memory_space<smem>>
    %707 = vector.broadcast %706 : f32 to vector<16x128xf32>
    %708 = arith.mulf %705, %707 : vector<16x128xf32>
    %709 = arith.addf %686, %708 : vector<16x128xf32>
    %c5_55 = arith.constant 5 : index
    %710 = memref.load %arg2[%c5_55] : memref<144xf32, #tpu.memory_space<smem>>
    %711 = vector.broadcast %710 : f32 to vector<16x128xf32>
    %712 = arith.mulf %705, %711 : vector<16x128xf32>
    %713 = arith.addf %692, %712 : vector<16x128xf32>
    %c6_56 = arith.constant 6 : index
    %714 = memref.load %arg2[%c6_56] : memref<144xf32, #tpu.memory_space<smem>>
    %715 = vector.broadcast %714 : f32 to vector<16x128xf32>
    %716 = arith.mulf %705, %715 : vector<16x128xf32>
    %717 = arith.addf %698, %716 : vector<16x128xf32>
    %c7_57 = arith.constant 7 : index
    %718 = memref.load %arg2[%c7_57] : memref<144xf32, #tpu.memory_space<smem>>
    %719 = vector.broadcast %718 : f32 to vector<16x128xf32>
    %720 = arith.mulf %705, %719 : vector<16x128xf32>
    %721 = arith.addf %704, %720 : vector<16x128xf32>
    %722 = vector.extract_strided_slice %679 {offsets = [32, 0], sizes = [16, 128], strides = [1, 1]} : vector<64x128xf32> to vector<16x128xf32>
    %c8_58 = arith.constant 8 : index
    %723 = memref.load %arg2[%c8_58] : memref<144xf32, #tpu.memory_space<smem>>
    %724 = vector.broadcast %723 : f32 to vector<16x128xf32>
    %725 = arith.mulf %722, %724 : vector<16x128xf32>
    %726 = arith.addf %709, %725 : vector<16x128xf32>
    %c9_59 = arith.constant 9 : index
    %727 = memref.load %arg2[%c9_59] : memref<144xf32, #tpu.memory_space<smem>>
    %728 = vector.broadcast %727 : f32 to vector<16x128xf32>
    %729 = arith.mulf %722, %728 : vector<16x128xf32>
    %730 = arith.addf %713, %729 : vector<16x128xf32>
    %c10_60 = arith.constant 10 : index
    %731 = memref.load %arg2[%c10_60] : memref<144xf32, #tpu.memory_space<smem>>
    %732 = vector.broadcast %731 : f32 to vector<16x128xf32>
    %733 = arith.mulf %722, %732 : vector<16x128xf32>
    %734 = arith.addf %717, %733 : vector<16x128xf32>
    %c11_61 = arith.constant 11 : index
    %735 = memref.load %arg2[%c11_61] : memref<144xf32, #tpu.memory_space<smem>>
    %736 = vector.broadcast %735 : f32 to vector<16x128xf32>
    %737 = arith.mulf %722, %736 : vector<16x128xf32>
    %738 = arith.addf %721, %737 : vector<16x128xf32>
    %739 = vector.extract_strided_slice %679 {offsets = [48, 0], sizes = [16, 128], strides = [1, 1]} : vector<64x128xf32> to vector<16x128xf32>
    %c12_62 = arith.constant 12 : index
    %740 = memref.load %arg2[%c12_62] : memref<144xf32, #tpu.memory_space<smem>>
    %741 = vector.broadcast %740 : f32 to vector<16x128xf32>
    %742 = arith.mulf %739, %741 : vector<16x128xf32>
    %743 = arith.addf %726, %742 : vector<16x128xf32>
    %c13_63 = arith.constant 13 : index
    %744 = memref.load %arg2[%c13_63] : memref<144xf32, #tpu.memory_space<smem>>
    %745 = vector.broadcast %744 : f32 to vector<16x128xf32>
    %746 = arith.mulf %739, %745 : vector<16x128xf32>
    %747 = arith.addf %730, %746 : vector<16x128xf32>
    %c14_64 = arith.constant 14 : index
    %748 = memref.load %arg2[%c14_64] : memref<144xf32, #tpu.memory_space<smem>>
    %749 = vector.broadcast %748 : f32 to vector<16x128xf32>
    %750 = arith.mulf %739, %749 : vector<16x128xf32>
    %751 = arith.addf %734, %750 : vector<16x128xf32>
    %c15_65 = arith.constant 15 : index
    %752 = memref.load %arg2[%c15_65] : memref<144xf32, #tpu.memory_space<smem>>
    %753 = vector.broadcast %752 : f32 to vector<16x128xf32>
    %754 = arith.mulf %739, %753 : vector<16x128xf32>
    %755 = arith.addf %738, %754 : vector<16x128xf32>
    %756 = vector.extract_strided_slice %676 {offsets = [0, 0], sizes = [16, 128], strides = [1, 1]} : vector<64x128xf32> to vector<16x128xf32>
    %c16_66 = arith.constant 16 : index
    %757 = memref.load %arg2[%c16_66] : memref<144xf32, #tpu.memory_space<smem>>
    %758 = vector.broadcast %757 : f32 to vector<16x128xf32>
    %759 = arith.mulf %756, %758 : vector<16x128xf32>
    %760 = arith.addf %743, %759 : vector<16x128xf32>
    %c17_67 = arith.constant 17 : index
    %761 = memref.load %arg2[%c17_67] : memref<144xf32, #tpu.memory_space<smem>>
    %762 = vector.broadcast %761 : f32 to vector<16x128xf32>
    %763 = arith.mulf %756, %762 : vector<16x128xf32>
    %764 = arith.addf %747, %763 : vector<16x128xf32>
    %c18_68 = arith.constant 18 : index
    %765 = memref.load %arg2[%c18_68] : memref<144xf32, #tpu.memory_space<smem>>
    %766 = vector.broadcast %765 : f32 to vector<16x128xf32>
    %767 = arith.mulf %756, %766 : vector<16x128xf32>
    %768 = arith.addf %751, %767 : vector<16x128xf32>
    %c19_69 = arith.constant 19 : index
    %769 = memref.load %arg2[%c19_69] : memref<144xf32, #tpu.memory_space<smem>>
    %770 = vector.broadcast %769 : f32 to vector<16x128xf32>
    %771 = arith.mulf %756, %770 : vector<16x128xf32>
    %772 = arith.addf %755, %771 : vector<16x128xf32>
    %773 = vector.extract_strided_slice %676 {offsets = [16, 0], sizes = [16, 128], strides = [1, 1]} : vector<64x128xf32> to vector<16x128xf32>
    %c20_70 = arith.constant 20 : index
    %774 = memref.load %arg2[%c20_70] : memref<144xf32, #tpu.memory_space<smem>>
    %775 = vector.broadcast %774 : f32 to vector<16x128xf32>
    %776 = arith.mulf %773, %775 : vector<16x128xf32>
    %777 = arith.addf %760, %776 : vector<16x128xf32>
    %c21_71 = arith.constant 21 : index
    %778 = memref.load %arg2[%c21_71] : memref<144xf32, #tpu.memory_space<smem>>
    %779 = vector.broadcast %778 : f32 to vector<16x128xf32>
    %780 = arith.mulf %773, %779 : vector<16x128xf32>
    %781 = arith.addf %764, %780 : vector<16x128xf32>
    %c22_72 = arith.constant 22 : index
    %782 = memref.load %arg2[%c22_72] : memref<144xf32, #tpu.memory_space<smem>>
    %783 = vector.broadcast %782 : f32 to vector<16x128xf32>
    %784 = arith.mulf %773, %783 : vector<16x128xf32>
    %785 = arith.addf %768, %784 : vector<16x128xf32>
    %c23_73 = arith.constant 23 : index
    %786 = memref.load %arg2[%c23_73] : memref<144xf32, #tpu.memory_space<smem>>
    %787 = vector.broadcast %786 : f32 to vector<16x128xf32>
    %788 = arith.mulf %773, %787 : vector<16x128xf32>
    %789 = arith.addf %772, %788 : vector<16x128xf32>
    %790 = vector.extract_strided_slice %676 {offsets = [32, 0], sizes = [16, 128], strides = [1, 1]} : vector<64x128xf32> to vector<16x128xf32>
    %c24_74 = arith.constant 24 : index
    %791 = memref.load %arg2[%c24_74] : memref<144xf32, #tpu.memory_space<smem>>
    %792 = vector.broadcast %791 : f32 to vector<16x128xf32>
    %793 = arith.mulf %790, %792 : vector<16x128xf32>
    %794 = arith.addf %777, %793 : vector<16x128xf32>
    %c25_75 = arith.constant 25 : index
    %795 = memref.load %arg2[%c25_75] : memref<144xf32, #tpu.memory_space<smem>>
    %796 = vector.broadcast %795 : f32 to vector<16x128xf32>
    %797 = arith.mulf %790, %796 : vector<16x128xf32>
    %798 = arith.addf %781, %797 : vector<16x128xf32>
    %c26_76 = arith.constant 26 : index
    %799 = memref.load %arg2[%c26_76] : memref<144xf32, #tpu.memory_space<smem>>
    %800 = vector.broadcast %799 : f32 to vector<16x128xf32>
    %801 = arith.mulf %790, %800 : vector<16x128xf32>
    %802 = arith.addf %785, %801 : vector<16x128xf32>
    %c27_77 = arith.constant 27 : index
    %803 = memref.load %arg2[%c27_77] : memref<144xf32, #tpu.memory_space<smem>>
    %804 = vector.broadcast %803 : f32 to vector<16x128xf32>
    %805 = arith.mulf %790, %804 : vector<16x128xf32>
    %806 = arith.addf %789, %805 : vector<16x128xf32>
    %807 = vector.extract_strided_slice %676 {offsets = [48, 0], sizes = [16, 128], strides = [1, 1]} : vector<64x128xf32> to vector<16x128xf32>
    %c28_78 = arith.constant 28 : index
    %808 = memref.load %arg2[%c28_78] : memref<144xf32, #tpu.memory_space<smem>>
    %809 = vector.broadcast %808 : f32 to vector<16x128xf32>
    %810 = arith.mulf %807, %809 : vector<16x128xf32>
    %811 = arith.addf %794, %810 : vector<16x128xf32>
    %c29_79 = arith.constant 29 : index
    %812 = memref.load %arg2[%c29_79] : memref<144xf32, #tpu.memory_space<smem>>
    %813 = vector.broadcast %812 : f32 to vector<16x128xf32>
    %814 = arith.mulf %807, %813 : vector<16x128xf32>
    %815 = arith.addf %798, %814 : vector<16x128xf32>
    %c30_80 = arith.constant 30 : index
    %816 = memref.load %arg2[%c30_80] : memref<144xf32, #tpu.memory_space<smem>>
    %817 = vector.broadcast %816 : f32 to vector<16x128xf32>
    %818 = arith.mulf %807, %817 : vector<16x128xf32>
    %819 = arith.addf %802, %818 : vector<16x128xf32>
    %c31_81 = arith.constant 31 : index
    %820 = memref.load %arg2[%c31_81] : memref<144xf32, #tpu.memory_space<smem>>
    %821 = vector.broadcast %820 : f32 to vector<16x128xf32>
    %822 = arith.mulf %807, %821 : vector<16x128xf32>
    %823 = arith.addf %806, %822 : vector<16x128xf32>
    %c120_i32_82 = arith.constant 120 : i32
    %824 = tpu.dynamic_rotate %676 by %c120_i32_82 dim 1 : vector<64x128xf32>, i32 -> vector<64x128xf32>
    %cst_83 = arith.constant 0.000000e+00 : f32
    %825 = vector.broadcast %cst_83 : f32 to vector<64x128xf32>
    %826 = arith.select %9, %824, %825 : vector<64x128xi1>, vector<64x128xf32>
    %827 = vector.extract_strided_slice %826 {offsets = [0, 0], sizes = [16, 128], strides = [1, 1]} : vector<64x128xf32> to vector<16x128xf32>
    %c32_84 = arith.constant 32 : index
    %828 = memref.load %arg2[%c32_84] : memref<144xf32, #tpu.memory_space<smem>>
    %829 = vector.broadcast %828 : f32 to vector<16x128xf32>
    %830 = arith.mulf %827, %829 : vector<16x128xf32>
    %831 = arith.addf %811, %830 : vector<16x128xf32>
    %c33_85 = arith.constant 33 : index
    %832 = memref.load %arg2[%c33_85] : memref<144xf32, #tpu.memory_space<smem>>
    %833 = vector.broadcast %832 : f32 to vector<16x128xf32>
    %834 = arith.mulf %827, %833 : vector<16x128xf32>
    %835 = arith.addf %815, %834 : vector<16x128xf32>
    %c34_86 = arith.constant 34 : index
    %836 = memref.load %arg2[%c34_86] : memref<144xf32, #tpu.memory_space<smem>>
    %837 = vector.broadcast %836 : f32 to vector<16x128xf32>
    %838 = arith.mulf %827, %837 : vector<16x128xf32>
    %839 = arith.addf %819, %838 : vector<16x128xf32>
    %c35_87 = arith.constant 35 : index
    %840 = memref.load %arg2[%c35_87] : memref<144xf32, #tpu.memory_space<smem>>
    %841 = vector.broadcast %840 : f32 to vector<16x128xf32>
    %842 = arith.mulf %827, %841 : vector<16x128xf32>
    %843 = arith.addf %823, %842 : vector<16x128xf32>
    %844 = vector.extract_strided_slice %826 {offsets = [16, 0], sizes = [16, 128], strides = [1, 1]} : vector<64x128xf32> to vector<16x128xf32>
    %c36_88 = arith.constant 36 : index
    %845 = memref.load %arg2[%c36_88] : memref<144xf32, #tpu.memory_space<smem>>
    %846 = vector.broadcast %845 : f32 to vector<16x128xf32>
    %847 = arith.mulf %844, %846 : vector<16x128xf32>
    %848 = arith.addf %831, %847 : vector<16x128xf32>
    %c37_89 = arith.constant 37 : index
    %849 = memref.load %arg2[%c37_89] : memref<144xf32, #tpu.memory_space<smem>>
    %850 = vector.broadcast %849 : f32 to vector<16x128xf32>
    %851 = arith.mulf %844, %850 : vector<16x128xf32>
    %852 = arith.addf %835, %851 : vector<16x128xf32>
    %c38_90 = arith.constant 38 : index
    %853 = memref.load %arg2[%c38_90] : memref<144xf32, #tpu.memory_space<smem>>
    %854 = vector.broadcast %853 : f32 to vector<16x128xf32>
    %855 = arith.mulf %844, %854 : vector<16x128xf32>
    %856 = arith.addf %839, %855 : vector<16x128xf32>
    %c39_91 = arith.constant 39 : index
    %857 = memref.load %arg2[%c39_91] : memref<144xf32, #tpu.memory_space<smem>>
    %858 = vector.broadcast %857 : f32 to vector<16x128xf32>
    %859 = arith.mulf %844, %858 : vector<16x128xf32>
    %860 = arith.addf %843, %859 : vector<16x128xf32>
    %861 = vector.extract_strided_slice %826 {offsets = [32, 0], sizes = [16, 128], strides = [1, 1]} : vector<64x128xf32> to vector<16x128xf32>
    %c40_92 = arith.constant 40 : index
    %862 = memref.load %arg2[%c40_92] : memref<144xf32, #tpu.memory_space<smem>>
    %863 = vector.broadcast %862 : f32 to vector<16x128xf32>
    %864 = arith.mulf %861, %863 : vector<16x128xf32>
    %865 = arith.addf %848, %864 : vector<16x128xf32>
    %c41_93 = arith.constant 41 : index
    %866 = memref.load %arg2[%c41_93] : memref<144xf32, #tpu.memory_space<smem>>
    %867 = vector.broadcast %866 : f32 to vector<16x128xf32>
    %868 = arith.mulf %861, %867 : vector<16x128xf32>
    %869 = arith.addf %852, %868 : vector<16x128xf32>
    %c42_94 = arith.constant 42 : index
    %870 = memref.load %arg2[%c42_94] : memref<144xf32, #tpu.memory_space<smem>>
    %871 = vector.broadcast %870 : f32 to vector<16x128xf32>
    %872 = arith.mulf %861, %871 : vector<16x128xf32>
    %873 = arith.addf %856, %872 : vector<16x128xf32>
    %c43_95 = arith.constant 43 : index
    %874 = memref.load %arg2[%c43_95] : memref<144xf32, #tpu.memory_space<smem>>
    %875 = vector.broadcast %874 : f32 to vector<16x128xf32>
    %876 = arith.mulf %861, %875 : vector<16x128xf32>
    %877 = arith.addf %860, %876 : vector<16x128xf32>
    %878 = vector.extract_strided_slice %826 {offsets = [48, 0], sizes = [16, 128], strides = [1, 1]} : vector<64x128xf32> to vector<16x128xf32>
    %c44_96 = arith.constant 44 : index
    %879 = memref.load %arg2[%c44_96] : memref<144xf32, #tpu.memory_space<smem>>
    %880 = vector.broadcast %879 : f32 to vector<16x128xf32>
    %881 = arith.mulf %878, %880 : vector<16x128xf32>
    %882 = arith.addf %865, %881 : vector<16x128xf32>
    %c45_97 = arith.constant 45 : index
    %883 = memref.load %arg2[%c45_97] : memref<144xf32, #tpu.memory_space<smem>>
    %884 = vector.broadcast %883 : f32 to vector<16x128xf32>
    %885 = arith.mulf %878, %884 : vector<16x128xf32>
    %886 = arith.addf %869, %885 : vector<16x128xf32>
    %c46_98 = arith.constant 46 : index
    %887 = memref.load %arg2[%c46_98] : memref<144xf32, #tpu.memory_space<smem>>
    %888 = vector.broadcast %887 : f32 to vector<16x128xf32>
    %889 = arith.mulf %878, %888 : vector<16x128xf32>
    %890 = arith.addf %873, %889 : vector<16x128xf32>
    %c47_99 = arith.constant 47 : index
    %891 = memref.load %arg2[%c47_99] : memref<144xf32, #tpu.memory_space<smem>>
    %892 = vector.broadcast %891 : f32 to vector<16x128xf32>
    %893 = arith.mulf %878, %892 : vector<16x128xf32>
    %894 = arith.addf %877, %893 : vector<16x128xf32>
    %c8_i32_100 = arith.constant 8 : i32
    %895 = tpu.dynamic_rotate %673 by %c8_i32_100 dim 1 : vector<64x128xf32>, i32 -> vector<64x128xf32>
    %cst_101 = arith.constant 0.000000e+00 : f32
    %896 = vector.broadcast %cst_101 : f32 to vector<64x128xf32>
    %897 = arith.select %11, %895, %896 : vector<64x128xi1>, vector<64x128xf32>
    %898 = vector.extract_strided_slice %897 {offsets = [0, 0], sizes = [16, 128], strides = [1, 1]} : vector<64x128xf32> to vector<16x128xf32>
    %c48_102 = arith.constant 48 : index
    %899 = memref.load %arg2[%c48_102] : memref<144xf32, #tpu.memory_space<smem>>
    %900 = vector.broadcast %899 : f32 to vector<16x128xf32>
    %901 = arith.mulf %898, %900 : vector<16x128xf32>
    %902 = arith.addf %882, %901 : vector<16x128xf32>
    %c49_103 = arith.constant 49 : index
    %903 = memref.load %arg2[%c49_103] : memref<144xf32, #tpu.memory_space<smem>>
    %904 = vector.broadcast %903 : f32 to vector<16x128xf32>
    %905 = arith.mulf %898, %904 : vector<16x128xf32>
    %906 = arith.addf %886, %905 : vector<16x128xf32>
    %c50_104 = arith.constant 50 : index
    %907 = memref.load %arg2[%c50_104] : memref<144xf32, #tpu.memory_space<smem>>
    %908 = vector.broadcast %907 : f32 to vector<16x128xf32>
    %909 = arith.mulf %898, %908 : vector<16x128xf32>
    %910 = arith.addf %890, %909 : vector<16x128xf32>
    %c51_105 = arith.constant 51 : index
    %911 = memref.load %arg2[%c51_105] : memref<144xf32, #tpu.memory_space<smem>>
    %912 = vector.broadcast %911 : f32 to vector<16x128xf32>
    %913 = arith.mulf %898, %912 : vector<16x128xf32>
    %914 = arith.addf %894, %913 : vector<16x128xf32>
    %915 = vector.extract_strided_slice %897 {offsets = [16, 0], sizes = [16, 128], strides = [1, 1]} : vector<64x128xf32> to vector<16x128xf32>
    %c52_106 = arith.constant 52 : index
    %916 = memref.load %arg2[%c52_106] : memref<144xf32, #tpu.memory_space<smem>>
    %917 = vector.broadcast %916 : f32 to vector<16x128xf32>
    %918 = arith.mulf %915, %917 : vector<16x128xf32>
    %919 = arith.addf %902, %918 : vector<16x128xf32>
    %c53_107 = arith.constant 53 : index
    %920 = memref.load %arg2[%c53_107] : memref<144xf32, #tpu.memory_space<smem>>
    %921 = vector.broadcast %920 : f32 to vector<16x128xf32>
    %922 = arith.mulf %915, %921 : vector<16x128xf32>
    %923 = arith.addf %906, %922 : vector<16x128xf32>
    %c54_108 = arith.constant 54 : index
    %924 = memref.load %arg2[%c54_108] : memref<144xf32, #tpu.memory_space<smem>>
    %925 = vector.broadcast %924 : f32 to vector<16x128xf32>
    %926 = arith.mulf %915, %925 : vector<16x128xf32>
    %927 = arith.addf %910, %926 : vector<16x128xf32>
    %c55_109 = arith.constant 55 : index
    %928 = memref.load %arg2[%c55_109] : memref<144xf32, #tpu.memory_space<smem>>
    %929 = vector.broadcast %928 : f32 to vector<16x128xf32>
    %930 = arith.mulf %915, %929 : vector<16x128xf32>
    %931 = arith.addf %914, %930 : vector<16x128xf32>
    %932 = vector.extract_strided_slice %897 {offsets = [32, 0], sizes = [16, 128], strides = [1, 1]} : vector<64x128xf32> to vector<16x128xf32>
    %c56_110 = arith.constant 56 : index
    %933 = memref.load %arg2[%c56_110] : memref<144xf32, #tpu.memory_space<smem>>
    %934 = vector.broadcast %933 : f32 to vector<16x128xf32>
    %935 = arith.mulf %932, %934 : vector<16x128xf32>
    %936 = arith.addf %919, %935 : vector<16x128xf32>
    %c57_111 = arith.constant 57 : index
    %937 = memref.load %arg2[%c57_111] : memref<144xf32, #tpu.memory_space<smem>>
    %938 = vector.broadcast %937 : f32 to vector<16x128xf32>
    %939 = arith.mulf %932, %938 : vector<16x128xf32>
    %940 = arith.addf %923, %939 : vector<16x128xf32>
    %c58_112 = arith.constant 58 : index
    %941 = memref.load %arg2[%c58_112] : memref<144xf32, #tpu.memory_space<smem>>
    %942 = vector.broadcast %941 : f32 to vector<16x128xf32>
    %943 = arith.mulf %932, %942 : vector<16x128xf32>
    %944 = arith.addf %927, %943 : vector<16x128xf32>
    %c59_113 = arith.constant 59 : index
    %945 = memref.load %arg2[%c59_113] : memref<144xf32, #tpu.memory_space<smem>>
    %946 = vector.broadcast %945 : f32 to vector<16x128xf32>
    %947 = arith.mulf %932, %946 : vector<16x128xf32>
    %948 = arith.addf %931, %947 : vector<16x128xf32>
    %949 = vector.extract_strided_slice %897 {offsets = [48, 0], sizes = [16, 128], strides = [1, 1]} : vector<64x128xf32> to vector<16x128xf32>
    %c60_114 = arith.constant 60 : index
    %950 = memref.load %arg2[%c60_114] : memref<144xf32, #tpu.memory_space<smem>>
    %951 = vector.broadcast %950 : f32 to vector<16x128xf32>
    %952 = arith.mulf %949, %951 : vector<16x128xf32>
    %953 = arith.addf %936, %952 : vector<16x128xf32>
    %c61_115 = arith.constant 61 : index
    %954 = memref.load %arg2[%c61_115] : memref<144xf32, #tpu.memory_space<smem>>
    %955 = vector.broadcast %954 : f32 to vector<16x128xf32>
    %956 = arith.mulf %949, %955 : vector<16x128xf32>
    %957 = arith.addf %940, %956 : vector<16x128xf32>
    %c62_116 = arith.constant 62 : index
    %958 = memref.load %arg2[%c62_116] : memref<144xf32, #tpu.memory_space<smem>>
    %959 = vector.broadcast %958 : f32 to vector<16x128xf32>
    %960 = arith.mulf %949, %959 : vector<16x128xf32>
    %961 = arith.addf %944, %960 : vector<16x128xf32>
    %c63_117 = arith.constant 63 : index
    %962 = memref.load %arg2[%c63_117] : memref<144xf32, #tpu.memory_space<smem>>
    %963 = vector.broadcast %962 : f32 to vector<16x128xf32>
    %964 = arith.mulf %949, %963 : vector<16x128xf32>
    %965 = arith.addf %948, %964 : vector<16x128xf32>
    %966 = vector.extract_strided_slice %673 {offsets = [0, 0], sizes = [16, 128], strides = [1, 1]} : vector<64x128xf32> to vector<16x128xf32>
    %c64_118 = arith.constant 64 : index
    %967 = memref.load %arg2[%c64_118] : memref<144xf32, #tpu.memory_space<smem>>
    %968 = vector.broadcast %967 : f32 to vector<16x128xf32>
    %969 = arith.mulf %966, %968 : vector<16x128xf32>
    %970 = arith.addf %953, %969 : vector<16x128xf32>
    %c65_119 = arith.constant 65 : index
    %971 = memref.load %arg2[%c65_119] : memref<144xf32, #tpu.memory_space<smem>>
    %972 = vector.broadcast %971 : f32 to vector<16x128xf32>
    %973 = arith.mulf %966, %972 : vector<16x128xf32>
    %974 = arith.addf %957, %973 : vector<16x128xf32>
    %c66_120 = arith.constant 66 : index
    %975 = memref.load %arg2[%c66_120] : memref<144xf32, #tpu.memory_space<smem>>
    %976 = vector.broadcast %975 : f32 to vector<16x128xf32>
    %977 = arith.mulf %966, %976 : vector<16x128xf32>
    %978 = arith.addf %961, %977 : vector<16x128xf32>
    %c67_121 = arith.constant 67 : index
    %979 = memref.load %arg2[%c67_121] : memref<144xf32, #tpu.memory_space<smem>>
    %980 = vector.broadcast %979 : f32 to vector<16x128xf32>
    %981 = arith.mulf %966, %980 : vector<16x128xf32>
    %982 = arith.addf %965, %981 : vector<16x128xf32>
    %983 = vector.extract_strided_slice %673 {offsets = [16, 0], sizes = [16, 128], strides = [1, 1]} : vector<64x128xf32> to vector<16x128xf32>
    %c68_122 = arith.constant 68 : index
    %984 = memref.load %arg2[%c68_122] : memref<144xf32, #tpu.memory_space<smem>>
    %985 = vector.broadcast %984 : f32 to vector<16x128xf32>
    %986 = arith.mulf %983, %985 : vector<16x128xf32>
    %987 = arith.addf %970, %986 : vector<16x128xf32>
    %c69_123 = arith.constant 69 : index
    %988 = memref.load %arg2[%c69_123] : memref<144xf32, #tpu.memory_space<smem>>
    %989 = vector.broadcast %988 : f32 to vector<16x128xf32>
    %990 = arith.mulf %983, %989 : vector<16x128xf32>
    %991 = arith.addf %974, %990 : vector<16x128xf32>
    %c70_124 = arith.constant 70 : index
    %992 = memref.load %arg2[%c70_124] : memref<144xf32, #tpu.memory_space<smem>>
    %993 = vector.broadcast %992 : f32 to vector<16x128xf32>
    %994 = arith.mulf %983, %993 : vector<16x128xf32>
    %995 = arith.addf %978, %994 : vector<16x128xf32>
    %c71_125 = arith.constant 71 : index
    %996 = memref.load %arg2[%c71_125] : memref<144xf32, #tpu.memory_space<smem>>
    %997 = vector.broadcast %996 : f32 to vector<16x128xf32>
    %998 = arith.mulf %983, %997 : vector<16x128xf32>
    %999 = arith.addf %982, %998 : vector<16x128xf32>
    %1000 = vector.extract_strided_slice %673 {offsets = [32, 0], sizes = [16, 128], strides = [1, 1]} : vector<64x128xf32> to vector<16x128xf32>
    %c72_126 = arith.constant 72 : index
    %1001 = memref.load %arg2[%c72_126] : memref<144xf32, #tpu.memory_space<smem>>
    %1002 = vector.broadcast %1001 : f32 to vector<16x128xf32>
    %1003 = arith.mulf %1000, %1002 : vector<16x128xf32>
    %1004 = arith.addf %987, %1003 : vector<16x128xf32>
    %c73_127 = arith.constant 73 : index
    %1005 = memref.load %arg2[%c73_127] : memref<144xf32, #tpu.memory_space<smem>>
    %1006 = vector.broadcast %1005 : f32 to vector<16x128xf32>
    %1007 = arith.mulf %1000, %1006 : vector<16x128xf32>
    %1008 = arith.addf %991, %1007 : vector<16x128xf32>
    %c74_128 = arith.constant 74 : index
    %1009 = memref.load %arg2[%c74_128] : memref<144xf32, #tpu.memory_space<smem>>
    %1010 = vector.broadcast %1009 : f32 to vector<16x128xf32>
    %1011 = arith.mulf %1000, %1010 : vector<16x128xf32>
    %1012 = arith.addf %995, %1011 : vector<16x128xf32>
    %c75_129 = arith.constant 75 : index
    %1013 = memref.load %arg2[%c75_129] : memref<144xf32, #tpu.memory_space<smem>>
    %1014 = vector.broadcast %1013 : f32 to vector<16x128xf32>
    %1015 = arith.mulf %1000, %1014 : vector<16x128xf32>
    %1016 = arith.addf %999, %1015 : vector<16x128xf32>
    %1017 = vector.extract_strided_slice %673 {offsets = [48, 0], sizes = [16, 128], strides = [1, 1]} : vector<64x128xf32> to vector<16x128xf32>
    %c76_130 = arith.constant 76 : index
    %1018 = memref.load %arg2[%c76_130] : memref<144xf32, #tpu.memory_space<smem>>
    %1019 = vector.broadcast %1018 : f32 to vector<16x128xf32>
    %1020 = arith.mulf %1017, %1019 : vector<16x128xf32>
    %1021 = arith.addf %1004, %1020 : vector<16x128xf32>
    %c77_131 = arith.constant 77 : index
    %1022 = memref.load %arg2[%c77_131] : memref<144xf32, #tpu.memory_space<smem>>
    %1023 = vector.broadcast %1022 : f32 to vector<16x128xf32>
    %1024 = arith.mulf %1017, %1023 : vector<16x128xf32>
    %1025 = arith.addf %1008, %1024 : vector<16x128xf32>
    %c78_132 = arith.constant 78 : index
    %1026 = memref.load %arg2[%c78_132] : memref<144xf32, #tpu.memory_space<smem>>
    %1027 = vector.broadcast %1026 : f32 to vector<16x128xf32>
    %1028 = arith.mulf %1017, %1027 : vector<16x128xf32>
    %1029 = arith.addf %1012, %1028 : vector<16x128xf32>
    %c79_133 = arith.constant 79 : index
    %1030 = memref.load %arg2[%c79_133] : memref<144xf32, #tpu.memory_space<smem>>
    %1031 = vector.broadcast %1030 : f32 to vector<16x128xf32>
    %1032 = arith.mulf %1017, %1031 : vector<16x128xf32>
    %1033 = arith.addf %1016, %1032 : vector<16x128xf32>
    %c120_i32_134 = arith.constant 120 : i32
    %1034 = tpu.dynamic_rotate %673 by %c120_i32_134 dim 1 : vector<64x128xf32>, i32 -> vector<64x128xf32>
    %cst_135 = arith.constant 0.000000e+00 : f32
    %1035 = vector.broadcast %cst_135 : f32 to vector<64x128xf32>
    %1036 = arith.select %9, %1034, %1035 : vector<64x128xi1>, vector<64x128xf32>
    %1037 = vector.extract_strided_slice %1036 {offsets = [0, 0], sizes = [16, 128], strides = [1, 1]} : vector<64x128xf32> to vector<16x128xf32>
    %c80_136 = arith.constant 80 : index
    %1038 = memref.load %arg2[%c80_136] : memref<144xf32, #tpu.memory_space<smem>>
    %1039 = vector.broadcast %1038 : f32 to vector<16x128xf32>
    %1040 = arith.mulf %1037, %1039 : vector<16x128xf32>
    %1041 = arith.addf %1021, %1040 : vector<16x128xf32>
    %c81_137 = arith.constant 81 : index
    %1042 = memref.load %arg2[%c81_137] : memref<144xf32, #tpu.memory_space<smem>>
    %1043 = vector.broadcast %1042 : f32 to vector<16x128xf32>
    %1044 = arith.mulf %1037, %1043 : vector<16x128xf32>
    %1045 = arith.addf %1025, %1044 : vector<16x128xf32>
    %c82_138 = arith.constant 82 : index
    %1046 = memref.load %arg2[%c82_138] : memref<144xf32, #tpu.memory_space<smem>>
    %1047 = vector.broadcast %1046 : f32 to vector<16x128xf32>
    %1048 = arith.mulf %1037, %1047 : vector<16x128xf32>
    %1049 = arith.addf %1029, %1048 : vector<16x128xf32>
    %c83_139 = arith.constant 83 : index
    %1050 = memref.load %arg2[%c83_139] : memref<144xf32, #tpu.memory_space<smem>>
    %1051 = vector.broadcast %1050 : f32 to vector<16x128xf32>
    %1052 = arith.mulf %1037, %1051 : vector<16x128xf32>
    %1053 = arith.addf %1033, %1052 : vector<16x128xf32>
    %1054 = vector.extract_strided_slice %1036 {offsets = [16, 0], sizes = [16, 128], strides = [1, 1]} : vector<64x128xf32> to vector<16x128xf32>
    %c84_140 = arith.constant 84 : index
    %1055 = memref.load %arg2[%c84_140] : memref<144xf32, #tpu.memory_space<smem>>
    %1056 = vector.broadcast %1055 : f32 to vector<16x128xf32>
    %1057 = arith.mulf %1054, %1056 : vector<16x128xf32>
    %1058 = arith.addf %1041, %1057 : vector<16x128xf32>
    %c85_141 = arith.constant 85 : index
    %1059 = memref.load %arg2[%c85_141] : memref<144xf32, #tpu.memory_space<smem>>
    %1060 = vector.broadcast %1059 : f32 to vector<16x128xf32>
    %1061 = arith.mulf %1054, %1060 : vector<16x128xf32>
    %1062 = arith.addf %1045, %1061 : vector<16x128xf32>
    %c86_142 = arith.constant 86 : index
    %1063 = memref.load %arg2[%c86_142] : memref<144xf32, #tpu.memory_space<smem>>
    %1064 = vector.broadcast %1063 : f32 to vector<16x128xf32>
    %1065 = arith.mulf %1054, %1064 : vector<16x128xf32>
    %1066 = arith.addf %1049, %1065 : vector<16x128xf32>
    %c87_143 = arith.constant 87 : index
    %1067 = memref.load %arg2[%c87_143] : memref<144xf32, #tpu.memory_space<smem>>
    %1068 = vector.broadcast %1067 : f32 to vector<16x128xf32>
    %1069 = arith.mulf %1054, %1068 : vector<16x128xf32>
    %1070 = arith.addf %1053, %1069 : vector<16x128xf32>
    %1071 = vector.extract_strided_slice %1036 {offsets = [32, 0], sizes = [16, 128], strides = [1, 1]} : vector<64x128xf32> to vector<16x128xf32>
    %c88_144 = arith.constant 88 : index
    %1072 = memref.load %arg2[%c88_144] : memref<144xf32, #tpu.memory_space<smem>>
    %1073 = vector.broadcast %1072 : f32 to vector<16x128xf32>
    %1074 = arith.mulf %1071, %1073 : vector<16x128xf32>
    %1075 = arith.addf %1058, %1074 : vector<16x128xf32>
    %c89_145 = arith.constant 89 : index
    %1076 = memref.load %arg2[%c89_145] : memref<144xf32, #tpu.memory_space<smem>>
    %1077 = vector.broadcast %1076 : f32 to vector<16x128xf32>
    %1078 = arith.mulf %1071, %1077 : vector<16x128xf32>
    %1079 = arith.addf %1062, %1078 : vector<16x128xf32>
    %c90_146 = arith.constant 90 : index
    %1080 = memref.load %arg2[%c90_146] : memref<144xf32, #tpu.memory_space<smem>>
    %1081 = vector.broadcast %1080 : f32 to vector<16x128xf32>
    %1082 = arith.mulf %1071, %1081 : vector<16x128xf32>
    %1083 = arith.addf %1066, %1082 : vector<16x128xf32>
    %c91_147 = arith.constant 91 : index
    %1084 = memref.load %arg2[%c91_147] : memref<144xf32, #tpu.memory_space<smem>>
    %1085 = vector.broadcast %1084 : f32 to vector<16x128xf32>
    %1086 = arith.mulf %1071, %1085 : vector<16x128xf32>
    %1087 = arith.addf %1070, %1086 : vector<16x128xf32>
    %1088 = vector.extract_strided_slice %1036 {offsets = [48, 0], sizes = [16, 128], strides = [1, 1]} : vector<64x128xf32> to vector<16x128xf32>
    %c92_148 = arith.constant 92 : index
    %1089 = memref.load %arg2[%c92_148] : memref<144xf32, #tpu.memory_space<smem>>
    %1090 = vector.broadcast %1089 : f32 to vector<16x128xf32>
    %1091 = arith.mulf %1088, %1090 : vector<16x128xf32>
    %1092 = arith.addf %1075, %1091 : vector<16x128xf32>
    %c93_149 = arith.constant 93 : index
    %1093 = memref.load %arg2[%c93_149] : memref<144xf32, #tpu.memory_space<smem>>
    %1094 = vector.broadcast %1093 : f32 to vector<16x128xf32>
    %1095 = arith.mulf %1088, %1094 : vector<16x128xf32>
    %1096 = arith.addf %1079, %1095 : vector<16x128xf32>
    %c94_150 = arith.constant 94 : index
    %1097 = memref.load %arg2[%c94_150] : memref<144xf32, #tpu.memory_space<smem>>
    %1098 = vector.broadcast %1097 : f32 to vector<16x128xf32>
    %1099 = arith.mulf %1088, %1098 : vector<16x128xf32>
    %1100 = arith.addf %1083, %1099 : vector<16x128xf32>
    %c95_151 = arith.constant 95 : index
    %1101 = memref.load %arg2[%c95_151] : memref<144xf32, #tpu.memory_space<smem>>
    %1102 = vector.broadcast %1101 : f32 to vector<16x128xf32>
    %1103 = arith.mulf %1088, %1102 : vector<16x128xf32>
    %1104 = arith.addf %1087, %1103 : vector<16x128xf32>
    %c63_i32_152 = arith.constant 63 : i32
    %1105 = tpu.dynamic_rotate %673 by %c63_i32_152 dim 0 : vector<64x128xf32>, i32 -> vector<64x128xf32>
    %cst_153 = arith.constant 0.000000e+00 : f32
    %1106 = vector.broadcast %cst_153 : f32 to vector<64x128xf32>
    %1107 = arith.select %5, %1105, %1106 : vector<64x128xi1>, vector<64x128xf32>
    %c8_i32_154 = arith.constant 8 : i32
    %1108 = tpu.dynamic_rotate %1107 by %c8_i32_154 dim 1 : vector<64x128xf32>, i32 -> vector<64x128xf32>
    %cst_155 = arith.constant 0.000000e+00 : f32
    %1109 = vector.broadcast %cst_155 : f32 to vector<64x128xf32>
    %1110 = arith.select %11, %1108, %1109 : vector<64x128xi1>, vector<64x128xf32>
    %1111 = vector.extract_strided_slice %1110 {offsets = [0, 0], sizes = [16, 128], strides = [1, 1]} : vector<64x128xf32> to vector<16x128xf32>
    %c96_156 = arith.constant 96 : index
    %1112 = memref.load %arg2[%c96_156] : memref<144xf32, #tpu.memory_space<smem>>
    %1113 = vector.broadcast %1112 : f32 to vector<16x128xf32>
    %1114 = arith.mulf %1111, %1113 : vector<16x128xf32>
    %1115 = arith.addf %1092, %1114 : vector<16x128xf32>
    %c97_157 = arith.constant 97 : index
    %1116 = memref.load %arg2[%c97_157] : memref<144xf32, #tpu.memory_space<smem>>
    %1117 = vector.broadcast %1116 : f32 to vector<16x128xf32>
    %1118 = arith.mulf %1111, %1117 : vector<16x128xf32>
    %1119 = arith.addf %1096, %1118 : vector<16x128xf32>
    %c98_158 = arith.constant 98 : index
    %1120 = memref.load %arg2[%c98_158] : memref<144xf32, #tpu.memory_space<smem>>
    %1121 = vector.broadcast %1120 : f32 to vector<16x128xf32>
    %1122 = arith.mulf %1111, %1121 : vector<16x128xf32>
    %1123 = arith.addf %1100, %1122 : vector<16x128xf32>
    %c99_159 = arith.constant 99 : index
    %1124 = memref.load %arg2[%c99_159] : memref<144xf32, #tpu.memory_space<smem>>
    %1125 = vector.broadcast %1124 : f32 to vector<16x128xf32>
    %1126 = arith.mulf %1111, %1125 : vector<16x128xf32>
    %1127 = arith.addf %1104, %1126 : vector<16x128xf32>
    %1128 = vector.extract_strided_slice %1110 {offsets = [16, 0], sizes = [16, 128], strides = [1, 1]} : vector<64x128xf32> to vector<16x128xf32>
    %c100_160 = arith.constant 100 : index
    %1129 = memref.load %arg2[%c100_160] : memref<144xf32, #tpu.memory_space<smem>>
    %1130 = vector.broadcast %1129 : f32 to vector<16x128xf32>
    %1131 = arith.mulf %1128, %1130 : vector<16x128xf32>
    %1132 = arith.addf %1115, %1131 : vector<16x128xf32>
    %c101_161 = arith.constant 101 : index
    %1133 = memref.load %arg2[%c101_161] : memref<144xf32, #tpu.memory_space<smem>>
    %1134 = vector.broadcast %1133 : f32 to vector<16x128xf32>
    %1135 = arith.mulf %1128, %1134 : vector<16x128xf32>
    %1136 = arith.addf %1119, %1135 : vector<16x128xf32>
    %c102_162 = arith.constant 102 : index
    %1137 = memref.load %arg2[%c102_162] : memref<144xf32, #tpu.memory_space<smem>>
    %1138 = vector.broadcast %1137 : f32 to vector<16x128xf32>
    %1139 = arith.mulf %1128, %1138 : vector<16x128xf32>
    %1140 = arith.addf %1123, %1139 : vector<16x128xf32>
    %c103_163 = arith.constant 103 : index
    %1141 = memref.load %arg2[%c103_163] : memref<144xf32, #tpu.memory_space<smem>>
    %1142 = vector.broadcast %1141 : f32 to vector<16x128xf32>
    %1143 = arith.mulf %1128, %1142 : vector<16x128xf32>
    %1144 = arith.addf %1127, %1143 : vector<16x128xf32>
    %1145 = vector.extract_strided_slice %1110 {offsets = [32, 0], sizes = [16, 128], strides = [1, 1]} : vector<64x128xf32> to vector<16x128xf32>
    %c104_164 = arith.constant 104 : index
    %1146 = memref.load %arg2[%c104_164] : memref<144xf32, #tpu.memory_space<smem>>
    %1147 = vector.broadcast %1146 : f32 to vector<16x128xf32>
    %1148 = arith.mulf %1145, %1147 : vector<16x128xf32>
    %1149 = arith.addf %1132, %1148 : vector<16x128xf32>
    %c105_165 = arith.constant 105 : index
    %1150 = memref.load %arg2[%c105_165] : memref<144xf32, #tpu.memory_space<smem>>
    %1151 = vector.broadcast %1150 : f32 to vector<16x128xf32>
    %1152 = arith.mulf %1145, %1151 : vector<16x128xf32>
    %1153 = arith.addf %1136, %1152 : vector<16x128xf32>
    %c106_166 = arith.constant 106 : index
    %1154 = memref.load %arg2[%c106_166] : memref<144xf32, #tpu.memory_space<smem>>
    %1155 = vector.broadcast %1154 : f32 to vector<16x128xf32>
    %1156 = arith.mulf %1145, %1155 : vector<16x128xf32>
    %1157 = arith.addf %1140, %1156 : vector<16x128xf32>
    %c107_167 = arith.constant 107 : index
    %1158 = memref.load %arg2[%c107_167] : memref<144xf32, #tpu.memory_space<smem>>
    %1159 = vector.broadcast %1158 : f32 to vector<16x128xf32>
    %1160 = arith.mulf %1145, %1159 : vector<16x128xf32>
    %1161 = arith.addf %1144, %1160 : vector<16x128xf32>
    %1162 = vector.extract_strided_slice %1110 {offsets = [48, 0], sizes = [16, 128], strides = [1, 1]} : vector<64x128xf32> to vector<16x128xf32>
    %c108_168 = arith.constant 108 : index
    %1163 = memref.load %arg2[%c108_168] : memref<144xf32, #tpu.memory_space<smem>>
    %1164 = vector.broadcast %1163 : f32 to vector<16x128xf32>
    %1165 = arith.mulf %1162, %1164 : vector<16x128xf32>
    %1166 = arith.addf %1149, %1165 : vector<16x128xf32>
    %c109_169 = arith.constant 109 : index
    %1167 = memref.load %arg2[%c109_169] : memref<144xf32, #tpu.memory_space<smem>>
    %1168 = vector.broadcast %1167 : f32 to vector<16x128xf32>
    %1169 = arith.mulf %1162, %1168 : vector<16x128xf32>
    %1170 = arith.addf %1153, %1169 : vector<16x128xf32>
    %c110_170 = arith.constant 110 : index
    %1171 = memref.load %arg2[%c110_170] : memref<144xf32, #tpu.memory_space<smem>>
    %1172 = vector.broadcast %1171 : f32 to vector<16x128xf32>
    %1173 = arith.mulf %1162, %1172 : vector<16x128xf32>
    %1174 = arith.addf %1157, %1173 : vector<16x128xf32>
    %c111_171 = arith.constant 111 : index
    %1175 = memref.load %arg2[%c111_171] : memref<144xf32, #tpu.memory_space<smem>>
    %1176 = vector.broadcast %1175 : f32 to vector<16x128xf32>
    %1177 = arith.mulf %1162, %1176 : vector<16x128xf32>
    %1178 = arith.addf %1161, %1177 : vector<16x128xf32>
    %1179 = vector.extract_strided_slice %1107 {offsets = [0, 0], sizes = [16, 128], strides = [1, 1]} : vector<64x128xf32> to vector<16x128xf32>
    %c112_172 = arith.constant 112 : index
    %1180 = memref.load %arg2[%c112_172] : memref<144xf32, #tpu.memory_space<smem>>
    %1181 = vector.broadcast %1180 : f32 to vector<16x128xf32>
    %1182 = arith.mulf %1179, %1181 : vector<16x128xf32>
    %1183 = arith.addf %1166, %1182 : vector<16x128xf32>
    %c113_173 = arith.constant 113 : index
    %1184 = memref.load %arg2[%c113_173] : memref<144xf32, #tpu.memory_space<smem>>
    %1185 = vector.broadcast %1184 : f32 to vector<16x128xf32>
    %1186 = arith.mulf %1179, %1185 : vector<16x128xf32>
    %1187 = arith.addf %1170, %1186 : vector<16x128xf32>
    %c114_174 = arith.constant 114 : index
    %1188 = memref.load %arg2[%c114_174] : memref<144xf32, #tpu.memory_space<smem>>
    %1189 = vector.broadcast %1188 : f32 to vector<16x128xf32>
    %1190 = arith.mulf %1179, %1189 : vector<16x128xf32>
    %1191 = arith.addf %1174, %1190 : vector<16x128xf32>
    %c115_175 = arith.constant 115 : index
    %1192 = memref.load %arg2[%c115_175] : memref<144xf32, #tpu.memory_space<smem>>
    %1193 = vector.broadcast %1192 : f32 to vector<16x128xf32>
    %1194 = arith.mulf %1179, %1193 : vector<16x128xf32>
    %1195 = arith.addf %1178, %1194 : vector<16x128xf32>
    %1196 = vector.extract_strided_slice %1107 {offsets = [16, 0], sizes = [16, 128], strides = [1, 1]} : vector<64x128xf32> to vector<16x128xf32>
    %c116_176 = arith.constant 116 : index
    %1197 = memref.load %arg2[%c116_176] : memref<144xf32, #tpu.memory_space<smem>>
    %1198 = vector.broadcast %1197 : f32 to vector<16x128xf32>
    %1199 = arith.mulf %1196, %1198 : vector<16x128xf32>
    %1200 = arith.addf %1183, %1199 : vector<16x128xf32>
    %c117_177 = arith.constant 117 : index
    %1201 = memref.load %arg2[%c117_177] : memref<144xf32, #tpu.memory_space<smem>>
    %1202 = vector.broadcast %1201 : f32 to vector<16x128xf32>
    %1203 = arith.mulf %1196, %1202 : vector<16x128xf32>
    %1204 = arith.addf %1187, %1203 : vector<16x128xf32>
    %c118_178 = arith.constant 118 : index
    %1205 = memref.load %arg2[%c118_178] : memref<144xf32, #tpu.memory_space<smem>>
    %1206 = vector.broadcast %1205 : f32 to vector<16x128xf32>
    %1207 = arith.mulf %1196, %1206 : vector<16x128xf32>
    %1208 = arith.addf %1191, %1207 : vector<16x128xf32>
    %c119_179 = arith.constant 119 : index
    %1209 = memref.load %arg2[%c119_179] : memref<144xf32, #tpu.memory_space<smem>>
    %1210 = vector.broadcast %1209 : f32 to vector<16x128xf32>
    %1211 = arith.mulf %1196, %1210 : vector<16x128xf32>
    %1212 = arith.addf %1195, %1211 : vector<16x128xf32>
    %1213 = vector.extract_strided_slice %1107 {offsets = [32, 0], sizes = [16, 128], strides = [1, 1]} : vector<64x128xf32> to vector<16x128xf32>
    %c120_180 = arith.constant 120 : index
    %1214 = memref.load %arg2[%c120_180] : memref<144xf32, #tpu.memory_space<smem>>
    %1215 = vector.broadcast %1214 : f32 to vector<16x128xf32>
    %1216 = arith.mulf %1213, %1215 : vector<16x128xf32>
    %1217 = arith.addf %1200, %1216 : vector<16x128xf32>
    %c121_181 = arith.constant 121 : index
    %1218 = memref.load %arg2[%c121_181] : memref<144xf32, #tpu.memory_space<smem>>
    %1219 = vector.broadcast %1218 : f32 to vector<16x128xf32>
    %1220 = arith.mulf %1213, %1219 : vector<16x128xf32>
    %1221 = arith.addf %1204, %1220 : vector<16x128xf32>
    %c122_182 = arith.constant 122 : index
    %1222 = memref.load %arg2[%c122_182] : memref<144xf32, #tpu.memory_space<smem>>
    %1223 = vector.broadcast %1222 : f32 to vector<16x128xf32>
    %1224 = arith.mulf %1213, %1223 : vector<16x128xf32>
    %1225 = arith.addf %1208, %1224 : vector<16x128xf32>
    %c123_183 = arith.constant 123 : index
    %1226 = memref.load %arg2[%c123_183] : memref<144xf32, #tpu.memory_space<smem>>
    %1227 = vector.broadcast %1226 : f32 to vector<16x128xf32>
    %1228 = arith.mulf %1213, %1227 : vector<16x128xf32>
    %1229 = arith.addf %1212, %1228 : vector<16x128xf32>
    %1230 = vector.extract_strided_slice %1107 {offsets = [48, 0], sizes = [16, 128], strides = [1, 1]} : vector<64x128xf32> to vector<16x128xf32>
    %c124_184 = arith.constant 124 : index
    %1231 = memref.load %arg2[%c124_184] : memref<144xf32, #tpu.memory_space<smem>>
    %1232 = vector.broadcast %1231 : f32 to vector<16x128xf32>
    %1233 = arith.mulf %1230, %1232 : vector<16x128xf32>
    %1234 = arith.addf %1217, %1233 : vector<16x128xf32>
    %c125_185 = arith.constant 125 : index
    %1235 = memref.load %arg2[%c125_185] : memref<144xf32, #tpu.memory_space<smem>>
    %1236 = vector.broadcast %1235 : f32 to vector<16x128xf32>
    %1237 = arith.mulf %1230, %1236 : vector<16x128xf32>
    %1238 = arith.addf %1221, %1237 : vector<16x128xf32>
    %c126_186 = arith.constant 126 : index
    %1239 = memref.load %arg2[%c126_186] : memref<144xf32, #tpu.memory_space<smem>>
    %1240 = vector.broadcast %1239 : f32 to vector<16x128xf32>
    %1241 = arith.mulf %1230, %1240 : vector<16x128xf32>
    %1242 = arith.addf %1225, %1241 : vector<16x128xf32>
    %c127_187 = arith.constant 127 : index
    %1243 = memref.load %arg2[%c127_187] : memref<144xf32, #tpu.memory_space<smem>>
    %1244 = vector.broadcast %1243 : f32 to vector<16x128xf32>
    %1245 = arith.mulf %1230, %1244 : vector<16x128xf32>
    %1246 = arith.addf %1229, %1245 : vector<16x128xf32>
    %c120_i32_188 = arith.constant 120 : i32
    %1247 = tpu.dynamic_rotate %1107 by %c120_i32_188 dim 1 : vector<64x128xf32>, i32 -> vector<64x128xf32>
    %cst_189 = arith.constant 0.000000e+00 : f32
    %1248 = vector.broadcast %cst_189 : f32 to vector<64x128xf32>
    %1249 = arith.select %9, %1247, %1248 : vector<64x128xi1>, vector<64x128xf32>
    %1250 = vector.extract_strided_slice %1249 {offsets = [0, 0], sizes = [16, 128], strides = [1, 1]} : vector<64x128xf32> to vector<16x128xf32>
    %c128_190 = arith.constant 128 : index
    %1251 = memref.load %arg2[%c128_190] : memref<144xf32, #tpu.memory_space<smem>>
    %1252 = vector.broadcast %1251 : f32 to vector<16x128xf32>
    %1253 = arith.mulf %1250, %1252 : vector<16x128xf32>
    %1254 = arith.addf %1234, %1253 : vector<16x128xf32>
    %c129_191 = arith.constant 129 : index
    %1255 = memref.load %arg2[%c129_191] : memref<144xf32, #tpu.memory_space<smem>>
    %1256 = vector.broadcast %1255 : f32 to vector<16x128xf32>
    %1257 = arith.mulf %1250, %1256 : vector<16x128xf32>
    %1258 = arith.addf %1238, %1257 : vector<16x128xf32>
    %c130_192 = arith.constant 130 : index
    %1259 = memref.load %arg2[%c130_192] : memref<144xf32, #tpu.memory_space<smem>>
    %1260 = vector.broadcast %1259 : f32 to vector<16x128xf32>
    %1261 = arith.mulf %1250, %1260 : vector<16x128xf32>
    %1262 = arith.addf %1242, %1261 : vector<16x128xf32>
    %c131_193 = arith.constant 131 : index
    %1263 = memref.load %arg2[%c131_193] : memref<144xf32, #tpu.memory_space<smem>>
    %1264 = vector.broadcast %1263 : f32 to vector<16x128xf32>
    %1265 = arith.mulf %1250, %1264 : vector<16x128xf32>
    %1266 = arith.addf %1246, %1265 : vector<16x128xf32>
    %1267 = vector.extract_strided_slice %1249 {offsets = [16, 0], sizes = [16, 128], strides = [1, 1]} : vector<64x128xf32> to vector<16x128xf32>
    %c132_194 = arith.constant 132 : index
    %1268 = memref.load %arg2[%c132_194] : memref<144xf32, #tpu.memory_space<smem>>
    %1269 = vector.broadcast %1268 : f32 to vector<16x128xf32>
    %1270 = arith.mulf %1267, %1269 : vector<16x128xf32>
    %1271 = arith.addf %1254, %1270 : vector<16x128xf32>
    %c133_195 = arith.constant 133 : index
    %1272 = memref.load %arg2[%c133_195] : memref<144xf32, #tpu.memory_space<smem>>
    %1273 = vector.broadcast %1272 : f32 to vector<16x128xf32>
    %1274 = arith.mulf %1267, %1273 : vector<16x128xf32>
    %1275 = arith.addf %1258, %1274 : vector<16x128xf32>
    %c134_196 = arith.constant 134 : index
    %1276 = memref.load %arg2[%c134_196] : memref<144xf32, #tpu.memory_space<smem>>
    %1277 = vector.broadcast %1276 : f32 to vector<16x128xf32>
    %1278 = arith.mulf %1267, %1277 : vector<16x128xf32>
    %1279 = arith.addf %1262, %1278 : vector<16x128xf32>
    %c135_197 = arith.constant 135 : index
    %1280 = memref.load %arg2[%c135_197] : memref<144xf32, #tpu.memory_space<smem>>
    %1281 = vector.broadcast %1280 : f32 to vector<16x128xf32>
    %1282 = arith.mulf %1267, %1281 : vector<16x128xf32>
    %1283 = arith.addf %1266, %1282 : vector<16x128xf32>
    %1284 = vector.extract_strided_slice %1249 {offsets = [32, 0], sizes = [16, 128], strides = [1, 1]} : vector<64x128xf32> to vector<16x128xf32>
    %c136_198 = arith.constant 136 : index
    %1285 = memref.load %arg2[%c136_198] : memref<144xf32, #tpu.memory_space<smem>>
    %1286 = vector.broadcast %1285 : f32 to vector<16x128xf32>
    %1287 = arith.mulf %1284, %1286 : vector<16x128xf32>
    %1288 = arith.addf %1271, %1287 : vector<16x128xf32>
    %c137_199 = arith.constant 137 : index
    %1289 = memref.load %arg2[%c137_199] : memref<144xf32, #tpu.memory_space<smem>>
    %1290 = vector.broadcast %1289 : f32 to vector<16x128xf32>
    %1291 = arith.mulf %1284, %1290 : vector<16x128xf32>
    %1292 = arith.addf %1275, %1291 : vector<16x128xf32>
    %c138_200 = arith.constant 138 : index
    %1293 = memref.load %arg2[%c138_200] : memref<144xf32, #tpu.memory_space<smem>>
    %1294 = vector.broadcast %1293 : f32 to vector<16x128xf32>
    %1295 = arith.mulf %1284, %1294 : vector<16x128xf32>
    %1296 = arith.addf %1279, %1295 : vector<16x128xf32>
    %c139_201 = arith.constant 139 : index
    %1297 = memref.load %arg2[%c139_201] : memref<144xf32, #tpu.memory_space<smem>>
    %1298 = vector.broadcast %1297 : f32 to vector<16x128xf32>
    %1299 = arith.mulf %1284, %1298 : vector<16x128xf32>
    %1300 = arith.addf %1283, %1299 : vector<16x128xf32>
    %1301 = vector.extract_strided_slice %1249 {offsets = [48, 0], sizes = [16, 128], strides = [1, 1]} : vector<64x128xf32> to vector<16x128xf32>
    %c140_202 = arith.constant 140 : index
    %1302 = memref.load %arg2[%c140_202] : memref<144xf32, #tpu.memory_space<smem>>
    %1303 = vector.broadcast %1302 : f32 to vector<16x128xf32>
    %1304 = arith.mulf %1301, %1303 : vector<16x128xf32>
    %1305 = arith.addf %1288, %1304 : vector<16x128xf32>
    %c141_203 = arith.constant 141 : index
    %1306 = memref.load %arg2[%c141_203] : memref<144xf32, #tpu.memory_space<smem>>
    %1307 = vector.broadcast %1306 : f32 to vector<16x128xf32>
    %1308 = arith.mulf %1301, %1307 : vector<16x128xf32>
    %1309 = arith.addf %1292, %1308 : vector<16x128xf32>
    %c142_204 = arith.constant 142 : index
    %1310 = memref.load %arg2[%c142_204] : memref<144xf32, #tpu.memory_space<smem>>
    %1311 = vector.broadcast %1310 : f32 to vector<16x128xf32>
    %1312 = arith.mulf %1301, %1311 : vector<16x128xf32>
    %1313 = arith.addf %1296, %1312 : vector<16x128xf32>
    %c143_205 = arith.constant 143 : index
    %1314 = memref.load %arg2[%c143_205] : memref<144xf32, #tpu.memory_space<smem>>
    %1315 = vector.broadcast %1314 : f32 to vector<16x128xf32>
    %1316 = arith.mulf %1301, %1315 : vector<16x128xf32>
    %1317 = arith.addf %1300, %1316 : vector<16x128xf32>
    %c1_206 = arith.constant 1 : index
    %c0_207 = arith.constant 0 : index
    %c0_208 = arith.constant 0 : index
    %c0_209 = arith.constant 0 : index
    %1318 = vector.load %arg4[%c1_206, %c0_207, %c0_208, %c0_209] : memref<2x4x16x128xf32, #tpu.memory_space<vmem>>, vector<1x1x16x128xf32>
    %1319 = vector.shape_cast %1318 : vector<1x1x16x128xf32> to vector<16x128xf32>
    %1320 = vector.shape_cast %1305 : vector<16x128xf32> to vector<1x1x16x128xf32>
    tpu.vector_store %arg4[%c1_206, %c0_207, %c0_208, %c0_209], %1320 {strides = array<i32>} : memref<2x4x16x128xf32, #tpu.memory_space<vmem>>, vector<1x1x16x128xf32>,
    %c1_210 = arith.constant 1 : index
    %c1_211 = arith.constant 1 : index
    %c0_212 = arith.constant 0 : index
    %c0_213 = arith.constant 0 : index
    %1321 = vector.load %arg4[%c1_210, %c1_211, %c0_212, %c0_213] : memref<2x4x16x128xf32, #tpu.memory_space<vmem>>, vector<1x1x16x128xf32>
    %1322 = vector.shape_cast %1321 : vector<1x1x16x128xf32> to vector<16x128xf32>
    %1323 = vector.shape_cast %1309 : vector<16x128xf32> to vector<1x1x16x128xf32>
    tpu.vector_store %arg4[%c1_210, %c1_211, %c0_212, %c0_213], %1323 {strides = array<i32>} : memref<2x4x16x128xf32, #tpu.memory_space<vmem>>, vector<1x1x16x128xf32>,
    %c1_214 = arith.constant 1 : index
    %c2_215 = arith.constant 2 : index
    %c0_216 = arith.constant 0 : index
    %c0_217 = arith.constant 0 : index
    %1324 = vector.load %arg4[%c1_214, %c2_215, %c0_216, %c0_217] : memref<2x4x16x128xf32, #tpu.memory_space<vmem>>, vector<1x1x16x128xf32>
    %1325 = vector.shape_cast %1324 : vector<1x1x16x128xf32> to vector<16x128xf32>
    %1326 = vector.shape_cast %1313 : vector<16x128xf32> to vector<1x1x16x128xf32>
    tpu.vector_store %arg4[%c1_214, %c2_215, %c0_216, %c0_217], %1326 {strides = array<i32>} : memref<2x4x16x128xf32, #tpu.memory_space<vmem>>, vector<1x1x16x128xf32>,
    %c1_218 = arith.constant 1 : index
    %c3_219 = arith.constant 3 : index
    %c0_220 = arith.constant 0 : index
    %c0_221 = arith.constant 0 : index
    %1327 = vector.load %arg4[%c1_218, %c3_219, %c0_220, %c0_221] : memref<2x4x16x128xf32, #tpu.memory_space<vmem>>, vector<1x1x16x128xf32>
    %1328 = vector.shape_cast %1327 : vector<1x1x16x128xf32> to vector<16x128xf32>
    %1329 = vector.shape_cast %1317 : vector<16x128xf32> to vector<1x1x16x128xf32>
    tpu.vector_store %arg4[%c1_218, %c3_219, %c0_220, %c0_221], %1329 {strides = array<i32>} : memref<2x4x16x128xf32, #tpu.memory_space<vmem>>, vector<1x1x16x128xf32>,
    return
  }
  func.func @transform_0(%arg0: i32) -> (i32, i32, i32, i32) {
    %c0_i32 = arith.constant 0 : i32
    %c0_i32_0 = arith.constant 0 : i32
    %c0_i32_1 = arith.constant 0 : i32
    %c0_i32_2 = arith.constant 0 : i32
    return %arg0, %c0_i32, %c0_i32_0, %c0_i32_1 : i32, i32, i32, i32
  }
  func.func @transform_1(%arg0: i32) -> i32 {
    %c0_i32 = arith.constant 0 : i32
    %c0_i32_0 = arith.constant 0 : i32
    return %c0_i32 : i32
  }
  func.func @transform_2(%arg0: i32) -> i32 {
    %c0_i32 = arith.constant 0 : i32
    %c0_i32_0 = arith.constant 0 : i32
    return %c0_i32 : i32
  }
  func.func @transform_3(%arg0: i32) -> (i32, i32, i32, i32) {
    %c0_i32 = arith.constant 0 : i32
    %c0_i32_0 = arith.constant 0 : i32
    %c0_i32_1 = arith.constant 0 : i32
    %c0_i32_2 = arith.constant 0 : i32
    return %arg0, %c0_i32, %c0_i32_0, %c0_i32_1 : i32, i32, i32, i32
  }
}

</mosaic_0001>

<bundles_post_ra>
// kernel: wrapped_model_2d_forward.1
= control target key start
LH: loop header
LB: loop body
LE: loop exit
PB: predicated region body
PF: predicated region fallthrough
CT: control target
= control target key end

     0   :  { %s5246_s0 = inlined_call_operand.vmem [shape: f32[2,4,16,128], index: 0, kind: input, shape index: {}]   ;;  %s5247_s1 = inlined_call_operand.vmem [shape: f32[144], index: 1, kind: input, shape index: {}]   ;;  %s5248_s2 = inlined_call_operand.vmem [shape: f32[4], index: 2, kind: input, shape index: {}]   ;;  %s5249_s3 = inlined_call_operand.vmem [shape: f32[2,4,16,128], index: 3, kind: output, shape index: {}]  }
   0x1   :  { %5315 = sst [smem:[#allocation51_spill]] %s5249_s3 }
   0x2   :  { %8 = vsyncpa [#allocation3], 0  ;;  %s17_s14 = sshll.u32 %s5247_s1, 4  ;;  %s18_s14 = int_to_ptr.vmem [resolvable:$true] %s17_s14 }
   0x3   :  { %9 = vsyncpa [#allocation5], 0  ;;  %s26_s17 = sshll.u32 %s5248_s2, 4  ;;  %s2670_s18 = smov [#allocation2]   ;;  %s27_s17 = int_to_ptr.vmem [resolvable:$true] %s26_s17 }
   0x4   :  { %20 = dma.vmem_to_smem %s18_s14, 32, %s2670_s18, [#allocation3]  }
   0x5   :  { %s2671_s19 = smov [#allocation4]  }
   0x6   :  { %29 = dma.vmem_to_smem %s27_s17, 16, %s2671_s19, [#allocation5]  }
   0x7   :  { %2666 = dma.done.wait [#allocation3], 32  }
   0x8   :  { %2667 = vsyncadd [#allocation3], 4294967264 }
   0x9   :  { %2668 = dma.done.wait [#allocation5], 16  }
   0xa   :  { %2669 = vsyncadd [#allocation5], 4294967280 }
   0xb   :  { %38 = sfence }
   0xc   :  { %v39_v0 = vlaneseq  ;;  %v2703_v1 = vld [vmem:[%s5246_s0] sm:$0xff]  ;;  %v2708_v2 = vld [vmem:[%s5246_s0 + $0x8] sm:$0xff]  ;;  %v2713_v3 = vld [vmem:[%s5246_s0 + $0x10] sm:$0xff]  ;;  %s5253_s5 = smov 8   ;;  %v5318_v26 = vmov 0  ;;  %v5323_v37 = vmov 0 }
   0xd   :  { %v132_v4 = vrot.slane %v2703_v1, 7  ;;  %v133_v5 = vrot.slane %v2708_v2, 7  ;;  %v2720_v6 = vld [vmem:[%s5246_s0 + $0x18] sm:$0xff]  ;;  %v134_v7 = vrot.slane %v2713_v3, 7  ;;  %v2735_v11 = vld [vmem:[%s5246_s0 + $0x28] sm:$0xff]  ;;  %v2740_v12 = vld [vmem:[%s5246_s0 + $0x20] sm:$0xff] }
   0xe   :  { %v2726_v8 = vld [vmem:[%s5246_s0 + $0x38] sm:$0xff]  ;;  %v2729_v9 = vshrl.u32 %v39_v0, 7  ;;  %v135_v10 = vrot.slane %v2720_v6, 7  ;;  %v136_v13 = vrot.slane %v2740_v12, 7  ;;  %v137_v19 = vrot.slane %v2735_v11, 7  ;;  %v2783_v28 = vld [vmem:[%s5246_s0 + $0x30] sm:$0xff] }
   0xf   :  { %v139_v15 = vrot.slane %v2726_v8, 7  ;;  %v138_v33 = vrot.slane %v2783_v28, 7  ;;  %s5250_s8 = smov 120   ;;  %s2860_s9 = sld [smem:[#allocation2]]  ;;  %v837_v42 = vrot.slane %v2703_v1, 1  ;;  %v839_v43 = vrot.slane %v2713_v3, 1 }
  0x10   :  { %vm140_vm0 = vcmp.lt.s32.totalorder %v2729_v9, 1  ;;  %v54_v14 = vand.u32 15, %v2729_v9  ;;  %v42_v16 = vadd.s32 16, %v2729_v9  ;;  %v46_v21 = vadd.s32 48, %v2729_v9  ;;  %s2866_s10 = sld [smem:[#allocation4]] }
  0x11   :  { %v2749_v17 = vsel %vm140_vm0, %v132_v4, %v133_v5  ;;  %v2753_v18 = vsel %vm140_vm0, %v134_v7, %v135_v10  ;;  %v2763_v22 = vsel %vm140_vm0, %v136_v13, %v137_v19  ;;  %v44_v23 = vadd.s32 32, %v2729_v9  ;;  %s2868_s11 = sld [smem:[#allocation2 + $0x1]] }
  0x12   :  { %159 = vrot.lane.b32.xlu0 %v2749_v17, %s5253_s5  ;;  %163 = vrot.lane.b32.xlu1 %v2753_v18, %s5253_s5  ;;  %v68_v20 = vand.u32 15, %v42_v16  ;;  %vm2766_vm1 = vcmp.ge.s32.totalorder %v54_v14, 1  ;;  %v148_v25 = vsel %vm140_vm0, %v139_v15, %v132_v4  ;;  %v146_v27 = vsel %vm140_vm0, %v133_v5, %v134_v7  ;;  %s2872_s12 = sld [smem:[#allocation4 + $0x1]] }
  0x13   :  { %167 = vrot.lane.b32.xlu2 %v2763_v22, %s5253_s5  ;;  %v82_v29 = vand.u32 15, %v44_v23  ;;  %v2787_v30 = vsel %vm2766_vm1, %v148_v25, 0.0  ;;  %v96_v32 = vand.u32 15, %v46_v21  ;;  %v144_v35 = vsel %vm140_vm0, %v135_v10, %v136_v13  ;;  %s2874_s13 = sld [smem:[#allocation2 + $0x2]]  ;;  %v3028_v21 = vld [vmem:[%s5246_s0 + $0x78] sm:$0xff] }
  0x14   :  { %vm2772_vm2 = vcmp.ge.s32.totalorder %v68_v20, 1  ;;  %v142_v38 = vsel %vm140_vm0, %v137_v19, %v138_v33  ;;  %v2822_v40 = vsel %vm140_vm0, %v138_v33, %v139_v15  ;;  %s2876_s14 = sld [smem:[#allocation4 + $0x2]]  ;;  %v41_v41 = vadd.s32 8, %v2729_v9  ;;  %v3023_v20 = vld [vmem:[%s5246_s0 + $0x40] sm:$0xff] }
  0x15   :  { %v5319_v26 = vsel %vm2772_vm2, 4294967295, %v5318_v26  ;;  %v2791_v31 = vsel %vm2772_vm2, %v146_v27, 0.0  ;;  %vm2794_vm3 = vcmp.ge.s32.totalorder %v82_v29, 1  ;;  %vm2808_vm4 = vcmp.ge.s32.totalorder %v96_v32, 1  ;;  %s2878_s15 = sld [smem:[#allocation2 + $0x3]]  ;;  %5351 = vst [vmem:[#allocation27_spill] sm:$0xff] %v3023_v20 }
  0x16   :  { %5320 = vst [vmem:[#allocation8_spill] sm:$0xff] %v5319_v26  ;;  %v2806_v36 = vsel %vm2794_vm3, %v144_v35, 0.0  ;;  %v5324_v37 = vsel %vm2808_vm4, 4294967295, %v5323_v37  ;;  %v2818_v39 = vsel %vm2808_vm4, %v142_v38, 0.0  ;;  %5326 = sst [smem:[#allocation10_spill]] %s2866_s10  ;;  %v61_v44 = vand.u32 15, %v41_v41 }
  0x17   :  { %5325 = vst [vmem:[#allocation9_spill] sm:$0xff] %v5324_v37  ;;  %5327 = sst [smem:[#allocation11_spill]] %s2868_s11  ;;  %v838_v45 = vrot.slane %v2708_v2, 1  ;;  %v43_v46 = vadd.s32 24, %v2729_v9  ;;  %vm845_vm5 = vcmp.lt.s32.totalorder %v2729_v9, 7  ;;  %v45_v47 = vadd.s32 40, %v2729_v9 }
  0x18   :  { %5328 = sst [smem:[#allocation12_spill]] %s2872_s12  ;;  %v840_v48 = vrot.slane %v2720_v6, 1  ;;  %v47_v50 = vadd.s32 56, %v2729_v9  ;;  %vm2927_vm6 = vcmp.lt.s32.totalorder %v61_v44, 15  ;;  %v5333_v51 = vmov 0  ;;  %v3038_v27 = vld [vmem:[%s5246_s0 + $0x48] sm:$0xff] }
  0x19   :  { %5329 = sst [smem:[#allocation13_spill]] %s2874_s13  ;;  %v2922_v49 = vsel %vm845_vm5, %v837_v42, %v838_v45  ;;  %v5334_v51 = vsel %vm2927_vm6, 4294967295, %v5333_v51  ;;  %v851_v52 = vsel %vm845_vm5, %v838_v45, %v839_v43  ;;  %v75_v53 = vand.u32 15, %v43_v46  ;;  %5352 = vst [vmem:[#allocation28_spill] sm:$0xff] %v3038_v27  ;;  %s5353_s13 = smov 8  }
  0x1a   :  { %157 = vrot.lane.b32.xlu0 %v2787_v30, %s5253_s5  ;;  %161 = vrot.lane.b32.xlu1 %v2791_v31, %s5253_s5  ;;  %5330 = sst [smem:[#allocation14_spill]] %s2876_s14  ;;  %5332 = vst [vmem:[#allocation16_spill] sm:$0xff] %v2922_v49  ;;  %v89_v54 = vand.u32 15, %v45_v47  ;;  %v842_v55 = vrot.slane %v2735_v11, 1  ;;  %v843_v56 = vrot.slane %v2783_v28, 1  ;;  %v841_v57 = vrot.slane %v2740_v12, 1 }
  0x1b   :  { %165 = vrot.lane.b32.xlu2 %v2806_v36, %s5253_s5  ;;  %5331 = sst [smem:[#allocation15_spill]] %s2878_s15  ;;  %5335 = vst [vmem:[#allocation17_spill] sm:$0xff] %v5334_v51  ;;  %v2946_v58 = vsel %vm845_vm5, %v839_v43, %v840_v48  ;;  %v2950_v59 = vsel %vm2927_vm6, %v851_v52, 0.0  ;;  %v103_v60 = vand.u32 15, %v47_v50  ;;  %v844_v61 = vrot.slane %v2726_v8, 1 }
  0x1c   :  { %s2880_s16 = sld [smem:[#allocation4 + $0x3]]  ;;  %5336 = vst [vmem:[#allocation18_spill] sm:$0xff] %v2946_v58  ;;  %vm2955_vm7 = vcmp.lt.s32.totalorder %v75_v53, 15  ;;  %v5338_v62 = vmov 0  ;;  %v849_v63 = vsel %vm845_vm5, %v840_v48, %v841_v57  ;;  %vm2963_vm8 = vcmp.lt.s32.totalorder %v89_v54, 15 }
  0x1d   :  { %s2882_s17 = sld [smem:[#allocation2 + $0x4]]  ;;  %5337 = vst [vmem:[#allocation19_spill] sm:$0xff] %v2950_v59  ;;  %v5339_v62 = vsel %vm2955_vm7, 4294967295, %v5338_v62  ;;  %vm2982_vm9 = vcmp.lt.s32.totalorder %v103_v60, 15  ;;  %v5344_v4 = vmov 0  ;;  %v853_v5 = vsel %vm845_vm5, %v844_v61, %v837_v42 }
  0x1e   :  { %s2888_s18 = sld [smem:[#allocation2 + $0x5]]  ;;  %5340 = vst [vmem:[#allocation20_spill] sm:$0xff] %v5339_v62  ;;  %v5345_v4 = vsel %vm2982_vm9, 4294967295, %v5344_v4  ;;  %v3000_v7 = vsel %vm845_vm5, %v841_v57, %v842_v55  ;;  %v3015_v14 = vsel %vm2982_vm9, %v853_v5, 0.0  ;;  %v1218_v29 = vrot.slane %v3023_v20, 7  ;;  %v3206_v62 = vld [vmem:[%s5246_s0 + $0x58] sm:$0xff] }
  0x1f   :  { %s2890_s19 = sld [smem:[#allocation2 + $0x6]]  ;;  %5346 = vst [vmem:[#allocation22_spill] sm:$0xff] %v5345_v4  ;;  %v5268_v32 = vrot.slane %v3028_v21, 7  ;;  %v5267_v44 = vrot.slane %v3038_v27, 7  ;;  %v3071_v50 = vsel %vm845_vm5, %v843_v56, %v844_v61  ;;  %v3211_v4 = vld [vmem:[%s5246_s0 + $0x60] sm:$0xff] }
  0x20   :  { %s2895_s20 = sld [smem:[#allocation2 + $0x7]]  ;;  %5349 = vst [vmem:[#allocation25_spill] sm:$0xff] %v3000_v7 }
  0x21   :  { %s2897_s21 = sld [smem:[#allocation2 + $0x8]]  ;;  %5350 = vst [vmem:[#allocation26_spill] sm:$0xff] %v3015_v14  ;;  %v1233_v45 = vsel %vm140_vm0, %v5268_v32, %v1218_v29 }
  0x22   :  { %169 = vrot.lane.b32.xlu0 %v2818_v39, %s5253_s5  ;;  %171 = vrot.lane.b32.xlu1 %v2822_v40, %s5253_s5  ;;  %s2899_s1 = sld [smem:[#allocation2 + $0x9]]  ;;  %5354 = vst [vmem:[#allocation29_spill] sm:$0xff] %v3071_v50 }
  0x23   :  { %381 = vrot.lane.b32.xlu2 %v2787_v30, %s5250_s8  ;;  %s2902_s22 = sld [smem:[#allocation2 + $0xa]]  ;;  %5361 = vst [vmem:[#allocation35_spill] sm:$0xff] %v3206_v62 }
  0x24   :  { %s2907_s2 = sld [smem:[#allocation2 + $0xb]]  ;;  %5362 = vst [vmem:[#allocation36_spill] sm:$0xff] %v3211_v4 }
  0x25   :  { %s2911_s23 = sld [smem:[#allocation2 + $0xc]] }
  0x26   :  { %s2917_s24 = sld [smem:[#allocation2 + $0xd]] }
  0x27   :  { %s2925_s25 = sld [smem:[#allocation2 + $0xe]]  ;;  %v238_v23 = vstv %s2897_s21 }
  0x28   :  { %s2935_s26 = sld [smem:[#allocation2 + $0xf]]  ;;  %v244_v35 = vstv %s2899_s1 }
  0x29   :  { %s2939_s27 = sld [smem:[#allocation2 + $0x10]]  ;;  %v250_v38 = vstv %s2902_s22 }
  0x2a   :  { %383 = vrot.lane.b32.xlu0 %v2749_v17, %s5250_s8  ;;  %385 = vrot.lane.b32.xlu1 %v2791_v31, %s5250_s8  ;;  %s2942_s28 = sld [smem:[#allocation2 + $0x11]]  ;;  %v256_v41 = vstv %s2907_s2 }
  0x2b   :  { %387 = vrot.lane.b32.xlu2 %v2753_v18, %s5250_s8  ;;  %s2953_s29 = sld [smem:[#allocation2 + $0x12]] }
  0x2c   :  { %s2961_s30 = sld [smem:[#allocation2 + $0x13]] }
  0x2d   :  { %s2971_s4 = sld [smem:[#allocation2 + $0x14]] }
  0x2e   :  { %s2980_s6 = sld [smem:[#allocation2 + $0x15]] }
  0x2f   :  { %s2992_s7 = sld [smem:[#allocation2 + $0x16]]  ;;  %v286_v61 = vstv %s2939_s27 }
  0x30   :  { %s3011_s3 = sld [smem:[#allocation2 + $0x18]] }
  0x31   :  { %s3030_s11 = sld [smem:[#allocation2 + $0x19]] }
  0x32   :  { %389 = vrot.lane.b32.xlu0 %v2806_v36, %s5250_s8  ;;  %391 = vrot.lane.b32.xlu1 %v2763_v22, %s5250_s8  ;;  %s3048_s10 = sld [smem:[#allocation2 + $0x1b]] }
  0x33   :  { %393 = vrot.lane.b32.xlu2 %v2818_v39, %s5250_s8  ;;  %s3057_s12 = sld [smem:[#allocation2 + $0x1c]]  ;;  %v310_v60 = vstv %s2971_s4 }
  0x34   :  { %s3073_s14 = sld [smem:[#allocation2 + $0x1d]]  ;;  %v316_v57 = vstv %s2980_s6 }
  0x35   :  { %s3085_s15 = sld [smem:[#allocation2 + $0x1e]] }
  0x36   :  { %s3098_s21 = sld [smem:[#allocation2 + $0x1f]]  ;;  %v334_v47 = vstv %s3011_s3 }
  0x37   :  { %s3104_s1 = sld [smem:[#allocation2 + $0x20]] }
  0x38   :  { %s3116_s22 = sld [smem:[#allocation2 + $0x21]] }
  0x39   :  { %s3125_s2 = sld [smem:[#allocation2 + $0x22]]  ;;  %v358_v43 = vstv %s3057_s12 }
  0x3a   :  { %395 = vrot.lane.b32.xlu0 %v2822_v40, %s5250_s8  ;;  %501 = vrot.lane.b32.xlu1 %v2703_v1, %s5253_s5  ;;  %s3135_s27 = sld [smem:[#allocation2 + $0x23]] }
  0x3b   :  { %503 = vrot.lane.b32.xlu2 %v2708_v2, %s5253_s5  ;;  %v370_v42 = vstv %s3085_s15  ;;  %s3235_s6 = sld [smem:[#allocation2 + $0x24]] }
  0x3c   :  { %v376_v16 = vstv %s3098_s21  ;;  %s3265_s12 = sld [smem:[#allocation2 + $0x26]] }
  0x3d   :  { %s5381_s15 = sld [smem:[#allocation10_spill]] }
  0x3e   :  { %v5368_v27 = vstv %s3116_s22  ;;  %s5383_s21 = sld [smem:[#allocation12_spill]] }
  0x3f   :  { %s5384_s3 = sld [smem:[#allocation14_spill]] }
  0x40   :  { %s3652_s4 = sld [smem:[#allocation2 + $0x44]] }
  0x41   :  { %v5294_v34 = vstv %s3235_s6 }
  0x42   :  { %505 = vrot.lane.b32.xlu0 %v2713_v3, %s5253_s5  ;;  %507 = vrot.lane.b32.xlu1 %v2720_v6, %s5253_s5 }
  0x43   :  { %509 = vrot.lane.b32.xlu2 %v2740_v12, %s5253_s5 }
  0x4a   :  { %511 = vrot.lane.b32.xlu0 %v2735_v11, %s5253_s5  ;;  %513 = vrot.lane.b32.xlu1 %v2783_v28, %s5253_s5 }
  0x4b   :  { %515 = vrot.lane.b32.xlu2 %v2726_v8, %s5253_s5 }
  0x52   :  { %717 = vrot.lane.b32.xlu0 %v2703_v1, %s5250_s8  ;;  %719 = vrot.lane.b32.xlu1 %v2708_v2, %s5250_s8  ;;  %v5341_v1 = vmov 0  ;;  %v847_v2 = vsel %vm845_vm5, %v842_v55, %v843_v56  ;;  %v3083_v55 = vsel %vm2766_vm1, %v1233_v45, 0.0  ;;  %v304_v45 = vstv %s2961_s30  ;;  %s3362_s30 = sld [smem:[#allocation2 + $0x2a]] }
  0x53   :  { %721 = vrot.lane.b32.xlu2 %v2713_v3, %s5250_s8  ;;  %v5342_v1 = vsel %vm2963_vm8, 4294967295, %v5341_v1  ;;  %v2978_v3 = vand.u32 127, %v39_v0  ;;  %v2996_v0 = vsel %vm2963_vm8, %v847_v2, 0.0  ;;  %5355 = vst [vmem:[#allocation30_spill] sm:$0xff] %v3083_v55  ;;  %v298_v2 = vstv %s2953_s29  ;;  %s3345_s29 = sld [smem:[#allocation2 + $0x29]] }
  0x54   :  { %5343 = vst [vmem:[#allocation21_spill] sm:$0xff] %v5342_v1  ;;  %v3121_v24 = vmul.f32 %v304_v45, %v2787_v30 }
  0x55   :  { %5348 = vst [vmem:[#allocation24_spill] sm:$0xff] %v2996_v0  ;;  %vm123_vm10 = vcmp.ge.s32.totalorder %v2978_v3, 8  ;;  %vm122_vm11 = vcmp.lt.s32.totalorder %v2978_v3, 120 }
  0x5a   :  { %723 = vrot.lane.b32.xlu0 %v2720_v6, %s5250_s8  ;;  %725 = vrot.lane.b32.xlu1 %v2740_v12, %s5250_s8  ;;  %v2990_v6 = vsel %vm2955_vm7, %v849_v63, 0.0  ;;  %v292_v63 = vstv %s2942_s28  ;;  %v322_v12 = vstv %s2992_s7  ;;  %s5356_s28 = smov 120   ;;  %s3254_s7 = sld [smem:[#allocation2 + $0x25]] }
  0x5b   :  { %727 = vrot.lane.b32.xlu2 %v2735_v11, %s5250_s8  ;;  %5347 = vst [vmem:[#allocation23_spill] sm:$0xff] %v2990_v6  ;;  %v3200_v11 = vmul.f32 %v376_v16, %v2818_v39 }
  0x5d   :  { %5360 = vst [vmem:[#allocation34_spill] sm:$0xff] %v3200_v11  ;;  %v5370_v11 = vstv %s3125_s2 }
  0x62   :  { %729 = vrot.lane.b32.xlu0 %v2783_v28, %s5250_s8  ;;  %731 = vrot.lane.b32.xlu1 %v2726_v8, %s5250_s8  ;;  %s3005_s8 = sld [smem:[#allocation2 + $0x17]]  ;;  %v3093_v28 = vsel %vm140_vm0, %v1218_v29, %v5267_v44  ;;  %v3113_v29 = vmul.f32 %v298_v2, %v2787_v30  ;;  %v3222_v8 = vld [vmem:[%s5246_s0 + $0x50] sm:$0xff] }
  0x63   :  { %862 = vrot.lane.b32.xlu2 %v2922_v49, %s5253_s5  ;;  %5363 = vst [vmem:[#allocation37_spill] sm:$0xff] %v3222_v8 }
  0x68   :  { %v328_v10 = vstv %s3005_s8  ;;  %s3295_s8 = sld [smem:[#allocation2 + $0x27]] }
  0x6a   :  { %866 = vrot.lane.b32.xlu1 %v2946_v58, %s5253_s5  ;;  %864 = vrot.lane.b32.xlu0 %v2950_v59, %s5253_s5 }
  0x6b   :  { %868 = vrot.lane.b32.xlu2 %v2990_v6, %s5253_s5  ;;  %s3042_s5 = sld [smem:[#allocation2 + $0x1a]] }
  0x6d   :  { %v168_v19 = vpop.permute.xlu2 %167 }
  0x6e   :  { %v178_v25 = vsel %vm123_vm10, %v168_v19, 0.0  ;;  %v3107_v19 = vmul.f32 %v286_v61, %v2787_v30 }
  0x6f   :  { %v3065_v48 = vmul.f32 %v238_v23, %v178_v25  ;;  %v3075_v52 = vmul.f32 %v244_v35, %v178_v25  ;;  %v3077_v53 = vmul.f32 %v250_v38, %v178_v25  ;;  %v3079_v54 = vmul.f32 %v256_v41, %v178_v25 }
  0x70   :  { %v3110_v25 = vmul.f32 %v292_v63, %v2787_v30  ;;  %v3143_v30 = vmul.f32 %v292_v63, %v2749_v17  ;;  %v3169_v63 = vmul.f32 %v310_v60, %v2753_v18 }
  0x71   :  { %v346_v46 = vstv %s3042_s5  ;;  %s5374_s5 = sld [smem:[#allocation11_spill]] }
  0x72   :  { %872 = vrot.lane.b32.xlu1 %v2996_v0, %s5353_s13  ;;  %870 = vrot.lane.b32.xlu0 %v3000_v7, %s5353_s13  ;;  %v3228_v20 = vmul.f32 %v346_v46, %v2806_v36 }
  0x73   :  { %874 = vrot.lane.b32.xlu2 %v3071_v50, %s5353_s13 }
  0x74   :  { %5364 = vst [vmem:[#allocation38_spill] sm:$0xff] %v3228_v20  ;;  %v5397_v20 = vstv %s2880_s16  ;;  %s3467_s16 = sld [smem:[#allocation2 + $0x2b]] }
  0x75   :  { %v166_v5 = vpop.permute.xlu2 %165 }
  0x76   :  { %v177_v44 = vsel %vm123_vm10, %v166_v5, 0.0  ;;  %v3140_v5 = vmul.f32 %v286_v61, %v2749_v17  ;;  %v3166_v61 = vmul.f32 %v328_v10, %v2791_v31 }
  0x77   :  { %v3127_v56 = vmul.f32 %v238_v23, %v177_v44  ;;  %v3129_v32 = vmul.f32 %v244_v35, %v177_v44  ;;  %v3131_v33 = vmul.f32 %v250_v38, %v177_v44  ;;  %v3133_v15 = vmul.f32 %v256_v41, %v177_v44 }
  0x78   :  { %v3150_v23 = vmul.f32 %v310_v60, %v2791_v31  ;;  %v3153_v35 = vmul.f32 %v298_v2, %v2749_v17  ;;  %v3156_v38 = vmul.f32 %v304_v45, %v2749_v17  ;;  %v3160_v41 = vmul.f32 %v316_v57, %v2791_v31 }
  0x79   :  { %v3163_v44 = vmul.f32 %v322_v12, %v2791_v31  ;;  %v3172_v17 = vmul.f32 %v316_v57, %v2753_v18  ;;  %v3175_v2 = vmul.f32 %v322_v12, %v2753_v18  ;;  %v3178_v45 = vmul.f32 %v328_v10, %v2753_v18 }
  0x7a   :  { %1078 = vrot.lane.b32.xlu1 %v2922_v49, %s5356_s28  ;;  %876 = vrot.lane.b32.xlu0 %v3015_v14, %s5353_s13  ;;  %v340_v31 = vstv %s3030_s11  ;;  %v352_v60 = vstv %s3048_s10  ;;  %v3188_v57 = vmul.f32 %v358_v43, %v2818_v39  ;;  %v3197_v10 = vmul.f32 %v370_v42, %v2818_v39  ;;  %s5376_s10 = sld [smem:[#allocation13_spill]] }
  0x7b   :  { %1080 = vrot.lane.b32.xlu2 %v2950_v59, %s5356_s28  ;;  %v364_v12 = vstv %s3073_s14  ;;  %v3225_v49 = vmul.f32 %v340_v31, %v2806_v36  ;;  %v3231_v26 = vmul.f32 %v352_v60, %v2806_v36  ;;  %v5366_v59 = vstv %s3104_s1  ;;  %s5377_s14 = sld [smem:[#allocation15_spill]] }
  0x7c   :  { %5357 = vst [vmem:[#allocation31_spill] sm:$0xff] %v3188_v57  ;;  %v3194_v18 = vmul.f32 %v364_v12, %v2818_v39  ;;  %v3217_v39 = vmul.f32 %v334_v47, %v2806_v36  ;;  %v5391_v57 = vstv %s2888_s18  ;;  %s3336_s11 = sld [smem:[#allocation2 + $0x28]] }
  0x7d   :  { %v382_v13 = vpop.permute.xlu2 %381  ;;  %5359 = vst [vmem:[#allocation33_spill] sm:$0xff] %v3197_v10  ;;  %v1221_v10 = vrot.slane %v3206_v62, 7 }
  0x7e   :  { %5358 = vst [vmem:[#allocation32_spill] sm:$0xff] %v3194_v18  ;;  %v397_v51 = vsel %vm122_vm11, %v382_v13, 0.0  ;;  %v5372_v13 = vstv %s3135_s27 }
  0x7f   :  { %5365 = vst [vmem:[#allocation39_spill] sm:$0xff] %v3231_v26  ;;  %v3243_v1 = vmul.f32 %v5366_v59, %v397_v51  ;;  %v3247_v37 = vmul.f32 %v5368_v27, %v397_v51  ;;  %v3251_v36 = vmul.f32 %v5370_v11, %v397_v51  ;;  %v3258_v18 = vmul.f32 %v5372_v13, %v397_v51 }
  0x80   :  { %v3263_v59 = vmul.f32 %v334_v47, %v2763_v22  ;;  %v3268_v51 = vmul.f32 %v340_v31, %v2763_v22  ;;  %v3271_v13 = vmul.f32 %v346_v46, %v2763_v22  ;;  %v3277_v47 = vmul.f32 %v358_v43, %v2822_v40 }
  0x81   :  { %5367 = vst [vmem:[#allocation40_spill] sm:$0xff] %v3243_v1  ;;  %v5385_v43 = vrot.slane %v3222_v8, 7 }
  0x82   :  { %1084 = vrot.lane.b32.xlu1 %v2990_v6, %s5356_s28  ;;  %1082 = vrot.lane.b32.xlu0 %v2946_v58, %s5356_s28  ;;  %5369 = vst [vmem:[#allocation41_spill] sm:$0xff] %v3247_v37  ;;  %v5290_v6 = vrot.slane %v3211_v4, 7  ;;  %v3274_v58 = vmul.f32 %v352_v60, %v2763_v22  ;;  %v5390_v4 = vstv %s2882_s17 }
  0x83   :  { %5371 = vst [vmem:[#allocation42_spill] sm:$0xff] %v3251_v36  ;;  %1086 = vrot.lane.b32.xlu2 %v3000_v7, %s5356_s28  ;;  %v3293_v60 = vsel %vm140_vm0, %v5385_v43, %v1221_v10  ;;  %v5386_v7 = vstv %s2860_s9  ;;  %v5388_v36 = vstv %s5376_s10 }
  0x84   :  { %5373 = vst [vmem:[#allocation43_spill] sm:$0xff] %v3258_v18  ;;  %v160_v11 = vpop.permute.xlu0 %159  ;;  %v164_v27 = vpop.permute.xlu1 %163  ;;  %v1229_v22 = vsel %vm140_vm0, %v1221_v10, %v5290_v6  ;;  %v5394_v10 = vstv %s5381_s15 }
  0x85   :  { %5375 = vst [vmem:[#allocation44_spill] sm:$0xff] %v3263_v59  ;;  %v174_v31 = vsel %vm123_vm10, %v160_v11, 0.0  ;;  %v176_v46 = vsel %vm123_vm10, %v164_v27, 0.0  ;;  %v5387_v11 = vstv %s5374_s5  ;;  %v5389_v27 = vstv %s5377_s14 }
  0x86   :  { %5378 = vst [vmem:[#allocation45_spill] sm:$0xff] %v3268_v51  ;;  %v184_v62 = vmul.f32 %v5386_v7, %v174_v31  ;;  %v192_v18 = vmul.f32 %v5387_v11, %v174_v31  ;;  %v200_v37 = vmul.f32 %v5388_v36, %v174_v31  ;;  %v208_v1 = vmul.f32 %v5389_v27, %v174_v31  ;;  %v388_v31 = vpop.permute.xlu2 %387 }
  0x87   :  { %5379 = vst [vmem:[#allocation46_spill] sm:$0xff] %v3271_v13  ;;  %v222_v6 = vmul.f32 %v5391_v57, %v176_v46  ;;  %v5393_v13 = vstv %s2895_s20  ;;  %v5395_v59 = vstv %s5383_s21  ;;  %v5396_v7 = vstv %s5384_s3 }
  0x88   :  { %5380 = vst [vmem:[#allocation47_spill] sm:$0xff] %v3274_v58  ;;  %v5392_v58 = vstv %s2890_s19  ;;  %v234_v51 = vmul.f32 %v5393_v13, %v176_v46  ;;  %v188_v43 = vadd.f32 %v5394_v10, %v184_v62  ;;  %v196_v26 = vadd.f32 %v5395_v59, %v192_v18 }
  0x89   :  { %5382 = vst [vmem:[#allocation48_spill] sm:$0xff] %v3277_v47  ;;  %v216_v47 = vmul.f32 %v5390_v4, %v176_v46  ;;  %v228_v8 = vmul.f32 %v5392_v58, %v176_v46  ;;  %v204_v11 = vadd.f32 %v5396_v7, %v200_v37  ;;  %v212_v36 = vadd.f32 %v5397_v20, %v208_v1 }
  0x8a   :  { %v3323_v4 = vsel %vm2794_vm3, %v1229_v22, 0.0  ;;  %v3326_v58 = vmul.f32 %v364_v12, %v2822_v40  ;;  %v3329_v57 = vmul.f32 %v370_v42, %v2822_v40  ;;  %v3332_v62 = vmul.f32 %v376_v16, %v2822_v40  ;;  %1090 = vrot.lane.b32.xlu1 %v3071_v50, %s5356_s28  ;;  %1088 = vrot.lane.b32.xlu0 %v2996_v0, %s5356_s28 }
  0x8b   :  { %v218_v18 = vadd.f32 %v216_v47, %v188_v43  ;;  %v224_v59 = vadd.f32 %v222_v6, %v196_v26  ;;  %v230_v37 = vadd.f32 %v228_v8, %v204_v11  ;;  %v236_v13 = vadd.f32 %v234_v51, %v212_v36  ;;  %1092 = vrot.lane.b32.xlu2 %v3015_v14, %s5356_s28  ;;  %v3375_v11 = vld [vmem:[%s5246_s0 + $0x70] sm:$0xff]  ;;  %s3661_s28 = sld [smem:[#allocation2 + $0x46]] }
  0x8c   :  { %v5295_v1 = vstv %s3254_s7  ;;  %v400_v26 = vsel %vm122_vm11, %v388_v31, 0.0  ;;  %v158_v42 = vpop.permute.xlu0 %157  ;;  %v162_v12 = vpop.permute.xlu1 %161  ;;  %v5398_v51 = vstv %s2860_s9  ;;  %v5399_v46 = vstv %s5374_s5  ;;  %5402 = vst [vmem:[#allocation49_spill] sm:$0xff] %v3375_v11  ;;  %s3599_s5 = sld [smem:[#allocation2 + $0x39]] }
  0x8d   :  { %v242_v40 = vadd.f32 %v3065_v48, %v218_v18  ;;  %v248_v6 = vadd.f32 %v3075_v52, %v224_v59  ;;  %v254_v8 = vadd.f32 %v3077_v53, %v230_v37  ;;  %v260_v16 = vadd.f32 %v3079_v54, %v236_v13  ;;  %s3654_s9 = sld [smem:[#allocation2 + $0x45]] }
  0x8e   :  { %v173_v48 = vsel %vm123_vm10, %v158_v42, 0.0  ;;  %v175_v52 = vsel %vm123_vm10, %v162_v12, 0.0  ;;  %v3360_v54 = vmul.f32 %v5294_v34, %v400_v26  ;;  %v5400_v27 = vstv %s5376_s10  ;;  %s3607_s10 = sld [smem:[#allocation2 + $0x3a]] }
  0x8f   :  { %v183_v47 = vmul.f32 %v5398_v51, %v173_v48  ;;  %v191_v22 = vmul.f32 %v5399_v46, %v173_v48  ;;  %v199_v10 = vmul.f32 %v5400_v27, %v173_v48  ;;  %v5401_v43 = vstv %s5377_s14  ;;  %s3613_s14 = sld [smem:[#allocation2 + $0x3c]] }
  0x90   :  { %v207_v7 = vmul.f32 %v5401_v43, %v173_v48  ;;  %v5403_v36 = vstv %s2882_s17  ;;  %v5404_v18 = vstv %s2888_s18  ;;  %v5405_v37 = vstv %s2890_s19  ;;  %s3489_s17 = sld [smem:[#allocation2 + $0x2c]] }
  0x91   :  { %v215_v31 = vmul.f32 %v5403_v36, %v175_v52  ;;  %v221_v59 = vmul.f32 %v5404_v18, %v175_v52  ;;  %v227_v13 = vmul.f32 %v5405_v37, %v175_v52  ;;  %v5406_v42 = vstv %s2895_s20  ;;  %v3396_v36 = vld [vmem:[%s5246_s0 + $0x68] sm:$0xff]  ;;  %s3495_s18 = sld [smem:[#allocation2 + $0x2d]] }
  0x92   :  { %v233_v12 = vmul.f32 %v5406_v42, %v175_v52  ;;  %v5407_v51 = vstv %s5381_s15  ;;  %v5408_v46 = vstv %s5383_s21  ;;  %v5409_v27 = vstv %s5384_s3  ;;  %5411 = vst [vmem:[#allocation50_spill] sm:$0xff] %v3396_v36  ;;  %1244 = vrot.lane.b32.xlu1 %v3093_v28, %s5353_s13  ;;  %s3531_s19 = sld [smem:[#allocation2 + $0x2e]] }
  0x93   :  { %v187_v34 = vadd.f32 %v5407_v51, %v183_v47  ;;  %v195_v53 = vadd.f32 %v5408_v46, %v191_v22  ;;  %v203_v48 = vadd.f32 %v5409_v27, %v199_v10  ;;  %v5410_v43 = vmov %v5397_v20  ;;  %1242 = vrot.lane.b32.xlu0 %v3083_v55, %s5353_s13  ;;  %s3533_s20 = sld [smem:[#allocation2 + $0x2f]] }
  0x94   :  { %v211_v20 = vadd.f32 %v5410_v43, %v207_v7  ;;  %v3400_v18 = vmul.f32 %v5295_v1, %v400_v26  ;;  %v5412_v37 = vstv %s3265_s12  ;;  %v5413_v47 = vstv %s3295_s8  ;;  %s3615_s15 = sld [smem:[#allocation2 + $0x3d]] }
  0x95   :  { %v3404_v52 = vmul.f32 %v5412_v37, %v400_v26  ;;  %v3408_v42 = vmul.f32 %v5413_v47, %v400_v26  ;;  %v1224_v22 = vrot.slane %v3375_v11, 7  ;;  %v217_v10 = vadd.f32 %v215_v31, %v187_v34  ;;  %s3617_s21 = sld [smem:[#allocation2 + $0x3e]] }
  0x96   :  { %v223_v51 = vadd.f32 %v221_v59, %v195_v53  ;;  %v229_v46 = vadd.f32 %v227_v13, %v203_v48  ;;  %v235_v7 = vadd.f32 %v233_v12, %v211_v20  ;;  %v5414_v27 = vrot.slane %v3028_v21, 7  ;;  %v170_v12 = vpop.permute.xlu0 %169  ;;  %v172_v48 = vpop.permute.xlu1 %171  ;;  %s3619_s3 = sld [smem:[#allocation2 + $0x3f]] }
  0x97   :  { %v5304_v34 = vrot.slane %v3396_v36, 7  ;;  %v241_v31 = vadd.f32 %v3127_v56, %v217_v10  ;;  %v179_v43 = vsel %vm123_vm10, %v170_v12, 0.0  ;;  %v180_v37 = vsel %vm123_vm10, %v172_v48, 0.0 }
  0x98   :  { %v3419_v26 = vsel %vm140_vm0, %v1224_v22, %v5414_v27  ;;  %v247_v59 = vadd.f32 %v3129_v32, %v223_v51  ;;  %v253_v21 = vadd.f32 %v3131_v33, %v229_v46  ;;  %v259_v13 = vadd.f32 %v3133_v15, %v235_v7 }
  0x99   :  { %v3436_v56 = vsel %vm140_vm0, %v5304_v34, %v1224_v22  ;;  %v5415_v47 = vstv %s2911_s23  ;;  %v5416_v33 = vstv %s2917_s24  ;;  %v5417_v15 = vstv %s2925_s25  ;;  %s3535_s23 = sld [smem:[#allocation2 + $0x30]] }
  0x9a   :  { %v263_v10 = vmul.f32 %v5415_v47, %v179_v43  ;;  %v269_v51 = vmul.f32 %v5416_v33, %v179_v43  ;;  %v275_v46 = vmul.f32 %v5417_v15, %v179_v43  ;;  %v5418_v7 = vstv %s2935_s26  ;;  %1250 = vrot.lane.b32.xlu1 %v3323_v4, %s5353_s13  ;;  %s3541_s24 = sld [smem:[#allocation2 + $0x31]] }
  0x9b   :  { %v281_v27 = vmul.f32 %v5418_v7, %v179_v43  ;;  %v5419_v53 = vmov %v5415_v47  ;;  %v5420_v20 = vmov %v5416_v33  ;;  %v5421_v48 = vmov %v5417_v15  ;;  %1248 = vrot.lane.b32.xlu0 %v3293_v60, %s5353_s13  ;;  %s3555_s25 = sld [smem:[#allocation2 + $0x32]] }
  0x9c   :  { %v264_v12 = vmul.f32 %v5419_v53, %v180_v37  ;;  %v270_v1 = vmul.f32 %v5420_v20, %v180_v37  ;;  %v276_v14 = vmul.f32 %v5421_v48, %v180_v37  ;;  %v5422_v0 = vmov %v5418_v7  ;;  %s3563_s26 = sld [smem:[#allocation2 + $0x33]] }
  0x9d   :  { %v282_v50 = vmul.f32 %v5422_v0, %v180_v37  ;;  %v265_v11 = vadd.f32 %v263_v10, %v241_v31  ;;  %v271_v22 = vadd.f32 %v269_v51, %v247_v59  ;;  %v277_v34 = vadd.f32 %v275_v46, %v253_v21  ;;  %v5428_v59 = vld [vmem:[#allocation47_spill] sm:$0xff]  ;;  %v5431_v37 = vld [vmem:[#allocation33_spill] sm:$0xff]  ;;  %v5433_v10 = vld [vmem:[#allocation48_spill] sm:$0xff] }
  0x9e   :  { %v283_v32 = vadd.f32 %v281_v27, %v259_v13  ;;  %v266_v55 = vadd.f32 %v264_v12, %v242_v40  ;;  %v272_v47 = vadd.f32 %v270_v1, %v248_v6  ;;  %v278_v36 = vadd.f32 %v276_v14, %v254_v8  ;;  %v5423_v6 = vld [vmem:[#allocation38_spill] sm:$0xff]  ;;  %v5424_v8 = vld [vmem:[#allocation39_spill] sm:$0xff]  ;;  %v5430_v13 = vld [vmem:[#allocation32_spill] sm:$0xff] }
  0x9f   :  { %v284_v33 = vadd.f32 %v282_v50, %v260_v16  ;;  %v289_v15 = vadd.f32 %v3107_v19, %v265_v11  ;;  %v295_v43 = vadd.f32 %v3110_v25, %v271_v22  ;;  %v301_v53 = vadd.f32 %v3113_v29, %v277_v34  ;;  %v386_v29 = vpop.permute.xlu1 %385  ;;  %v5425_v16 = vld [vmem:[#allocation44_spill] sm:$0xff]  ;;  %v5426_v11 = vld [vmem:[#allocation45_spill] sm:$0xff]  ;;  %v5427_v34 = vld [vmem:[#allocation46_spill] sm:$0xff] }
  0xa0   :  { %v307_v20 = vadd.f32 %v3121_v24, %v283_v32  ;;  %v290_v0 = vadd.f32 %v3140_v5, %v266_v55  ;;  %v296_v31 = vadd.f32 %v3143_v30, %v272_v47  ;;  %v302_v40 = vadd.f32 %v3153_v35, %v278_v36  ;;  %v384_v55 = vpop.permute.xlu0 %383  ;;  %v5429_v21 = vld [vmem:[#allocation31_spill] sm:$0xff]  ;;  %v5432_v32 = vld [vmem:[#allocation34_spill] sm:$0xff]  ;;  %v5434_v12 = vld [vmem:[#allocation40_spill] sm:$0xff] }
  0xa1   :  { %v308_v14 = vadd.f32 %v3156_v38, %v284_v33  ;;  %v313_v50 = vadd.f32 %v3150_v23, %v289_v15  ;;  %v319_v24 = vadd.f32 %v3160_v41, %v295_v43  ;;  %v325_v19 = vadd.f32 %v3163_v44, %v301_v53  ;;  %v5435_v22 = vld [vmem:[#allocation41_spill] sm:$0xff]  ;;  %v5436_v33 = vld [vmem:[#allocation42_spill] sm:$0xff]  ;;  %v5437_v43 = vld [vmem:[#allocation43_spill] sm:$0xff] }
  0xa2   :  { %v331_v25 = vadd.f32 %v3166_v61, %v307_v20  ;;  %v314_v5 = vadd.f32 %v3169_v63, %v290_v0  ;;  %v320_v30 = vadd.f32 %v3172_v17, %v296_v31  ;;  %v326_v35 = vadd.f32 %v3175_v2, %v302_v40  ;;  %1256 = vrot.lane.b32.xlu1 %v3419_v26, %s5353_s13 }
  0xa3   :  { %v332_v38 = vadd.f32 %v3178_v45, %v308_v14  ;;  %v337_v1 = vadd.f32 %v3217_v39, %v313_v50  ;;  %v343_v23 = vadd.f32 %v3225_v49, %v319_v24  ;;  %v349_v41 = vadd.f32 %v5423_v6, %v325_v19 }
  0xa4   :  { %v355_v44 = vadd.f32 %v5424_v8, %v331_v25  ;;  %v338_v61 = vadd.f32 %v5425_v16, %v314_v5  ;;  %v344_v36 = vadd.f32 %v5426_v11, %v320_v30  ;;  %v350_v63 = vadd.f32 %v5427_v34, %v326_v35  ;;  %v394_v11 = vpop.permute.xlu2 %393 }
  0xa5   :  { %v356_v17 = vadd.f32 %v5428_v59, %v332_v38  ;;  %v361_v2 = vadd.f32 %v5429_v21, %v337_v1  ;;  %v367_v45 = vadd.f32 %v5430_v13, %v343_v23  ;;  %v373_v39 = vadd.f32 %v5431_v37, %v349_v41 }
  0xa6   :  { %v379_v49 = vadd.f32 %v5432_v32, %v355_v44  ;;  %v362_v51 = vadd.f32 %v5433_v10, %v338_v61  ;;  %v368_v46 = vadd.f32 %v3326_v58, %v344_v36  ;;  %v374_v7 = vadd.f32 %v3329_v57, %v350_v63 }
  0xa7   :  { %v380_v27 = vadd.f32 %v3332_v62, %v356_v17  ;;  %v409_v48 = vadd.f32 %v5434_v12, %v361_v2  ;;  %v415_v47 = vadd.f32 %v5435_v22, %v367_v45  ;;  %v421_v15 = vadd.f32 %v5436_v33, %v373_v39  ;;  %v392_v30 = vpop.permute.xlu1 %391 }
  0xa8   :  { %v427_v53 = vadd.f32 %v5437_v43, %v379_v49  ;;  %v398_v58 = vsel %vm122_vm11, %v384_v55, 0.0  ;;  %v399_v57 = vsel %vm122_vm11, %v386_v29, 0.0  ;;  %v3510_v20 = vsel %vm2808_vm4, %v3436_v56, 0.0  ;;  %v390_v55 = vpop.permute.xlu0 %389 }
  0xa9   :  { %v472_v0 = vstv %s3467_s16  ;;  %v5439_v31 = vstv %s3104_s1  ;;  %v5440_v14 = vstv %s3116_s22  ;;  %v5441_v24 = vstv %s3125_s2  ;;  %s5453_s1 = smov 120   ;;  %s3567_s22 = sld [smem:[#allocation2 + $0x34]] }
  0xaa   :  { %v408_v40 = vmul.f32 %v5439_v31, %v398_v58  ;;  %v414_v50 = vmul.f32 %v5440_v14, %v398_v58  ;;  %v420_v19 = vmul.f32 %v5441_v24, %v398_v58  ;;  %v5442_v25 = vstv %s3135_s27  ;;  %1254 = vrot.lane.b32.xlu0 %v3510_v20, %s5353_s13  ;;  %s3579_s2 = sld [smem:[#allocation2 + $0x35]] }
  0xab   :  { %v426_v5 = vmul.f32 %v5442_v25, %v398_v58  ;;  %v5443_v29 = vstv %s3235_s6  ;;  %v5444_v38 = vstv %s3254_s7  ;;  %v5445_v56 = vstv %s3265_s12  ;;  %s3581_s27 = sld [smem:[#allocation2 + $0x36]] }
  0xac   :  { %v431_v35 = vmul.f32 %v5443_v29, %v399_v57  ;;  %v437_v1 = vmul.f32 %v5444_v38, %v399_v57  ;;  %v443_v23 = vmul.f32 %v5445_v56, %v399_v57  ;;  %v5446_v6 = vstv %s3295_s8  ;;  %s3591_s6 = sld [smem:[#allocation2 + $0x37]] }
  0xad   :  { %v449_v41 = vmul.f32 %v5446_v6, %v399_v57  ;;  %v410_v8 = vadd.f32 %v408_v40, %v362_v51  ;;  %v416_v44 = vadd.f32 %v414_v50, %v368_v46  ;;  %v422_v16 = vadd.f32 %v420_v19, %v374_v7  ;;  %v5454_v19 = vld [vmem:[#allocation37_spill] sm:$0xff]  ;;  %s3595_s7 = sld [smem:[#allocation2 + $0x38]] }
  0xae   :  { %v428_v61 = vadd.f32 %v426_v5, %v380_v27  ;;  %v433_v36 = vadd.f32 %v431_v35, %v409_v48  ;;  %v439_v34 = vadd.f32 %v437_v1, %v415_v47  ;;  %v445_v63 = vadd.f32 %v443_v23, %v421_v15  ;;  %v5456_v5 = vld [vmem:[#allocation28_spill] sm:$0xff]  ;;  %s3611_s12 = sld [smem:[#allocation2 + $0x3b]] }
  0xaf   :  { %v451_v59 = vadd.f32 %v449_v41, %v427_v53  ;;  %v434_v17 = vadd.f32 %v3360_v54, %v410_v8  ;;  %v440_v21 = vadd.f32 %v3400_v18, %v416_v44  ;;  %v446_v2 = vadd.f32 %v3404_v52, %v422_v16  ;;  %v502_v14 = vpop.permute.xlu1 %501  ;;  %v504_v44 = vpop.permute.xlu2 %503  ;;  %s3632_s8 = sld [smem:[#allocation2 + $0x40]] }
  0xb0   :  { %v452_v13 = vadd.f32 %v3408_v42, %v428_v61  ;;  %v401_v45 = vsel %vm122_vm11, %v390_v55, 0.0  ;;  %v402_v37 = vsel %vm122_vm11, %v392_v30, 0.0  ;;  %v478_v39 = vstv %s3489_s17  ;;  %v396_v58 = vpop.permute.xlu0 %395  ;;  %s3663_s16 = sld [smem:[#allocation2 + $0x47]] }
  0xb1   :  { %v484_v32 = vstv %s3495_s18  ;;  %v5447_v49 = vstv %s3336_s11  ;;  %v5448_v54 = vstv %s3345_s29  ;;  %v5449_v46 = vstv %s3362_s30  ;;  %s3644_s11 = sld [smem:[#allocation2 + $0x41]] }
  0xb2   :  { %v455_v10 = vmul.f32 %v5447_v49, %v401_v45  ;;  %v461_v51 = vmul.f32 %v5448_v54, %v401_v45  ;;  %v467_v18 = vmul.f32 %v5449_v46, %v401_v45  ;;  %v473_v7 = vmul.f32 %v472_v0, %v401_v45  ;;  %1468 = vrot.lane.b32.xlu0 %v3093_v28, %s5453_s1  ;;  %s3646_s29 = sld [smem:[#allocation2 + $0x42]] }
  0xb3   :  { %v5450_v52 = vmov %v5447_v49  ;;  %v5451_v27 = vmov %v5448_v54  ;;  %v5452_v48 = vmov %v5449_v46  ;;  %v474_v47 = vmul.f32 %v472_v0, %v402_v37  ;;  %s3650_s30 = sld [smem:[#allocation2 + $0x43]] }
  0xb4   :  { %v456_v42 = vmul.f32 %v5450_v52, %v402_v37  ;;  %v462_v12 = vmul.f32 %v5451_v27, %v402_v37  ;;  %v468_v22 = vmul.f32 %v5452_v48, %v402_v37  ;;  %v457_v33 = vadd.f32 %v455_v10, %v433_v36  ;;  %s3688_s17 = sld [smem:[#allocation2 + $0x48]] }
  0xb5   :  { %v463_v15 = vadd.f32 %v461_v51, %v439_v34  ;;  %v469_v43 = vadd.f32 %v467_v18, %v445_v63  ;;  %v475_v53 = vadd.f32 %v473_v7, %v451_v59  ;;  %v476_v40 = vadd.f32 %v474_v47, %v452_v13  ;;  %s3800_s18 = sld [smem:[#allocation2 + $0x56]] }
  0xb6   :  { %v458_v57 = vadd.f32 %v456_v42, %v434_v17  ;;  %v464_v62 = vadd.f32 %v462_v12, %v440_v21  ;;  %v470_v31 = vadd.f32 %v468_v22, %v446_v2  ;;  %v490_v0 = vstv %s3531_s19  ;;  %s3909_s19 = sld [smem:[#allocation2 + $0x69]] }
  0xb7   :  { %v496_v50 = vstv %s3533_s20  ;;  %v403_v24 = vsel %vm122_vm11, %v394_v11, 0.0  ;;  %v5455_v25 = vrot.slane %v5454_v19, 7  ;;  %v5457_v55 = vrot.slane %v5456_v5, 7  ;;  %s3694_s20 = sld [smem:[#allocation2 + $0x49]] }
  0xb8   :  { %v479_v29 = vmul.f32 %v478_v39, %v403_v24  ;;  %v485_v35 = vmul.f32 %v484_v32, %v403_v24  ;;  %v491_v38 = vmul.f32 %v490_v0, %v403_v24  ;;  %v497_v1 = vmul.f32 %v496_v50, %v403_v24  ;;  %v506_v10 = vpop.permute.xlu0 %505 }
  0xb9   :  { %v1231_v30 = vsel %vm140_vm0, %v5457_v55, %v5455_v25  ;;  %v404_v6 = vsel %vm122_vm11, %v396_v58, 0.0  ;;  %v526_v41 = vstv %s3535_s23  ;;  %v532_v8 = vstv %s3541_s24  ;;  %s3699_s23 = sld [smem:[#allocation2 + $0x4a]] }
  0xba   :  { %v3585_v23 = vsel %vm2772_vm2, %v1231_v30, 0.0  ;;  %v481_v16 = vadd.f32 %v479_v29, %v457_v33  ;;  %v487_v61 = vadd.f32 %v485_v35, %v463_v15  ;;  %v493_v11 = vadd.f32 %v491_v38, %v469_v43  ;;  %1474 = vrot.lane.b32.xlu0 %v3323_v4, %s5453_s1  ;;  %v508_v33 = vpop.permute.xlu1 %507  ;;  %s4057_s24 = sld [smem:[#allocation2 + $0x82]] }
  0xbb   :  { %v499_v36 = vadd.f32 %v497_v1, %v475_v53  ;;  %1470 = vrot.lane.b32.xlu1 %v3585_v23, %s5453_s1  ;;  %v480_v34 = vmul.f32 %v478_v39, %v404_v6  ;;  %v486_v63 = vmul.f32 %v484_v32, %v404_v6  ;;  %v492_v59 = vmul.f32 %v490_v0, %v404_v6 }
  0xbc   :  { %v498_v17 = vmul.f32 %v496_v50, %v404_v6  ;;  %1246 = vrot.lane.b32.xlu2 %v3585_v23, %s5353_s13  ;;  %v538_v21 = vstv %s3555_s25  ;;  %v544_v2 = vstv %s3563_s26  ;;  %v517_v13 = vsel %vm123_vm10, %v502_v14, 0.0  ;;  %s3705_s26 = sld [smem:[#allocation2 + $0x4b]] }
  0xbd   :  { %v518_v45 = vsel %vm123_vm10, %v504_v44, 0.0  ;;  %v482_v37 = vadd.f32 %v480_v34, %v458_v57  ;;  %v488_v39 = vadd.f32 %v486_v63, %v464_v62  ;;  %v494_v32 = vadd.f32 %v492_v59, %v470_v31  ;;  %v5459_v57 = vld [vmem:[#allocation50_spill] sm:$0xff]  ;;  %v5461_v31 = vld [vmem:[#allocation36_spill] sm:$0xff]  ;;  %v510_v44 = vpop.permute.xlu2 %509  ;;  %s4068_s25 = sld [smem:[#allocation2 + $0x83]] }
  0xbe   :  { %v500_v49 = vadd.f32 %v498_v17, %v476_v40  ;;  %v527_v54 = vmul.f32 %v526_v41, %v517_v13  ;;  %v533_v51 = vmul.f32 %v532_v8, %v517_v13  ;;  %v539_v46 = vmul.f32 %v538_v21, %v517_v13 }
  0xbf   :  { %v545_v18 = vmul.f32 %v544_v2, %v517_v13  ;;  %v528_v7 = vmul.f32 %v526_v41, %v518_v45  ;;  %v534_v52 = vmul.f32 %v532_v8, %v518_v45  ;;  %v540_v42 = vmul.f32 %v538_v21, %v518_v45 }
  0xc0   :  { %v546_v27 = vmul.f32 %v544_v2, %v518_v45  ;;  %v529_v12 = vadd.f32 %v527_v54, %v481_v16  ;;  %v535_v48 = vadd.f32 %v533_v51, %v487_v61  ;;  %v541_v22 = vadd.f32 %v539_v46, %v493_v11  ;;  %v512_v21 = vpop.permute.xlu0 %511 }
  0xc1   :  { %v547_v47 = vadd.f32 %v545_v18, %v499_v36  ;;  %v530_v15 = vadd.f32 %v528_v7, %v482_v37  ;;  %v536_v43 = vadd.f32 %v534_v52, %v488_v39  ;;  %v542_v53 = vadd.f32 %v540_v42, %v494_v32 }
  0xc2   :  { %v548_v58 = vadd.f32 %v546_v27, %v500_v49  ;;  %v5460_v62 = vrot.slane %v5459_v57, 7  ;;  %v5462_v40 = vrot.slane %v5461_v31, 7  ;;  %v550_v0 = vstv %s3567_s22  ;;  %1480 = vrot.lane.b32.xlu0 %v3419_v26, %s5453_s1  ;;  %s3935_s22 = sld [smem:[#allocation2 + $0x6e]] }
  0xc3   :  { %v556_v50 = vstv %s3579_s2  ;;  %v562_v24 = vstv %s3581_s27  ;;  %v568_v25 = vstv %s3591_s6  ;;  %v519_v5 = vsel %vm123_vm10, %v506_v10, 0.0  ;;  %s3712_s27 = sld [smem:[#allocation2 + $0x4c]] }
  0xc4   :  { %v3627_v14 = vsel %vm140_vm0, %v5462_v40, %v5460_v62  ;;  %v520_v55 = vsel %vm123_vm10, %v508_v33, 0.0  ;;  %v574_v30 = vstv %s3595_s7  ;;  %v551_v29 = vmul.f32 %v550_v0, %v519_v5  ;;  %s3724_s6 = sld [smem:[#allocation2 + $0x4d]] }
  0xc5   :  { %1476 = vrot.lane.b32.xlu1 %v3627_v14, %s5453_s1  ;;  %1252 = vrot.lane.b32.xlu2 %v3627_v14, %s5353_s13  ;;  %v557_v35 = vmul.f32 %v556_v50, %v519_v5  ;;  %v563_v38 = vmul.f32 %v562_v24, %v519_v5  ;;  %v569_v1 = vmul.f32 %v568_v25, %v519_v5  ;;  %v580_v2 = vstv %s3599_s5  ;;  %s3827_s2 = sld [smem:[#allocation2 + $0x59]] }
  0xc6   :  { %v552_v56 = vmul.f32 %v550_v0, %v520_v55  ;;  %v558_v6 = vmul.f32 %v556_v50, %v520_v55  ;;  %v564_v41 = vmul.f32 %v562_v24, %v520_v55  ;;  %v570_v8 = vmul.f32 %v568_v25, %v520_v55  ;;  %v2618_v24 = vld [vmem:[%s5246_s0] sm:$0xff]  ;;  %s3838_s7 = sld [smem:[#allocation2 + $0x5c]] }
  0xc7   :  { %v553_v16 = vadd.f32 %v551_v29, %v529_v12  ;;  %v559_v61 = vadd.f32 %v557_v35, %v535_v48  ;;  %v565_v11 = vadd.f32 %v563_v38, %v541_v22  ;;  %v571_v36 = vadd.f32 %v569_v1, %v547_v47  ;;  %v5463_v12 = vld [vmem:[#allocation27_spill] sm:$0xff]  ;;  %v514_v29 = vpop.permute.xlu1 %513  ;;  %s3841_s5 = sld [smem:[#allocation2 + $0x5d]] }
  0xc8   :  { %v554_v34 = vadd.f32 %v552_v56, %v530_v15  ;;  %v560_v63 = vadd.f32 %v558_v6, %v536_v43  ;;  %v566_v59 = vadd.f32 %v564_v41, %v542_v53  ;;  %v572_v17 = vadd.f32 %v570_v8, %v548_v58  ;;  %v5464_v15 = vld [vmem:[#allocation30_spill] sm:$0xff]  ;;  %v2619_v56 = vld [vmem:[%s5246_s0 + $0x10] sm:$0xff] }
  0xc9   :  { %v586_v13 = vstv %s3607_s10  ;;  %v592_v45 = vstv %s3611_s12  ;;  %v521_v37 = vsel %vm123_vm10, %v510_v44, 0.0  ;;  %v522_v54 = vsel %vm123_vm10, %v512_v21, 0.0  ;;  %s3729_s10 = sld [smem:[#allocation2 + $0x4e]] }
  0xca   :  { %v575_v39 = vmul.f32 %v574_v30, %v521_v37  ;;  %v581_v32 = vmul.f32 %v580_v2, %v521_v37  ;;  %v587_v49 = vmul.f32 %v586_v13, %v521_v37  ;;  %v593_v10 = vmul.f32 %v592_v45, %v521_v37  ;;  %1590 = vrot.lane.b32.xlu0 %v5454_v19, %s5353_s13  ;;  %s3733_s12 = sld [smem:[#allocation2 + $0x4f]] }
  0xcb   :  { %v598_v51 = vstv %s3613_s14  ;;  %v604_v46 = vstv %s3615_s15  ;;  %v610_v18 = vstv %s3617_s21  ;;  %v576_v48 = vmul.f32 %v574_v30, %v522_v54  ;;  %s3875_s14 = sld [smem:[#allocation2 + $0x62]] }
  0xcc   :  { %v577_v7 = vadd.f32 %v575_v39, %v553_v16  ;;  %v583_v52 = vadd.f32 %v581_v32, %v559_v61  ;;  %v589_v42 = vadd.f32 %v587_v49, %v565_v11  ;;  %v595_v27 = vadd.f32 %v593_v10, %v571_v36  ;;  %v2620_v11 = vld [vmem:[%s5246_s0 + $0x8] sm:$0xff]  ;;  %v2621_v39 = vld [vmem:[%s5246_s0 + $0x18] sm:$0xff]  ;;  %s3877_s15 = sld [smem:[#allocation2 + $0x63]] }
  0xcd   :  { %1586 = vrot.lane.b32.xlu1 %v5463_v12, %s5353_s13  ;;  %v582_v22 = vmul.f32 %v580_v2, %v522_v54  ;;  %v588_v47 = vmul.f32 %v586_v13, %v522_v54  ;;  %v594_v33 = vmul.f32 %v592_v45, %v522_v54  ;;  %1466 = vrot.lane.b32.xlu2 %v5464_v15, %s5453_s1  ;;  %v616_v43 = vstv %s3619_s3  ;;  %v516_v2 = vpop.permute.xlu2 %515  ;;  %v5465_v13 = vld [vmem:[#allocation35_spill] sm:$0xff]  ;;  %s3991_s21 = sld [smem:[#allocation2 + $0x7a]] }
  0xce   :  { %v622_v53 = vstv %s3632_s8  ;;  %v628_v58 = vstv %s3644_s11  ;;  %v634_v62 = vstv %s3646_s29  ;;  %v3678_v31 = vadd.f32 %v576_v48, %v554_v34  ;;  %s3738_s8 = sld [smem:[#allocation2 + $0x50]] }
  0xcf   :  { %v3680_v40 = vadd.f32 %v582_v22, %v560_v63  ;;  %v3682_v0 = vadd.f32 %v588_v47, %v566_v59  ;;  %v3684_v50 = vadd.f32 %v594_v33, %v572_v17  ;;  %v623_v25 = vmul.f32 %v2618_v24, %v622_v53  ;;  %s3742_s11 = sld [smem:[#allocation2 + $0x51]] }
  0xd0   :  { %v629_v5 = vmul.f32 %v2618_v24, %v628_v58  ;;  %v635_v55 = vmul.f32 %v2618_v24, %v634_v62  ;;  %v640_v30 = vstv %s3650_s30  ;;  %v646_v38 = vstv %s3652_s4  ;;  %s3752_s29 = sld [smem:[#allocation2 + $0x52]] }
  0xd1   :  { %v641_v35 = vmul.f32 %v2618_v24, %v640_v30  ;;  %v652_v1 = vstv %s3654_s9  ;;  %v658_v19 = vstv %s3661_s28  ;;  %v647_v6 = vmul.f32 %v2619_v56, %v646_v38  ;;  %s3754_s30 = sld [smem:[#allocation2 + $0x53]] }
  0xd2   :  { %v653_v41 = vmul.f32 %v2619_v56, %v652_v1  ;;  %v659_v8 = vmul.f32 %v2619_v56, %v658_v19  ;;  %v664_v44 = vstv %s3663_s16  ;;  %v523_v61 = vsel %vm123_vm10, %v514_v29, 0.0  ;;  %1596 = vrot.lane.b32.xlu0 %v5459_v57, %s5353_s13  ;;  %s3789_s28 = sld [smem:[#allocation2 + $0x54]] }
  0xd3   :  { %v665_v16 = vmul.f32 %v2619_v56, %v664_v44  ;;  %v624_v36 = vmul.f32 %v2620_v11, %v622_v53  ;;  %v630_v34 = vmul.f32 %v2620_v11, %v628_v58  ;;  %v599_v63 = vmul.f32 %v598_v51, %v523_v61  ;;  %v5466_v56 = vld [vmem:[#allocation49_spill] sm:$0xff]  ;;  %s3796_s16 = sld [smem:[#allocation2 + $0x55]] }
  0xd4   :  { %v605_v59 = vmul.f32 %v604_v46, %v523_v61  ;;  %v611_v17 = vmul.f32 %v610_v18, %v523_v61  ;;  %v617_v21 = vmul.f32 %v616_v43, %v523_v61  ;;  %v636_v45 = vmul.f32 %v2620_v11, %v634_v62  ;;  %s3891_s4 = sld [smem:[#allocation2 + $0x64]] }
  0xd5   :  { %1592 = vrot.lane.b32.xlu1 %v5465_v13, %s5353_s13  ;;  %v642_v37 = vmul.f32 %v2620_v11, %v640_v30  ;;  %v648_v32 = vmul.f32 %v2621_v39, %v646_v38  ;;  %v654_v49 = vmul.f32 %v2621_v39, %v652_v1  ;;  %1472 = vrot.lane.b32.xlu2 %v3293_v60, %s5453_s1  ;;  %v524_v33 = vsel %vm123_vm10, %v516_v2, 0.0  ;;  %s3895_s9 = sld [smem:[#allocation2 + $0x65]] }
  0xd6   :  { %v601_v10 = vadd.f32 %v599_v63, %v577_v7  ;;  %v607_v54 = vadd.f32 %v605_v59, %v583_v52  ;;  %v613_v12 = vadd.f32 %v611_v17, %v589_v42  ;;  %v619_v48 = vadd.f32 %v617_v21, %v595_v27  ;;  %v2624_v59 = vld [vmem:[%s5246_s0 + $0x30] sm:$0xff]  ;;  %s3993_s3 = sld [smem:[#allocation2 + $0x7b]] }
  0xd7   :  { %v660_v22 = vmul.f32 %v2621_v39, %v658_v19  ;;  %v666_v47 = vmul.f32 %v2621_v39, %v664_v44  ;;  %v670_v53 = vstv %s3688_s17  ;;  %v600_v27 = vmul.f32 %v598_v51, %v524_v33  ;;  %s3929_s17 = sld [smem:[#allocation2 + $0x6d]] }
  0xd8   :  { %v625_v7 = vadd.f32 %v623_v25, %v601_v10  ;;  %v631_v52 = vadd.f32 %v629_v5, %v607_v54  ;;  %v637_v58 = vadd.f32 %v635_v55, %v613_v12  ;;  %v643_v42 = vadd.f32 %v641_v35, %v619_v48  ;;  %v3791_v54 = vpop.permute.xlu2 %721 }
  0xd9   :  { %v606_v62 = vmul.f32 %v604_v46, %v524_v33  ;;  %v612_v24 = vmul.f32 %v610_v18, %v524_v33  ;;  %v618_v30 = vmul.f32 %v616_v43, %v524_v33  ;;  %v602_v29 = vadd.f32 %v600_v27, %v3678_v31  ;;  %v2622_v18 = vld [vmem:[%s5246_s0 + $0x20] sm:$0xff] }
  0xda   :  { %v649_v57 = vadd.f32 %v647_v6, %v625_v7  ;;  %v655_v25 = vadd.f32 %v653_v41, %v631_v52  ;;  %v661_v5 = vadd.f32 %v659_v8, %v637_v58  ;;  %v667_v55 = vadd.f32 %v665_v16, %v643_v42 }
  0xdb   :  { %v608_v51 = vadd.f32 %v606_v62, %v3680_v40  ;;  %v614_v46 = vadd.f32 %v612_v24, %v3682_v0  ;;  %v620_v35 = vadd.f32 %v618_v30, %v3684_v50  ;;  %v671_v43 = vmul.f32 %v2622_v18, %v670_v53  ;;  %v3770_v50 = vpop.permute.xlu1 %719  ;;  %v3805_v30 = vld [vmem:[%s5246_s0 + $0x48] sm:$0xff] }
  0xdc   :  { %v676_v38 = vstv %s3694_s20  ;;  %v682_v1 = vstv %s3699_s23  ;;  %v688_v19 = vstv %s3705_s26  ;;  %v626_v31 = vadd.f32 %v624_v36, %v602_v29  ;;  %s3809_s23 = sld [smem:[#allocation2 + $0x57]] }
  0xdd   :  { %1598 = vrot.lane.b32.xlu1 %v5466_v56, %s5353_s13  ;;  %v632_v6 = vadd.f32 %v630_v34, %v608_v51  ;;  %v638_v40 = vadd.f32 %v636_v45, %v614_v46  ;;  %v644_v0 = vadd.f32 %v642_v37, %v620_v35  ;;  %1478 = vrot.lane.b32.xlu2 %v3510_v20, %s5453_s1  ;;  %v694_v16 = vstv %s3712_s27  ;;  %v3778_v34 = vld [vmem:[%s5246_s0 + $0x40] sm:$0xff]  ;;  %v718_v37 = vpop.permute.xlu0 %717  ;;  %s3818_s26 = sld [smem:[#allocation2 + $0x58]] }
  0xde   :  { %v677_v41 = vmul.f32 %v2622_v18, %v676_v38  ;;  %v683_v8 = vmul.f32 %v2622_v18, %v682_v1  ;;  %v689_v44 = vmul.f32 %v2622_v18, %v688_v19  ;;  %v650_v61 = vadd.f32 %v648_v32, %v626_v31  ;;  %1802 = vrot.lane.b32.xlu0 %v3778_v34, %s5453_s1  ;;  %v2626_v51 = vld [vmem:[%s5246_s0 + $0x28] sm:$0xff]  ;;  %s3829_s27 = sld [smem:[#allocation2 + $0x5a]] }
  0xdf   :  { %v656_v11 = vadd.f32 %v654_v49, %v632_v6  ;;  %v662_v63 = vadd.f32 %v660_v22, %v638_v40  ;;  %v668_v36 = vadd.f32 %v666_v47, %v644_v0  ;;  %v695_v17 = vmul.f32 %v2624_v59, %v694_v16  ;;  %s3911_s20 = sld [smem:[#allocation2 + $0x6a]] }
  0xe0   :  { %v700_v21 = vstv %s3724_s6  ;;  %v706_v2 = vstv %s3729_s10  ;;  %v712_v45 = vstv %s3733_s12  ;;  %v742_v10 = vstv %s3738_s8  ;;  %s3836_s6 = sld [smem:[#allocation2 + $0x5b]] }
  0xe1   :  { %v701_v39 = vmul.f32 %v2624_v59, %v700_v21  ;;  %v707_v32 = vmul.f32 %v2624_v59, %v706_v2  ;;  %v713_v49 = vmul.f32 %v2624_v59, %v712_v45  ;;  %v748_v12 = vstv %s3742_s11  ;;  %s3856_s8 = sld [smem:[#allocation2 + $0x5e]] }
  0xe2   :  { %v754_v48 = vstv %s3752_s29  ;;  %v760_v22 = vstv %s3754_s30  ;;  %v673_v47 = vadd.f32 %v671_v43, %v649_v57  ;;  %v679_v33 = vadd.f32 %v677_v41, %v655_v25  ;;  %s3860_s11 = sld [smem:[#allocation2 + $0x5f]] }
  0xe3   :  { %v685_v7 = vadd.f32 %v683_v8, %v661_v5  ;;  %v691_v52 = vadd.f32 %v689_v44, %v667_v55  ;;  %v733_v58 = vsel %vm122_vm11, %v718_v37, 0.0  ;;  %v672_v46 = vmul.f32 %v2626_v51, %v670_v53  ;;  %v3820_v0 = vpop.permute.xlu1 %725  ;;  %v2627_v53 = vld [vmem:[%s5246_s0 + $0x38] sm:$0xff]  ;;  %s3864_s29 = sld [smem:[#allocation2 + $0x60]] }
  0xe4   :  { %v697_v42 = vadd.f32 %v695_v17, %v673_v47  ;;  %v743_v27 = vmul.f32 %v742_v10, %v733_v58  ;;  %v749_v62 = vmul.f32 %v748_v12, %v733_v58  ;;  %v755_v24 = vmul.f32 %v754_v48, %v733_v58  ;;  %s3867_s30 = sld [smem:[#allocation2 + $0x61]] }
  0xe5   :  { %1804 = vrot.lane.b32.xlu1 %v3805_v30, %s5453_s1  ;;  %v703_v57 = vadd.f32 %v701_v39, %v679_v33  ;;  %v709_v25 = vadd.f32 %v707_v32, %v685_v7  ;;  %v715_v5 = vadd.f32 %v713_v49, %v691_v52  ;;  %v761_v55 = vmul.f32 %v760_v22, %v733_v58  ;;  %s4208_s10 = sld [smem:[#allocation2 + $0x8a]] }
  0xe6   :  { %1588 = vrot.lane.b32.xlu2 %v3805_v30, %s5353_s13  ;;  %v745_v29 = vadd.f32 %v743_v27, %v697_v42  ;;  %v678_v35 = vmul.f32 %v2626_v51, %v676_v38  ;;  %v684_v18 = vmul.f32 %v2626_v51, %v682_v1  ;;  %v690_v40 = vmul.f32 %v2626_v51, %v688_v19  ;;  %s4210_s12 = sld [smem:[#allocation2 + $0x8b]] }
  0xe7   :  { %v751_v43 = vadd.f32 %v749_v62, %v703_v57  ;;  %v757_v31 = vadd.f32 %v755_v24, %v709_v25  ;;  %v763_v6 = vadd.f32 %v761_v55, %v715_v5  ;;  %1808 = vrot.lane.b32.xlu0 %v5465_v13, %s5453_s1  ;;  %v674_v41 = vadd.f32 %v672_v46, %v650_v61 }
  0xe8   :  { %v680_v8 = vadd.f32 %v678_v35, %v656_v11  ;;  %v686_v44 = vadd.f32 %v684_v18, %v662_v63  ;;  %v696_v38 = vmul.f32 %v2627_v53, %v694_v16  ;;  %v692_v1 = vadd.f32 %v690_v40, %v668_v36  ;;  %v724_v63 = vpop.permute.xlu0 %723 }
  0xe9   :  { %v702_v19 = vmul.f32 %v2627_v53, %v700_v21  ;;  %v708_v59 = vmul.f32 %v2627_v53, %v706_v2  ;;  %v714_v17 = vmul.f32 %v2627_v53, %v712_v45  ;;  %v734_v13 = vsel %vm122_vm11, %v3770_v50, 0.0  ;;  %v728_v2 = vpop.permute.xlu2 %727  ;;  %v3846_v50 = vld [vmem:[%s5246_s0 + $0x60] sm:$0xff] }
  0xea   :  { %v698_v37 = vadd.f32 %v696_v38, %v674_v41  ;;  %v766_v61 = vstv %s3789_s28  ;;  %v772_v11 = vstv %s3796_s16  ;;  %v744_v21 = vmul.f32 %v742_v10, %v734_v13  ;;  %s3897_s28 = sld [smem:[#allocation2 + $0x66]] }
  0xeb   :  { %v704_v16 = vadd.f32 %v702_v19, %v680_v8  ;;  %v710_v39 = vadd.f32 %v708_v59, %v686_v44  ;;  %v716_v36 = vadd.f32 %v714_v17, %v692_v1  ;;  %v750_v45 = vmul.f32 %v748_v12, %v734_v13  ;;  %v732_v18 = vpop.permute.xlu1 %731  ;;  %v3882_v59 = vld [vmem:[%s5246_s0 + $0x78] sm:$0xff]  ;;  %s3905_s16 = sld [smem:[#allocation2 + $0x67]] }
  0xec   :  { %v756_v32 = vmul.f32 %v754_v48, %v734_v13  ;;  %v762_v49 = vmul.f32 %v760_v22, %v734_v13  ;;  %v778_v47 = vstv %s3800_s18  ;;  %v746_v33 = vadd.f32 %v744_v21, %v698_v37  ;;  %s3907_s18 = sld [smem:[#allocation2 + $0x68]] }
  0xed   :  { %1810 = vrot.lane.b32.xlu1 %v3846_v50, %s5453_s1  ;;  %v784_v7 = vstv %s3809_s23  ;;  %v735_v10 = vsel %vm122_vm11, %v3791_v54, 0.0  ;;  %v736_v12 = vsel %vm122_vm11, %v724_v63, 0.0  ;;  %v752_v48 = vadd.f32 %v750_v45, %v704_v16  ;;  %s3913_s23 = sld [smem:[#allocation2 + $0x6b]] }
  0xee   :  { %1594 = vrot.lane.b32.xlu2 %v3846_v50, %s5353_s13  ;;  %v758_v22 = vadd.f32 %v756_v32, %v710_v39  ;;  %v764_v52 = vadd.f32 %v762_v49, %v716_v36  ;;  %v767_v58 = vmul.f32 %v766_v61, %v735_v10  ;;  %v773_v42 = vmul.f32 %v772_v11, %v735_v10 }
  0xef   :  { %v779_v27 = vmul.f32 %v778_v47, %v735_v10  ;;  %v785_v62 = vmul.f32 %v784_v7, %v735_v10  ;;  %v768_v24 = vmul.f32 %v766_v61, %v736_v12  ;;  %1814 = vrot.lane.b32.xlu0 %v5466_v56, %s5453_s1  ;;  %v774_v57 = vmul.f32 %v772_v11, %v736_v12 }
  0xf0   :  { %v769_v54 = vadd.f32 %v767_v58, %v745_v29  ;;  %v780_v25 = vmul.f32 %v778_v47, %v736_v12  ;;  %v786_v5 = vmul.f32 %v784_v7, %v736_v12  ;;  %v775_v55 = vadd.f32 %v773_v42, %v751_v43  ;;  %v730_v19 = vpop.permute.xlu0 %729 }
  0xf1   :  { %v781_v51 = vadd.f32 %v779_v27, %v757_v31  ;;  %v787_v46 = vadd.f32 %v785_v62, %v763_v6  ;;  %v770_v35 = vadd.f32 %v768_v24, %v746_v33  ;;  %v776_v40 = vadd.f32 %v774_v57, %v752_v48  ;;  %v863_v61 = vpop.permute.xlu2 %862 }
  0xf2   :  { %v782_v41 = vadd.f32 %v780_v25, %v758_v22  ;;  %v788_v8 = vadd.f32 %v786_v5, %v764_v52  ;;  %v790_v44 = vstv %s3818_s26  ;;  %v796_v56 = vstv %s3827_s2  ;;  %s3927_s26 = sld [smem:[#allocation2 + $0x6c]] }
  0xf3   :  { %v802_v29 = vstv %s3829_s27  ;;  %v808_v53 = vstv %s3836_s6  ;;  %v737_v43 = vsel %vm122_vm11, %v3820_v0, 0.0  ;;  %v738_v0 = vsel %vm122_vm11, %v728_v2, 0.0  ;;  %v867_v57 = vpop.permute.xlu1 %866  ;;  %s3937_s2 = sld [smem:[#allocation2 + $0x6f]] }
  0xf4   :  { %v791_v31 = vmul.f32 %v790_v44, %v737_v43  ;;  %v797_v6 = vmul.f32 %v796_v56, %v737_v43  ;;  %v803_v38 = vmul.f32 %v802_v29, %v737_v43  ;;  %v809_v1 = vmul.f32 %v808_v53, %v737_v43  ;;  %s3946_s27 = sld [smem:[#allocation2 + $0x70]] }
  0xf5   :  { %1816 = vrot.lane.b32.xlu1 %v3882_v59, %s5453_s1  ;;  %v814_v17 = vstv %s3838_s7  ;;  %v820_v37 = vstv %s3841_s5  ;;  %v826_v13 = vstv %s3856_s8  ;;  %v792_v36 = vmul.f32 %v790_v44, %v738_v0  ;;  %s3948_s6 = sld [smem:[#allocation2 + $0x71]] }
  0xf6   :  { %1600 = vrot.lane.b32.xlu2 %v3882_v59, %s5353_s13  ;;  %v793_v11 = vadd.f32 %v791_v31, %v769_v54  ;;  %v799_v63 = vadd.f32 %v797_v6, %v775_v55  ;;  %v805_v16 = vadd.f32 %v803_v38, %v781_v51  ;;  %v811_v39 = vadd.f32 %v809_v1, %v787_v46  ;;  %s3950_s7 = sld [smem:[#allocation2 + $0x72]] }
  0xf7   :  { %v798_v21 = vmul.f32 %v796_v56, %v738_v0  ;;  %v804_v2 = vmul.f32 %v802_v29, %v738_v0  ;;  %v810_v45 = vmul.f32 %v808_v53, %v738_v0  ;;  %v832_v32 = vstv %s3860_s11  ;;  %s3952_s5 = sld [smem:[#allocation2 + $0x73]] }
  0xf8   :  { %v739_v49 = vsel %vm122_vm11, %v730_v19, 0.0  ;;  %v740_v47 = vsel %vm122_vm11, %v732_v18, 0.0  ;;  %v887_v33 = vstv %s3864_s29  ;;  %v794_v7 = vadd.f32 %v792_v36, %v770_v35  ;;  %v865_v53 = vpop.permute.xlu0 %864  ;;  %s3961_s8 = sld [smem:[#allocation2 + $0x74]] }
  0xf9   :  { %v800_v10 = vadd.f32 %v798_v21, %v776_v40  ;;  %v806_v12 = vadd.f32 %v804_v2, %v782_v41  ;;  %v812_v48 = vadd.f32 %v810_v45, %v788_v8  ;;  %v815_v22 = vmul.f32 %v814_v17, %v739_v49  ;;  %v3918_v41 = vld [vmem:[%s5246_s0 + $0x50] sm:$0xff]  ;;  %v869_v1 = vpop.permute.xlu2 %868  ;;  %s3963_s11 = sld [smem:[#allocation2 + $0x75]] }
  0xfa   :  { %v821_v52 = vmul.f32 %v820_v37, %v739_v49  ;;  %v827_v58 = vmul.f32 %v826_v13, %v739_v49  ;;  %v833_v42 = vmul.f32 %v832_v32, %v739_v49  ;;  %v816_v27 = vmul.f32 %v814_v17, %v740_v47  ;;  %s3970_s29 = sld [smem:[#allocation2 + $0x76]] }
  0xfb   :  { %v822_v62 = vmul.f32 %v820_v37, %v740_v47  ;;  %v828_v24 = vmul.f32 %v826_v13, %v740_v47  ;;  %v834_v54 = vmul.f32 %v832_v32, %v740_v47  ;;  %v817_v25 = vadd.f32 %v815_v22, %v793_v11 }
  0xfc   :  { %v823_v5 = vadd.f32 %v821_v52, %v799_v63  ;;  %v829_v55 = vadd.f32 %v827_v58, %v805_v16  ;;  %v835_v51 = vadd.f32 %v833_v42, %v811_v39  ;;  %v818_v46 = vadd.f32 %v816_v27, %v794_v7  ;;  %v873_v42 = vpop.permute.xlu1 %872  ;;  %v3957_v27 = vld [vmem:[%s5246_s0 + $0x68] sm:$0xff] }
  0xfd   :  { %v824_v35 = vadd.f32 %v822_v62, %v800_v10  ;;  %v830_v18 = vadd.f32 %v828_v24, %v806_v12  ;;  %v836_v40 = vadd.f32 %v834_v54, %v812_v48  ;;  %v893_v8 = vstv %s3867_s30  ;;  %s3972_s30 = sld [smem:[#allocation2 + $0x77]] }
  0xfe   :  { %1806 = vrot.lane.b32.xlu2 %v3918_v41, %s5453_s1  ;;  %v899_v44 = vstv %s3875_s14  ;;  %v905_v56 = vstv %s3877_s15  ;;  %v878_v29 = vsel %vm123_vm10, %v863_v61, 0.0  ;;  %v911_v19 = vstv %s3891_s4  ;;  %s3974_s14 = sld [smem:[#allocation2 + $0x78]] }
  0xff   :  { %v888_v43 = vmul.f32 %v887_v33, %v878_v29  ;;  %v894_v31 = vmul.f32 %v893_v8, %v878_v29  ;;  %v900_v6 = vmul.f32 %v899_v44, %v878_v29  ;;  %v906_v38 = vmul.f32 %v905_v56, %v878_v29  ;;  %s3981_s15 = sld [smem:[#allocation2 + $0x79]] }
 0x100   :  { %v917_v0 = vstv %s3895_s9  ;;  %v923_v17 = vstv %s3897_s28  ;;  %v929_v37 = vstv %s3905_s16  ;;  %v880_v16 = vsel %vm123_vm10, %v867_v57, 0.0  ;;  %s3999_s4 = sld [smem:[#allocation2 + $0x7c]] }
 0x101   :  { %v890_v13 = vadd.f32 %v888_v43, %v817_v25  ;;  %v896_v11 = vadd.f32 %v894_v31, %v823_v5  ;;  %v902_v61 = vadd.f32 %v900_v6, %v829_v55  ;;  %v908_v63 = vadd.f32 %v906_v38, %v835_v51  ;;  %s4001_s9 = sld [smem:[#allocation2 + $0x7d]] }
 0x102   :  { %v879_v39 = vsel %vm123_vm10, %v865_v53, 0.0  ;;  %v881_v36 = vsel %vm123_vm10, %v869_v1, 0.0  ;;  %v935_v21 = vstv %s3907_s18  ;;  %v912_v2 = vmul.f32 %v911_v19, %v880_v16  ;;  %s4013_s28 = sld [smem:[#allocation2 + $0x7e]] }
 0x103   :  { %v918_v45 = vmul.f32 %v917_v0, %v880_v16  ;;  %v924_v32 = vmul.f32 %v923_v17, %v880_v16  ;;  %v930_v49 = vmul.f32 %v929_v37, %v880_v16  ;;  %v889_v47 = vmul.f32 %v887_v33, %v879_v39  ;;  %s4021_s16 = sld [smem:[#allocation2 + $0x7f]] }
 0x104   :  { %v895_v7 = vmul.f32 %v893_v8, %v879_v39  ;;  %v901_v10 = vmul.f32 %v899_v44, %v879_v39  ;;  %v907_v12 = vmul.f32 %v905_v56, %v879_v39  ;;  %v914_v48 = vadd.f32 %v912_v2, %v890_v13  ;;  %s4033_s18 = sld [smem:[#allocation2 + $0x80]] }
 0x105   :  { %v920_v22 = vadd.f32 %v918_v45, %v896_v11  ;;  %v926_v52 = vadd.f32 %v924_v32, %v902_v61  ;;  %v932_v58 = vadd.f32 %v930_v49, %v908_v63  ;;  %v891_v33 = vadd.f32 %v889_v47, %v818_v46  ;;  %v871_v46 = vpop.permute.xlu0 %870 }
 0x106   :  { %1812 = vrot.lane.b32.xlu2 %v3957_v27, %s5453_s1  ;;  %v897_v62 = vadd.f32 %v895_v7, %v824_v35  ;;  %v903_v24 = vadd.f32 %v901_v10, %v830_v18  ;;  %v909_v54 = vadd.f32 %v907_v12, %v836_v40  ;;  %v913_v57 = vmul.f32 %v911_v19, %v881_v36  ;;  %v5467_v10 = vld [vmem:[#allocation16_spill] sm:$0xff] }
 0x107   :  { %v919_v25 = vmul.f32 %v917_v0, %v881_v36  ;;  %v925_v5 = vmul.f32 %v923_v17, %v881_v36  ;;  %v931_v55 = vmul.f32 %v929_v37, %v881_v36  ;;  %v941_v51 = vstv %s3909_s19  ;;  %s4304_s19 = sld [smem:[#allocation2 + $0x5]] }
 0x108   :  { %v947_v8 = vstv %s3911_s20  ;;  %v953_v44 = vstv %s3913_s23  ;;  %v883_v56 = vsel %vm123_vm10, %v873_v42, 0.0  ;;  %v915_v35 = vadd.f32 %v913_v57, %v891_v33  ;;  %s4047_s23 = sld [smem:[#allocation2 + $0x81]] }
 0x109   :  { %v921_v18 = vadd.f32 %v919_v25, %v897_v62  ;;  %v927_v40 = vadd.f32 %v925_v5, %v903_v24  ;;  %v933_v29 = vadd.f32 %v931_v55, %v909_v54  ;;  %v937_v53 = vmul.f32 %v935_v21, %v883_v56  ;;  %v875_v62 = vpop.permute.xlu2 %874  ;;  %v5468_v54 = vld [vmem:[#allocation18_spill] sm:$0xff]  ;;  %s4306_s20 = sld [smem:[#allocation2 + $0x6]] }
 0x10a   :  { %v943_v43 = vmul.f32 %v941_v51, %v883_v56  ;;  %v949_v31 = vmul.f32 %v947_v8, %v883_v56  ;;  %v955_v6 = vmul.f32 %v953_v44, %v883_v56  ;;  %v882_v38 = vsel %vm123_vm10, %v871_v46, 0.0  ;;  %v4044_v56 = vld [vmem:[%s5246_s0 + $0x58] sm:$0xff] }
 0x10b   :  { %v959_v1 = vstv %s3927_s26  ;;  %v965_v19 = vstv %s3929_s17  ;;  %v971_v0 = vstv %s3935_s22  ;;  %v3983_v17 = vadd.f32 %v937_v53, %v915_v35  ;;  %s4166_s26 = sld [smem:[#allocation2 + $0x85]] }
 0x10c   :  { %v3985_v37 = vadd.f32 %v943_v43, %v921_v18  ;;  %v3987_v13 = vadd.f32 %v949_v31, %v927_v40  ;;  %v3989_v11 = vadd.f32 %v955_v6, %v933_v29  ;;  %v936_v61 = vmul.f32 %v935_v21, %v882_v38  ;;  %s4172_s17 = sld [smem:[#allocation2 + $0x86]] }
 0x10d   :  { %v942_v63 = vmul.f32 %v941_v51, %v882_v38  ;;  %v948_v16 = vmul.f32 %v947_v8, %v882_v38  ;;  %v954_v39 = vmul.f32 %v953_v44, %v882_v38  ;;  %v977_v36 = vstv %s3937_s2  ;;  %s4180_s22 = sld [smem:[#allocation2 + $0x87]] }
 0x10e   :  { %v983_v2 = vstv %s3946_s27  ;;  %v989_v45 = vstv %s3948_s6  ;;  %v995_v32 = vstv %s3950_s7  ;;  %v938_v49 = vadd.f32 %v936_v61, %v914_v48  ;;  %s4152_s27 = sld [smem:[#allocation2 + $0x84]] }
 0x10f   :  { %v944_v21 = vadd.f32 %v942_v63, %v920_v22  ;;  %v950_v47 = vadd.f32 %v948_v16, %v926_v52  ;;  %v956_v7 = vadd.f32 %v954_v39, %v932_v58  ;;  %v984_v12 = vmul.f32 %v983_v2, %v5467_v10  ;;  %v5469_v39 = vld [vmem:[#allocation25_spill] sm:$0xff]  ;;  %s4187_s2 = sld [smem:[#allocation2 + $0x88]] }
 0x110   :  { %v990_v42 = vmul.f32 %v989_v45, %v5467_v10  ;;  %v996_v33 = vmul.f32 %v995_v32, %v5467_v10  ;;  %v5314_v48 = vstv %s3952_s5  ;;  %v1007_v52 = vstv %s3961_s8  ;;  %s4197_s6 = sld [smem:[#allocation2 + $0x89]] }
 0x111   :  { %v1002_v22 = vmul.f32 %v5314_v48, %v5467_v10  ;;  %v1013_v58 = vstv %s3963_s11  ;;  %v1019_v24 = vstv %s3970_s29  ;;  %v1008_v57 = vmul.f32 %v1007_v52, %v5468_v54  ;;  %s4224_s8 = sld [smem:[#allocation2 + $0x8c]] }
 0x112   :  { %v1014_v25 = vmul.f32 %v1013_v58, %v5468_v54  ;;  %v1020_v5 = vmul.f32 %v1019_v24, %v5468_v54  ;;  %v1025_v55 = vstv %s3972_s30  ;;  %v884_v8 = vsel %vm123_vm10, %v875_v62, 0.0  ;;  %s4228_s11 = sld [smem:[#allocation2 + $0x8d]] }
 0x113   :  { %v1026_v51 = vmul.f32 %v1025_v55, %v5468_v54  ;;  %v1924_v44 = vrot.slane %v3918_v41, 1  ;;  %v5309_v46 = vrot.slane %v4044_v56, 1  ;;  %v960_v35 = vmul.f32 %v959_v1, %v884_v8  ;;  %s4239_s29 = sld [smem:[#allocation2 + $0x8e]] }
 0x114   :  { %v966_v18 = vmul.f32 %v965_v19, %v884_v8  ;;  %v972_v40 = vmul.f32 %v971_v0, %v884_v8  ;;  %v978_v41 = vmul.f32 %v977_v36, %v884_v8  ;;  %v5310_v53 = vrot.slane %v3805_v30, 1  ;;  %s4243_s30 = sld [smem:[#allocation2 + $0x8f]] }
 0x115   :  { %v4063_v29 = vsel %vm845_vm5, %v1924_v44, %v5309_v46  ;;  %v5313_v43 = vstv %s3974_s14  ;;  %v5312_v31 = vstv %s3981_s15  ;;  %v962_v6 = vadd.f32 %v960_v35, %v938_v49  ;;  %s4330_s7 = sld [smem:[#allocation2 + $0x9]] }
 0x116   :  { %v968_v38 = vadd.f32 %v966_v18, %v944_v21  ;;  %v974_v61 = vadd.f32 %v972_v40, %v950_v47  ;;  %v980_v63 = vadd.f32 %v978_v41, %v956_v7  ;;  %1950 = vrot.lane.b32.xlu1 %v4063_v29, %s5353_s13  ;;  %v1935_v16 = vsel %vm845_vm5, %v5310_v53, %v1924_v44 }
 0x117   :  { %v1032_v10 = vmul.f32 %v5313_v43, %v5469_v39  ;;  %v1038_v62 = vmul.f32 %v5312_v31, %v5469_v39  ;;  %v5311_v54 = vstv %s3991_s21  ;;  %v986_v49 = vadd.f32 %v984_v12, %v962_v6  ;;  %v5472_v31 = vld [vmem:[#allocation23_spill] sm:$0xff] }
 0x118   :  { %v992_v21 = vadd.f32 %v990_v42, %v968_v38  ;;  %v998_v47 = vadd.f32 %v996_v33, %v974_v61  ;;  %v1004_v7 = vadd.f32 %v1002_v22, %v980_v63  ;;  %v4085_v35 = vsel %vm2927_vm6, %v1935_v16, 0.0  ;;  %v5471_v22 = vld [vmem:[#allocation29_spill] sm:$0xff] }
 0x119   :  { %v1044_v44 = vmul.f32 %v5311_v54, %v5469_v39  ;;  %v1049_v18 = vstv %s3993_s3  ;;  %v1055_v40 = vstv %s3999_s4  ;;  %v1010_v41 = vadd.f32 %v1008_v57, %v986_v49  ;;  %1948 = vrot.lane.b32.xlu0 %v4085_v35, %s5353_s13  ;;  %s4264_s3 = sld [smem:[#allocation4 + $0x1]] }
 0x11a   :  { %v1016_v12 = vadd.f32 %v1014_v25, %v992_v21  ;;  %v1022_v6 = vadd.f32 %v1020_v5, %v998_v47  ;;  %v1028_v42 = vadd.f32 %v1026_v51, %v1004_v7  ;;  %v1050_v33 = vmul.f32 %v1049_v18, %v5469_v39  ;;  %v1079_v39 = vpop.permute.xlu1 %1078  ;;  %s4266_s4 = sld [smem:[#allocation2 + $0x2]] }
 0x11b   :  { %v1056_v38 = vmul.f32 %v1055_v40, %v5471_v22  ;;  %v1061_v61 = vstv %s4001_s9  ;;  %v1067_v63 = vstv %s4013_s28  ;;  %v1073_v49 = vstv %s4021_s16  ;;  %s4280_s9 = sld [smem:[#allocation4 + $0x2]] }
 0x11c   :  { %v1062_v16 = vmul.f32 %v1061_v61, %v5471_v22  ;;  %v1068_v57 = vmul.f32 %v1067_v63, %v5471_v22  ;;  %v1103_v25 = vstv %s4033_s18  ;;  %v1074_v5 = vmul.f32 %v1073_v49, %v5471_v22  ;;  %s4296_s28 = sld [smem:[#allocation2 + $0x3]] }
 0x11d   :  { %v1109_v51 = vstv %s4047_s23  ;;  %v1115_v21 = vstv %s4057_s24  ;;  %v1121_v47 = vstv %s4068_s25  ;;  %v1034_v7 = vadd.f32 %v1032_v10, %v1010_v41  ;;  %v877_v10 = vpop.permute.xlu0 %876  ;;  %s4300_s16 = sld [smem:[#allocation4 + $0x3]] }
 0x11e   :  { %v1040_v8 = vadd.f32 %v1038_v62, %v1016_v12  ;;  %v1046_v46 = vadd.f32 %v1044_v44, %v1022_v6  ;;  %v1052_v53 = vadd.f32 %v1050_v33, %v1028_v42  ;;  %v1094_v54 = vsel %vm122_vm11, %v1079_v39, 0.0  ;;  %v5473_v33 = vld [vmem:[#allocation19_spill] sm:$0xff]  ;;  %s4302_s18 = sld [smem:[#allocation2 + $0x4]] }
 0x11f   :  { %v1009_v22 = vmul.f32 %v1007_v52, %v5472_v31  ;;  %v1015_v43 = vmul.f32 %v1013_v58, %v5472_v31  ;;  %v1021_v48 = vmul.f32 %v1019_v24, %v5472_v31  ;;  %v1058_v41 = vadd.f32 %v1056_v38, %v1034_v7  ;;  %v1081_v7 = vpop.permute.xlu2 %1080  ;;  %s5483_s25 = sld [smem:[#allocation51_spill]] }
 0x120   :  { %v1064_v62 = vadd.f32 %v1062_v16, %v1040_v8  ;;  %v1070_v44 = vadd.f32 %v1068_v57, %v1046_v46  ;;  %v1076_v12 = vadd.f32 %v1074_v5, %v1052_v53  ;;  %v1104_v6 = vmul.f32 %v1103_v25, %v1094_v54  ;;  %s4376_s23 = sld [smem:[#allocation2 + $0xe]] }
 0x121   :  { %v1110_v42 = vmul.f32 %v1109_v51, %v1094_v54  ;;  %v1116_v52 = vmul.f32 %v1115_v21, %v1094_v54  ;;  %v1122_v58 = vmul.f32 %v1121_v47, %v1094_v54  ;;  %v1027_v24 = vmul.f32 %v1025_v55, %v5472_v31  ;;  %s4383_s24 = sld [smem:[#allocation2 + $0x10]] }
 0x122   :  { %v885_v46 = vsel %vm123_vm10, %v877_v10, 0.0  ;;  %v985_v53 = vmul.f32 %v983_v2, %v5473_v33  ;;  %v991_v38 = vmul.f32 %v989_v45, %v5473_v33  ;;  %v4136_v16 = vadd.f32 %v1104_v6, %v1058_v41  ;;  %v5475_v41 = vld [vmem:[#allocation24_spill] sm:$0xff] }
 0x123   :  { %v4138_v57 = vadd.f32 %v1110_v42, %v1064_v62  ;;  %v4140_v54 = vadd.f32 %v1116_v52, %v1070_v44  ;;  %v4142_v5 = vadd.f32 %v1122_v58, %v1076_v12  ;;  %v961_v55 = vmul.f32 %v959_v1, %v885_v46  ;;  %v5479_v58 = vld [vmem:[#allocation26_spill] sm:$0xff] }
 0x124   :  { %v967_v31 = vmul.f32 %v965_v19, %v885_v46  ;;  %v973_v39 = vmul.f32 %v971_v0, %v885_v46  ;;  %v979_v2 = vmul.f32 %v977_v36, %v885_v46  ;;  %v997_v45 = vmul.f32 %v995_v32, %v5473_v33 }
 0x125   :  { %v5474_v8 = vstv %s3952_s5  ;;  %v5476_v62 = vstv %s3974_s14  ;;  %v5477_v1 = vstv %s3981_s15  ;;  %v963_v19 = vadd.f32 %v961_v55, %v3983_v17  ;;  %s4249_s14 = sld [smem:[#allocation2]] }
 0x126   :  { %v1003_v10 = vmul.f32 %v5474_v8, %v5473_v33  ;;  %v1033_v44 = vmul.f32 %v5476_v62, %v5475_v41  ;;  %v1039_v12 = vmul.f32 %v5477_v1, %v5475_v41  ;;  %v969_v0 = vadd.f32 %v967_v31, %v3985_v37  ;;  %v1083_v62 = vpop.permute.xlu0 %1082  ;;  %s4256_s15 = sld [smem:[#allocation2 + $0x1]] }
 0x127   :  { %v975_v36 = vadd.f32 %v973_v39, %v3987_v13  ;;  %v981_v6 = vadd.f32 %v979_v2, %v3989_v11  ;;  %v5478_v32 = vstv %s3991_s21  ;;  %v1051_v52 = vmul.f32 %v1049_v18, %v5475_v41  ;;  %v1087_v1 = vpop.permute.xlu2 %1086  ;;  %s4258_s21 = sld [smem:[#allocation4]] }
 0x128   :  { %v1045_v42 = vmul.f32 %v5478_v32, %v5475_v41  ;;  %v1057_v46 = vmul.f32 %v1055_v40, %v5479_v58  ;;  %v1063_v33 = vmul.f32 %v1061_v61, %v5479_v58  ;;  %v987_v17 = vadd.f32 %v985_v53, %v963_v19  ;;  %v1085_v41 = vpop.permute.xlu1 %1084  ;;  %s4467_s5 = sld [smem:[#allocation2 + $0x1c]] }
 0x129   :  { %v993_v37 = vadd.f32 %v991_v38, %v969_v0  ;;  %v999_v13 = vadd.f32 %v997_v45, %v975_v36  ;;  %v1005_v11 = vadd.f32 %v1003_v10, %v981_v6  ;;  %v1069_v55 = vmul.f32 %v1067_v63, %v5479_v58 }
 0x12a   :  { %v1075_v31 = vmul.f32 %v1073_v49, %v5479_v58  ;;  %v1095_v18 = vsel %vm122_vm11, %v1081_v7, 0.0  ;;  %v1927_v40 = vrot.slane %v3957_v27, 1  ;;  %v1011_v61 = vadd.f32 %v1009_v22, %v987_v17 }
 0x12b   :  { %v1017_v39 = vadd.f32 %v1015_v43, %v993_v37  ;;  %v1023_v2 = vadd.f32 %v1021_v48, %v999_v13  ;;  %v1029_v53 = vadd.f32 %v1027_v24, %v1005_v11  ;;  %v1105_v38 = vmul.f32 %v1103_v25, %v1095_v18  ;;  %v4202_v48 = vld [vmem:[%s5246_s0 + $0x70] sm:$0xff] }
 0x12c   :  { %v1111_v45 = vmul.f32 %v1109_v51, %v1095_v18  ;;  %v1117_v63 = vmul.f32 %v1115_v21, %v1095_v18  ;;  %v1123_v49 = vmul.f32 %v1121_v47, %v1095_v18  ;;  %v1035_v8 = vadd.f32 %v1033_v44, %v1011_v61 }
 0x12d   :  { %v1041_v7 = vadd.f32 %v1039_v12, %v1017_v39  ;;  %v1047_v10 = vadd.f32 %v1045_v42, %v1023_v2  ;;  %v1053_v27 = vadd.f32 %v1051_v52, %v1029_v53  ;;  %v1928_v43 = vrot.slane %v4202_v48, 1 }
 0x12e   :  { %v1926_v25 = vrot.slane %v3846_v50, 1  ;;  %v1127_v51 = vstv %s4152_s27  ;;  %v1133_v21 = vstv %s4166_s26  ;;  %v1059_v47 = vadd.f32 %v1057_v46, %v1035_v8  ;;  %s4311_s27 = sld [smem:[#allocation2 + $0x7]] }
 0x12f   :  { %v1065_v22 = vadd.f32 %v1063_v33, %v1041_v7  ;;  %v1071_v24 = vadd.f32 %v1069_v55, %v1047_v10  ;;  %v1077_v44 = vadd.f32 %v1075_v31, %v1053_v27  ;;  %v1931_v12 = vsel %vm845_vm5, %v1927_v40, %v1928_v43  ;;  %s4386_s26 = sld [smem:[#allocation2 + $0x11]] }
 0x130   :  { %v4220_v19 = vsel %vm845_vm5, %v1926_v25, %v1927_v40  ;;  %v1139_v0 = vstv %s4172_s17  ;;  %v1145_v36 = vstv %s4180_s22  ;;  %v1107_v6 = vadd.f32 %v1105_v38, %v1059_v47  ;;  %s4325_s22 = sld [smem:[#allocation2 + $0x8]] }
 0x131   :  { %v1113_v32 = vadd.f32 %v1111_v45, %v1065_v22  ;;  %v1119_v42 = vadd.f32 %v1117_v63, %v1071_v24  ;;  %v1125_v52 = vadd.f32 %v1123_v49, %v1077_v44  ;;  %1954 = vrot.lane.b32.xlu0 %v4220_v19, %s5353_s13  ;;  %v4232_v46 = vsel %vm2963_vm8, %v1931_v12, 0.0  ;;  %v1093_v12 = vpop.permute.xlu2 %1092  ;;  %s4418_s17 = sld [smem:[#allocation2 + $0x16]] }
 0x132   :  { %v1097_v33 = vsel %vm122_vm11, %v1085_v41, 0.0  ;;  %v1096_v17 = vsel %vm122_vm11, %v1083_v62, 0.0  ;;  %v1151_v37 = vstv %s4187_s2  ;;  %1956 = vrot.lane.b32.xlu1 %v4232_v46, %s5353_s13  ;;  %v1157_v10 = vstv %s4197_s6  ;;  %s4446_s2 = sld [smem:[#allocation2 + $0x19]] }
 0x133   :  { %v1129_v13 = vmul.f32 %v1127_v51, %v1097_v33  ;;  %v1135_v11 = vmul.f32 %v1133_v21, %v1097_v33  ;;  %v1141_v55 = vmul.f32 %v1139_v0, %v1097_v33  ;;  %v1147_v31 = vmul.f32 %v1145_v36, %v1097_v33  ;;  %s4452_s6 = sld [smem:[#allocation2 + $0x1a]] }
 0x134   :  { %v1128_v18 = vmul.f32 %v1127_v51, %v1096_v17  ;;  %v1134_v40 = vmul.f32 %v1133_v21, %v1096_v17  ;;  %v1140_v61 = vmul.f32 %v1139_v0, %v1096_v17  ;;  %v1146_v39 = vmul.f32 %v1145_v36, %v1096_v17  ;;  %v1091_v51 = vpop.permute.xlu1 %1090  ;;  %v1089_v21 = vpop.permute.xlu0 %1088 }
 0x135   :  { %v1131_v2 = vadd.f32 %v1129_v13, %v1107_v6  ;;  %v1137_v53 = vadd.f32 %v1135_v11, %v1113_v32  ;;  %v1143_v38 = vadd.f32 %v1141_v55, %v1119_v42  ;;  %v1149_v45 = vadd.f32 %v1147_v31, %v1125_v52 }
 0x136   :  { %v1130_v63 = vadd.f32 %v1128_v18, %v4136_v16  ;;  %v1136_v49 = vadd.f32 %v1134_v40, %v4138_v57  ;;  %v1142_v8 = vadd.f32 %v1140_v61, %v4140_v54  ;;  %v1148_v7 = vadd.f32 %v1146_v39, %v4142_v5 }
 0x137   :  { %v1163_v27 = vstv %s4208_s10  ;;  %v1169_v41 = vstv %s4210_s12  ;;  %v1098_v62 = vsel %vm122_vm11, %v1087_v1, 0.0  ;;  %v1922_v5 = vrot.slane %v3778_v34, 1  ;;  %s4342_s12 = sld [smem:[#allocation2 + $0xa]] }
 0x138   :  { %v1152_v16 = vmul.f32 %v1151_v37, %v1098_v62  ;;  %v1158_v57 = vmul.f32 %v1157_v10, %v1098_v62  ;;  %v1164_v47 = vmul.f32 %v1163_v27, %v1098_v62  ;;  %v1170_v54 = vmul.f32 %v1169_v41, %v1098_v62  ;;  %s4473_s10 = sld [smem:[#allocation2 + $0x1d]] }
 0x139   :  { %v1929_v22 = vrot.slane %v3882_v59, 1  ;;  %v1175_v24 = vstv %s4224_s8  ;;  %v1181_v44 = vstv %s4228_s11  ;;  %v5481_v32 = vrot.slane %v3805_v30, 1  ;;  %s4481_s8 = sld [smem:[#allocation2 + $0x1f]] }
 0x13a   :  { %v1154_v1 = vadd.f32 %v1152_v16, %v1130_v63  ;;  %v1160_v0 = vadd.f32 %v1158_v57, %v1136_v49  ;;  %v1166_v36 = vadd.f32 %v1164_v47, %v1142_v8  ;;  %v1172_v6 = vadd.f32 %v1170_v54, %v1148_v7  ;;  %s4488_s11 = sld [smem:[#allocation2 + $0x20]] }
 0x13b   :  { %v4272_v42 = vsel %vm845_vm5, %v1922_v5, %v5481_v32  ;;  %v1937_v34 = vsel %vm845_vm5, %v1929_v22, %v1922_v5  ;;  %v1187_v52 = vstv %s4239_s29  ;;  %v1193_v58 = vstv %s4243_s30  ;;  %s4356_s29 = sld [smem:[#allocation2 + $0xb]] }
 0x13c   :  { %2162 = vrot.lane.b32.xlu1 %v4272_v42, %s5453_s1  ;;  %v4286_v17 = vsel %vm2982_vm9, %v1937_v34, 0.0  ;;  %v1100_v30 = vsel %vm122_vm11, %v1091_v51, 0.0  ;;  %1946 = vrot.lane.b32.xlu2 %v4272_v42, %s5353_s13  ;;  %v1099_v13 = vsel %vm122_vm11, %v1089_v21, 0.0  ;;  %v1101_v11 = vsel %vm122_vm11, %v1093_v12, 0.0  ;;  %v1245_v54 = vpop.permute.xlu1 %1244  ;;  %v1243_v5 = vpop.permute.xlu0 %1242  ;;  %s4499_s30 = sld [smem:[#allocation2 + $0x22]] }
 0x13d   :  { %1960 = vrot.lane.b32.xlu0 %v4286_v17, %s5353_s13  ;;  %v1176_v55 = vmul.f32 %v1175_v24, %v1100_v30  ;;  %v1182_v31 = vmul.f32 %v1181_v44, %v1100_v30  ;;  %v1188_v18 = vmul.f32 %v1187_v52, %v1100_v30  ;;  %v1194_v40 = vmul.f32 %v1193_v58, %v1100_v30 }
 0x13e   :  { %v1153_v61 = vmul.f32 %v1151_v37, %v1099_v13  ;;  %v1159_v39 = vmul.f32 %v1157_v10, %v1099_v13  ;;  %v1165_v63 = vmul.f32 %v1163_v27, %v1099_v13  ;;  %v1171_v49 = vmul.f32 %v1169_v41, %v1099_v13 }
 0x13f   :  { %v1178_v8 = vadd.f32 %v1176_v55, %v1154_v1  ;;  %v1184_v7 = vadd.f32 %v1182_v31, %v1160_v0  ;;  %v1190_v62 = vadd.f32 %v1188_v18, %v1166_v36  ;;  %v1196_v51 = vadd.f32 %v1194_v40, %v1172_v6 }
 0x140   :  { %v1155_v21 = vadd.f32 %v1153_v61, %v1131_v2  ;;  %v1161_v16 = vadd.f32 %v1159_v39, %v1137_v53  ;;  %v1167_v57 = vadd.f32 %v1165_v63, %v1143_v38  ;;  %v1173_v47 = vadd.f32 %v1171_v49, %v1149_v45 }
 0x141   :  { %1198 = vst [vmem:[%s5483_s25] sm:$0xff] %v1178_v8  ;;  %v1177_v37 = vmul.f32 %v1175_v24, %v1101_v11  ;;  %v1183_v10 = vmul.f32 %v1181_v44, %v1101_v11  ;;  %v1189_v27 = vmul.f32 %v1187_v52, %v1101_v11  ;;  %v1195_v41 = vmul.f32 %v1193_v58, %v1101_v11 }
 0x142   :  { %2446 = vst [vmem:[%s5483_s25 + $0x10] sm:$0xff] %v1184_v7  ;;  %v5484_v2 = vrot.slane %v4044_v56, 1  ;;  %v1267_v38 = vstv %s4249_s14  ;;  %v1271_v45 = vstv %s4258_s21  ;;  %v1275_v24 = vstv %s4256_s15  ;;  %v1247_v56 = vpop.permute.xlu2 %1246  ;;  %s4365_s15 = sld [smem:[#allocation2 + $0xc]] }
 0x143   :  { %2448 = vst [vmem:[%s5483_s25 + $0x20] sm:$0xff] %v1190_v62  ;;  %v1179_v44 = vadd.f32 %v1177_v37, %v1155_v21  ;;  %v1185_v12 = vadd.f32 %v1183_v10, %v1161_v16  ;;  %v1191_v50 = vadd.f32 %v1189_v27, %v1167_v57  ;;  %v1197_v1 = vadd.f32 %v1195_v41, %v1173_v47  ;;  %s4507_s14 = sld [smem:[#allocation2 + $0x23]] }
 0x144   :  { %v1933_v53 = vsel %vm845_vm5, %v5484_v2, %v1926_v25  ;;  %2450 = vst [vmem:[%s5483_s25 + $0x30] sm:$0xff] %v1196_v51  ;;  %v1279_v36 = vstv %s4264_s3  ;;  %v1283_v6 = vstv %s4266_s4  ;;  %v1287_v32 = vstv %s4280_s9  ;;  %s4371_s4 = sld [smem:[#allocation2 + $0xd]] }
 0x145   :  { %v4337_v0 = vsel %vm2955_vm7, %v1933_v53, 0.0  ;;  %1199 = vst [vmem:[%s5483_s25 + $0x8] sm:$0xff] %v1179_v44  ;;  %2166 = vrot.lane.b32.xlu0 %v4063_v29, %s5453_s1  ;;  %v1291_v34 = vstv %s4296_s28  ;;  %v1259_v52 = vsel %vm123_vm10, %v1245_v54, 0.0  ;;  %v1258_v58 = vsel %vm123_vm10, %v1243_v5, 0.0  ;;  %v1251_v54 = vpop.permute.xlu1 %1250  ;;  %v1249_v5 = vpop.permute.xlu0 %1248  ;;  %s4521_s21 = sld [smem:[#allocation2 + $0x25]] }
 0x146   :  { %2168 = vrot.lane.b32.xlu1 %v4337_v0, %s5453_s1  ;;  %2447 = vst [vmem:[%s5483_s25 + $0x18] sm:$0xff] %v1185_v12  ;;  %v1269_v33 = vmul.f32 %v1267_v38, %v1259_v52  ;;  %v1277_v30 = vmul.f32 %v1275_v24, %v1259_v52  ;;  %v1285_v13 = vmul.f32 %v1283_v6, %v1259_v52  ;;  %v1260_v11 = vsel %vm123_vm10, %v1247_v56, 0.0  ;;  %s4529_s3 = sld [smem:[#allocation2 + $0x26]] }
 0x147   :  { %1952 = vrot.lane.b32.xlu2 %v4337_v0, %s5353_s13  ;;  %2449 = vst [vmem:[%s5483_s25 + $0x28] sm:$0xff] %v1191_v50  ;;  %v1295_v55 = vstv %s4300_s16  ;;  %v1268_v31 = vmul.f32 %v1267_v38, %v1258_v58  ;;  %v1276_v18 = vmul.f32 %v1275_v24, %v1258_v58  ;;  %v1284_v40 = vmul.f32 %v1283_v6, %v1258_v58  ;;  %s4378_s16 = sld [smem:[#allocation2 + $0xf]] }
 0x148   :  { %2451 = vst [vmem:[%s5483_s25 + $0x38] sm:$0xff] %v1197_v1  ;;  %v1273_v61 = vadd.f32 %v1271_v45, %v1269_v33  ;;  %v1281_v39 = vadd.f32 %v1279_v36, %v1277_v30  ;;  %v1293_v63 = vmul.f32 %v1291_v34, %v1259_v52  ;;  %v1292_v49 = vmul.f32 %v1291_v34, %v1258_v58  ;;  %s4572_s9 = sld [smem:[#allocation2 + $0x29]] }
 0x149   :  { %v1289_v8 = vadd.f32 %v1287_v32, %v1285_v13  ;;  %v1272_v7 = vadd.f32 %v1271_v45, %v1268_v31  ;;  %v1280_v62 = vadd.f32 %v1279_v36, %v1276_v18  ;;  %v1288_v51 = vadd.f32 %v1287_v32, %v1284_v40  ;;  %s4574_s28 = sld [smem:[#allocation2 + $0x2a]] }
 0x14a   :  { %v1296_v21 = vadd.f32 %v1295_v55, %v1292_v49  ;;  %v1299_v16 = vstv %s4302_s18  ;;  %v1305_v57 = vstv %s4304_s19  ;;  %v1311_v47 = vstv %s4306_s20  ;;  %s4398_s18 = sld [smem:[#allocation2 + $0x12]]  ;;  %v1253_v52 = vpop.permute.xlu2 %1252 }
 0x14b   :  { %v1317_v37 = vstv %s4311_s27  ;;  %v1300_v10 = vmul.f32 %v1299_v16, %v1260_v11  ;;  %v1306_v27 = vmul.f32 %v1305_v57, %v1260_v11  ;;  %v1312_v41 = vmul.f32 %v1311_v47, %v1260_v11  ;;  %s4405_s19 = sld [smem:[#allocation2 + $0x13]] }
 0x14c   :  { %v1318_v2 = vmul.f32 %v1317_v37, %v1260_v11  ;;  %v4394_v53 = vsel %vm845_vm5, %v1928_v43, %v1929_v22  ;;  %v1323_v38 = vstv %s4325_s22  ;;  %v1329_v45 = vstv %s4330_s7  ;;  %s4414_s20 = sld [smem:[#allocation2 + $0x14]] }
 0x14d   :  { %v1302_v24 = vadd.f32 %v1300_v10, %v1272_v7  ;;  %v1308_v44 = vadd.f32 %v1306_v27, %v1280_v62  ;;  %v1314_v12 = vadd.f32 %v1312_v41, %v1288_v51  ;;  %2172 = vrot.lane.b32.xlu0 %v4232_v46, %s5453_s1  ;;  %v1335_v59 = vstv %s4342_s12  ;;  %s4416_s27 = sld [smem:[#allocation2 + $0x15]] }
 0x14e   :  { %2174 = vrot.lane.b32.xlu1 %v4394_v53, %s5453_s1  ;;  %v1320_v48 = vadd.f32 %v1318_v2, %v1296_v21  ;;  %v1341_v9 = vstv %s4356_s29  ;;  %v1262_v43 = vsel %vm123_vm10, %v1251_v54, 0.0  ;;  %v1261_v22 = vsel %vm123_vm10, %v1249_v5, 0.0  ;;  %s4441_s22 = sld [smem:[#allocation2 + $0x18]] }
 0x14f   :  { %1958 = vrot.lane.b32.xlu2 %v4394_v53, %s5353_s13  ;;  %v1324_v50 = vmul.f32 %v1323_v38, %v1262_v43  ;;  %v1330_v1 = vmul.f32 %v1329_v45, %v1262_v43  ;;  %v1336_v56 = vmul.f32 %v1335_v59, %v1262_v43  ;;  %v1342_v25 = vmul.f32 %v1341_v9, %v1262_v43  ;;  %s4426_s13 = sld [smem:[#allocation2 + $0x17]] }
 0x150   :  { %v1301_v36 = vmul.f32 %v1299_v16, %v1261_v22  ;;  %v1307_v6 = vmul.f32 %v1305_v57, %v1261_v22  ;;  %v1313_v32 = vmul.f32 %v1311_v47, %v1261_v22  ;;  %v1319_v34 = vmul.f32 %v1317_v37, %v1261_v22  ;;  %s4458_s7 = sld [smem:[#allocation2 + $0x1b]] }
 0x151   :  { %v1297_v58 = vadd.f32 %v1295_v55, %v1293_v63  ;;  %v4420_v33 = vadd.f32 %v1324_v50, %v1302_v24  ;;  %v4422_v30 = vadd.f32 %v1330_v1, %v1308_v44  ;;  %v4424_v13 = vadd.f32 %v1336_v56, %v1314_v12  ;;  %s4479_s12 = sld [smem:[#allocation2 + $0x1e]] }
 0x152   :  { %v4428_v11 = vadd.f32 %v1342_v25, %v1320_v48  ;;  %v1303_v31 = vadd.f32 %v1301_v36, %v1273_v61  ;;  %v1309_v18 = vadd.f32 %v1307_v6, %v1281_v39  ;;  %v1315_v40 = vadd.f32 %v1313_v32, %v1289_v8  ;;  %v1255_v32 = vpop.permute.xlu0 %1254  ;;  %s4493_s29 = sld [smem:[#allocation2 + $0x21]] }
 0x153   :  { %v1321_v49 = vadd.f32 %v1319_v34, %v1297_v58  ;;  %v1263_v55 = vsel %vm123_vm10, %v1253_v52, 0.0  ;;  %v1347_v63 = vstv %s4365_s15  ;;  %v1353_v7 = vstv %s4371_s4  ;;  %s4519_s15 = sld [smem:[#allocation2 + $0x24]] }
 0x154   :  { %v1325_v62 = vmul.f32 %v1323_v38, %v1263_v55  ;;  %v1331_v51 = vmul.f32 %v1329_v45, %v1263_v55  ;;  %v1337_v21 = vmul.f32 %v1335_v59, %v1263_v55  ;;  %v1343_v16 = vmul.f32 %v1341_v9, %v1263_v55  ;;  %v1257_v38 = vpop.permute.xlu1 %1256  ;;  %s4531_s4 = sld [smem:[#allocation2 + $0x27]] }
 0x155   :  { %v1359_v57 = vstv %s4376_s23  ;;  %v1371_v47 = vstv %s4383_s24  ;;  %v1377_v37 = vstv %s4386_s26  ;;  %v1383_v61 = vstv %s4398_s18  ;;  %s4582_s23 = sld [smem:[#allocation2 + $0x2b]] }
 0x156   :  { %v1327_v39 = vadd.f32 %v1325_v62, %v1303_v31  ;;  %v1333_v8 = vadd.f32 %v1331_v51, %v1309_v18  ;;  %v1339_v10 = vadd.f32 %v1337_v21, %v1315_v40  ;;  %v1365_v27 = vstv %s4378_s16  ;;  %s4590_s16 = sld [smem:[#allocation2 + $0x2c]] }
 0x157   :  { %2164 = vrot.lane.b32.xlu2 %v4085_v35, %s5453_s1  ;;  %v1345_v41 = vadd.f32 %v1343_v16, %v1321_v49  ;;  %v1373_v54 = vmul.f32 %v1371_v47, %v3093_v28  ;;  %v1379_v5 = vmul.f32 %v1377_v37, %v3093_v28  ;;  %v1389_v2 = vstv %s4405_s19  ;;  %s4597_s24 = sld [smem:[#allocation2 + $0x2d]] }
 0x158   :  { %v1385_v45 = vmul.f32 %v1383_v61, %v3093_v28  ;;  %v1395_v24 = vstv %s4414_s20  ;;  %v1401_v44 = vstv %s4416_s27  ;;  %v1407_v12 = vstv %s4418_s17  ;;  %s4606_s26 = sld [smem:[#allocation2 + $0x2e]] }
 0x159   :  { %v1391_v59 = vmul.f32 %v1389_v2, %v3093_v28  ;;  %v1397_v48 = vmul.f32 %v1395_v24, %v3293_v60  ;;  %v1403_v9 = vmul.f32 %v1401_v44, %v3293_v60  ;;  %v1413_v43 = vstv %s4426_s13  ;;  %s4610_s18 = sld [smem:[#allocation2 + $0x2f]] }
 0x15a   :  { %v1409_v22 = vmul.f32 %v1407_v12, %v3293_v60  ;;  %v4462_v50 = vmul.f32 %v1413_v43, %v3293_v60  ;;  %v1265_v1 = vsel %vm123_vm10, %v1257_v38, 0.0  ;;  %v1372_v56 = vmul.f32 %v1371_v47, %v5464_v15  ;;  %s4618_s19 = sld [smem:[#allocation2 + $0x30]] }
 0x15b   :  { %v1349_v28 = vmul.f32 %v1347_v63, %v1265_v1  ;;  %v1355_v25 = vmul.f32 %v1353_v7, %v1265_v1  ;;  %v1361_v36 = vmul.f32 %v1359_v57, %v1265_v1  ;;  %v1367_v6 = vmul.f32 %v1365_v27, %v1265_v1  ;;  %s4621_s20 = sld [smem:[#allocation2 + $0x31]] }
 0x15c   :  { %v1378_v34 = vmul.f32 %v1377_v37, %v5464_v15  ;;  %v1384_v60 = vmul.f32 %v1383_v61, %v5464_v15  ;;  %v1390_v52 = vmul.f32 %v1389_v2, %v5464_v15  ;;  %v1396_v58 = vmul.f32 %v1395_v24, %v3585_v23  ;;  %s4626_s27 = sld [smem:[#allocation2 + $0x32]] }
 0x15d   :  { %v1351_v31 = vadd.f32 %v1349_v28, %v1327_v39  ;;  %v1357_v18 = vadd.f32 %v1355_v25, %v1333_v8  ;;  %v1363_v40 = vadd.f32 %v1361_v36, %v1339_v10  ;;  %v1369_v49 = vadd.f32 %v1367_v6, %v1345_v41  ;;  %s4630_s17 = sld [smem:[#allocation2 + $0x33]] }
 0x15e   :  { %v1402_v55 = vmul.f32 %v1401_v44, %v3585_v23  ;;  %v1408_v62 = vmul.f32 %v1407_v12, %v3585_v23  ;;  %v1414_v51 = vmul.f32 %v1413_v43, %v3585_v23  ;;  %v1264_v15 = vsel %vm123_vm10, %v1255_v32, 0.0  ;;  %s4632_s13 = sld [smem:[#allocation2 + $0x34]] }
 0x15f   :  { %2170 = vrot.lane.b32.xlu2 %v4220_v19, %s5453_s1  ;;  %v1375_v21 = vadd.f32 %v1373_v54, %v1351_v31  ;;  %v1381_v16 = vadd.f32 %v1379_v5, %v1357_v18  ;;  %v1387_v47 = vadd.f32 %v1385_v45, %v1363_v40  ;;  %v1419_v37 = vstv %s4441_s22  ;;  %v1471_v40 = vpop.permute.xlu1 %1470  ;;  %s4638_s22 = sld [smem:[#allocation2 + $0x35]] }
 0x160   :  { %v1348_v61 = vmul.f32 %v1347_v63, %v1264_v15  ;;  %v1354_v23 = vmul.f32 %v1353_v7, %v1264_v15  ;;  %v1360_v39 = vmul.f32 %v1359_v57, %v1264_v15  ;;  %v1366_v8 = vmul.f32 %v1365_v27, %v1264_v15 }
 0x161   :  { %v1393_v10 = vadd.f32 %v1391_v59, %v1369_v49  ;;  %v4501_v41 = vadd.f32 %v1397_v48, %v1375_v21  ;;  %v4503_v54 = vadd.f32 %v1403_v9, %v1381_v16  ;;  %v4505_v5 = vadd.f32 %v1409_v22, %v1387_v47  ;;  %v1467_v9 = vpop.permute.xlu2 %1466  ;;  %v1469_v49 = vpop.permute.xlu0 %1468 }
 0x162   :  { %v1350_v2 = vadd.f32 %v1348_v61, %v4420_v33  ;;  %v1356_v63 = vadd.f32 %v1354_v23, %v4422_v30  ;;  %v1362_v7 = vadd.f32 %v1360_v39, %v4424_v13  ;;  %v1368_v57 = vadd.f32 %v1366_v8, %v4428_v11 }
 0x163   :  { %v1420_v27 = vmul.f32 %v1419_v37, %v3323_v4  ;;  %v1425_v38 = vstv %s4446_s2  ;;  %v1431_v45 = vstv %s4452_s6  ;;  %v1437_v24 = vstv %s4458_s7  ;;  %s4641_s2 = sld [smem:[#allocation2 + $0x36]] }
 0x164   :  { %v1374_v44 = vadd.f32 %v1372_v56, %v1350_v2  ;;  %v1380_v12 = vadd.f32 %v1378_v34, %v1356_v63  ;;  %v1386_v33 = vadd.f32 %v1384_v60, %v1362_v7  ;;  %v1392_v59 = vadd.f32 %v1390_v52, %v1368_v57  ;;  %s4643_s6 = sld [smem:[#allocation2 + $0x37]] }
 0x165   :  { %v1426_v30 = vmul.f32 %v1425_v38, %v3323_v4  ;;  %v1432_v13 = vmul.f32 %v1431_v45, %v3323_v4  ;;  %v1438_v11 = vmul.f32 %v1437_v24, %v3323_v4  ;;  %v1443_v48 = vstv %s4467_s5  ;;  %s4650_s7 = sld [smem:[#allocation2 + $0x38]] }
 0x166   :  { %v1398_v43 = vadd.f32 %v1396_v58, %v1374_v44  ;;  %v1404_v22 = vadd.f32 %v1402_v55, %v1380_v12  ;;  %v1410_v1 = vadd.f32 %v1408_v62, %v1386_v33  ;;  %v1416_v56 = vadd.f32 %v1414_v51, %v1392_v59  ;;  %s4656_s5 = sld [smem:[#allocation2 + $0x39]] }
 0x167   :  { %2176 = vrot.lane.b32.xlu2 %v4286_v17, %s5453_s1  ;;  %v1444_v4 = vmul.f32 %v1443_v48, %v3510_v20  ;;  %v1449_v28 = vstv %s4473_s10  ;;  %v1455_v25 = vstv %s4479_s12  ;;  %v1461_v36 = vstv %s4481_s8  ;;  %s4563_s1 = sld [smem:[#allocation2 + $0x28]] }
 0x168   :  { %v1450_v6 = vmul.f32 %v1449_v28, %v3510_v20  ;;  %v1456_v32 = vmul.f32 %v1455_v25, %v3510_v20  ;;  %v1462_v34 = vmul.f32 %v1461_v36, %v3510_v20  ;;  %v1491_v60 = vstv %s4488_s11  ;;  %s4658_s10 = sld [smem:[#allocation2 + $0x3a]] }
 0x169   :  { %v1497_v52 = vstv %s4493_s29  ;;  %v1503_v58 = vstv %s4499_s30  ;;  %v1509_v31 = vstv %s4507_s14  ;;  %v1422_v18 = vadd.f32 %v1420_v27, %v1398_v43  ;;  %s4665_s12 = sld [smem:[#allocation2 + $0x3b]] }
 0x16a   :  { %v1428_v55 = vadd.f32 %v1426_v30, %v1404_v22  ;;  %v1434_v62 = vadd.f32 %v1432_v13, %v1410_v1  ;;  %v1440_v51 = vadd.f32 %v1438_v11, %v1416_v56  ;;  %v1482_v15 = vsel %vm122_vm11, %v1467_v9, 0.0  ;;  %v1473_v13 = vpop.permute.xlu2 %1472  ;;  %s4668_s8 = sld [smem:[#allocation2 + $0x3c]] }
 0x16b   :  { %v1417_v20 = vadd.f32 %v4462_v50, %v1393_v10  ;;  %v1446_v21 = vadd.f32 %v1444_v4, %v1422_v18  ;;  %v1492_v16 = vmul.f32 %v1491_v60, %v1482_v15  ;;  %v1498_v47 = vmul.f32 %v1497_v52, %v1482_v15  ;;  %s4670_s11 = sld [smem:[#allocation2 + $0x3d]] }
 0x16c   :  { %v1452_v61 = vadd.f32 %v1450_v6, %v1428_v55  ;;  %v1458_v23 = vadd.f32 %v1456_v32, %v1434_v62  ;;  %v1464_v39 = vadd.f32 %v1462_v34, %v1440_v51  ;;  %v1504_v8 = vmul.f32 %v1503_v58, %v1482_v15  ;;  %v1475_v34 = vpop.permute.xlu0 %1474  ;;  %s4672_s29 = sld [smem:[#allocation2 + $0x3e]] }
 0x16d   :  { %v1510_v2 = vmul.f32 %v1509_v31, %v1482_v15  ;;  %v1515_v63 = vstv %s4519_s15  ;;  %v1521_v7 = vstv %s4521_s21  ;;  %v1527_v57 = vstv %s4529_s3  ;;  %s4674_s30 = sld [smem:[#allocation2 + $0x3f]] }
 0x16e   :  { %v1494_v27 = vadd.f32 %v1492_v16, %v1446_v21  ;;  %v1500_v44 = vadd.f32 %v1498_v47, %v1452_v61  ;;  %v1506_v12 = vadd.f32 %v1504_v8, %v1458_v23  ;;  %v1533_v50 = vstv %s4531_s4  ;;  %s4676_s14 = sld [smem:[#allocation2 + $0x40]] }
 0x16f   :  { %v1484_v10 = vsel %vm122_vm11, %v1471_v40, 0.0  ;;  %v1421_v33 = vmul.f32 %v1419_v37, %v3627_v14  ;;  %v1427_v59 = vmul.f32 %v1425_v38, %v3627_v14  ;;  %v1433_v30 = vmul.f32 %v1431_v45, %v3627_v14  ;;  %s4683_s15 = sld [smem:[#allocation2 + $0x41]] }
 0x170   :  { %v1512_v11 = vadd.f32 %v1510_v2, %v1464_v39  ;;  %v1516_v9 = vmul.f32 %v1515_v63, %v1484_v10  ;;  %v1522_v43 = vmul.f32 %v1521_v7, %v1484_v10  ;;  %v1528_v22 = vmul.f32 %v1527_v57, %v1484_v10  ;;  %s4685_s21 = sld [smem:[#allocation2 + $0x42]] }
 0x171   :  { %v1423_v1 = vadd.f32 %v1421_v33, %v4501_v41  ;;  %v1429_v56 = vadd.f32 %v1427_v59, %v4503_v54  ;;  %v1435_v37 = vadd.f32 %v1433_v30, %v4505_v5  ;;  %v1439_v38 = vmul.f32 %v1437_v24, %v3627_v14  ;;  %v1477_v24 = vpop.permute.xlu1 %1476  ;;  %s4692_s3 = sld [smem:[#allocation2 + $0x43]] }
 0x172   :  { %v4584_v45 = vadd.f32 %v1516_v9, %v1494_v27  ;;  %v4586_v4 = vadd.f32 %v1522_v43, %v1500_v44  ;;  %v4588_v6 = vadd.f32 %v1528_v22, %v1506_v12  ;;  %v1534_v32 = vmul.f32 %v1533_v50, %v1484_v10  ;;  %s4695_s4 = sld [smem:[#allocation2 + $0x44]] }
 0x173   :  { %v1441_v41 = vadd.f32 %v1439_v38, %v1417_v20  ;;  %v1445_v54 = vmul.f32 %v1443_v48, %v3419_v26  ;;  %v1451_v5 = vmul.f32 %v1449_v28, %v3419_v26  ;;  %v1457_v14 = vmul.f32 %v1455_v25, %v3419_v26 }
 0x174   :  { %v4599_v18 = vadd.f32 %v1534_v32, %v1512_v11  ;;  %v1463_v40 = vmul.f32 %v1461_v36, %v3419_v26  ;;  %v1483_v55 = vsel %vm122_vm11, %v1469_v49, 0.0  ;;  %v1485_v48 = vsel %vm122_vm11, %v1473_v13, 0.0 }
 0x175   :  { %v1447_v28 = vadd.f32 %v1445_v54, %v1423_v1  ;;  %v1453_v25 = vadd.f32 %v1451_v5, %v1429_v56  ;;  %v1459_v62 = vadd.f32 %v1457_v14, %v1435_v37  ;;  %v1493_v51 = vmul.f32 %v1491_v60, %v1483_v55  ;;  %v1481_v56 = vpop.permute.xlu0 %1480 }
 0x176   :  { %v1465_v15 = vadd.f32 %v1463_v40, %v1441_v41  ;;  %v1499_v26 = vmul.f32 %v1497_v52, %v1483_v55  ;;  %v1505_v36 = vmul.f32 %v1503_v58, %v1483_v55  ;;  %v1511_v49 = vmul.f32 %v1509_v31, %v1483_v55  ;;  %v1479_v58 = vpop.permute.xlu2 %1478 }
 0x177   :  { %v1495_v20 = vadd.f32 %v1493_v51, %v1447_v28  ;;  %v1517_v21 = vmul.f32 %v1515_v63, %v1485_v48  ;;  %v1523_v16 = vmul.f32 %v1521_v7, %v1485_v48  ;;  %v1539_v47 = vstv %s4563_s1  ;;  %s4697_s1 = sld [smem:[#allocation2 + $0x45]] }
 0x178   :  { %v1501_v60 = vadd.f32 %v1499_v26, %v1453_v25  ;;  %v1507_v61 = vadd.f32 %v1505_v36, %v1459_v62  ;;  %v1513_v23 = vadd.f32 %v1511_v49, %v1465_v15  ;;  %v1529_v39 = vmul.f32 %v1527_v57, %v1485_v48 }
 0x179   :  { %v1535_v8 = vmul.f32 %v1533_v50, %v1485_v48  ;;  %v1545_v2 = vstv %s4572_s9  ;;  %v1551_v52 = vstv %s4574_s28  ;;  %v1557_v27 = vstv %s4582_s23  ;;  %v1587_v1 = vpop.permute.xlu1 %1586  ;;  %s4699_s9 = sld [smem:[#allocation2 + $0x46]] }
 0x17a   :  { %v1519_v31 = vadd.f32 %v1517_v21, %v1495_v20  ;;  %v1525_v44 = vadd.f32 %v1523_v16, %v1501_v60  ;;  %v1531_v63 = vadd.f32 %v1529_v39, %v1507_v61  ;;  %v1487_v7 = vsel %vm122_vm11, %v1477_v24, 0.0  ;;  %s4707_s28 = sld [smem:[#allocation2 + $0x47]] }
 0x17b   :  { %v1537_v12 = vadd.f32 %v1535_v8, %v1513_v23  ;;  %v1541_v57 = vmul.f32 %v1539_v47, %v1487_v7  ;;  %v1547_v50 = vmul.f32 %v1545_v2, %v1487_v7  ;;  %v1553_v10 = vmul.f32 %v1551_v52, %v1487_v7  ;;  %s4950_s23 = sld [smem:[#allocation2 + $0x73]] }
 0x17c   :  { %v1559_v33 = vmul.f32 %v1557_v27, %v1487_v7  ;;  %v1486_v59 = vsel %vm122_vm11, %v1475_v34, 0.0  ;;  %v1563_v30 = vstv %s4590_s16  ;;  %v1569_v13 = vstv %s4597_s24  ;;  %s4840_s24 = sld [smem:[#allocation2 + $0x59]] }
 0x17d   :  { %v1543_v11 = vadd.f32 %v1541_v57, %v1519_v31  ;;  %v1549_v9 = vadd.f32 %v1547_v50, %v1525_v44  ;;  %v1555_v43 = vadd.f32 %v1553_v10, %v1531_v63  ;;  %v1575_v22 = vstv %s4606_s26  ;;  %v1591_v57 = vpop.permute.xlu0 %1590  ;;  %s4848_s26 = sld [smem:[#allocation2 + $0x5a]] }
 0x17e   :  { %v1540_v37 = vmul.f32 %v1539_v47, %v1486_v59  ;;  %v1546_v38 = vmul.f32 %v1545_v2, %v1486_v59  ;;  %v1552_v32 = vmul.f32 %v1551_v52, %v1486_v59  ;;  %v1558_v41 = vmul.f32 %v1557_v27, %v1486_v59  ;;  %v1589_v20 = vpop.permute.xlu2 %1588  ;;  %s4952_s16 = sld [smem:[#allocation2 + $0x74]] }
 0x17f   :  { %v1581_v54 = vstv %s4610_s18  ;;  %v1488_v5 = vsel %vm122_vm11, %v1479_v58, 0.0  ;;  %v1611_v14 = vstv %s4618_s19  ;;  %v1617_v24 = vstv %s4621_s20  ;;  %s4734_s18 = sld [smem:[#allocation2 + $0x48]] }
 0x180   :  { %v1542_v34 = vadd.f32 %v1540_v37, %v4584_v45  ;;  %v1548_v40 = vadd.f32 %v1546_v38, %v4586_v4  ;;  %v1554_v55 = vadd.f32 %v1552_v32, %v4588_v6  ;;  %v1560_v48 = vadd.f32 %v1558_v41, %v4599_v18  ;;  %s4856_s20 = sld [smem:[#allocation2 + $0x5b]] }
 0x181   :  { %v1564_v28 = vmul.f32 %v1563_v30, %v1488_v5  ;;  %v1570_v25 = vmul.f32 %v1569_v13, %v1488_v5  ;;  %v1576_v62 = vmul.f32 %v1575_v22, %v1488_v5  ;;  %v1582_v51 = vmul.f32 %v1581_v54, %v1488_v5  ;;  %s4965_s19 = sld [smem:[#allocation2 + $0x78]] }
 0x182   :  { %v1561_v15 = vadd.f32 %v1559_v33, %v1537_v12  ;;  %v1623_v26 = vstv %s4626_s27  ;;  %v1602_v45 = vsel %vm123_vm10, %v1587_v1, 0.0  ;;  %v1489_v4 = vsel %vm122_vm11, %v1481_v56, 0.0  ;;  %v1593_v12 = vpop.permute.xlu1 %1592  ;;  %s4747_s27 = sld [smem:[#allocation2 + $0x49]] }
 0x183   :  { %v1566_v6 = vadd.f32 %v1564_v28, %v1542_v34  ;;  %v1572_v18 = vadd.f32 %v1570_v25, %v1548_v40  ;;  %v1578_v36 = vadd.f32 %v1576_v62, %v1554_v55  ;;  %v1629_v49 = vstv %s4630_s17  ;;  %s4757_s17 = sld [smem:[#allocation2 + $0x4a]] }
 0x184   :  { %v1584_v21 = vadd.f32 %v1582_v51, %v1560_v48  ;;  %v1612_v16 = vmul.f32 %v1611_v14, %v1602_v45  ;;  %v1618_v47 = vmul.f32 %v1617_v24, %v1602_v45  ;;  %v1624_v60 = vmul.f32 %v1623_v26, %v1602_v45 }
 0x185   :  { %v1565_v61 = vmul.f32 %v1563_v30, %v1489_v4  ;;  %v1571_v23 = vmul.f32 %v1569_v13, %v1489_v4  ;;  %v1577_v39 = vmul.f32 %v1575_v22, %v1489_v4  ;;  %v1583_v8 = vmul.f32 %v1581_v54, %v1489_v4 }
 0x186   :  { %v1614_v2 = vadd.f32 %v1612_v16, %v1566_v6  ;;  %v1620_v52 = vadd.f32 %v1618_v47, %v1572_v18  ;;  %v1626_v27 = vadd.f32 %v1624_v60, %v1578_v36  ;;  %v1630_v58 = vmul.f32 %v1629_v49, %v1602_v45  ;;  %v1595_v28 = vpop.permute.xlu2 %1594 }
 0x187   :  { %v1567_v31 = vadd.f32 %v1565_v61, %v1543_v11  ;;  %v1573_v44 = vadd.f32 %v1571_v23, %v1549_v9  ;;  %v1579_v63 = vadd.f32 %v1577_v39, %v1555_v43  ;;  %v1585_v7 = vadd.f32 %v1583_v8, %v1561_v15 }
 0x188   :  { %v1603_v50 = vsel %vm123_vm10, %v1589_v20, 0.0  ;;  %v1635_v10 = vstv %s4632_s13  ;;  %v1641_v33 = vstv %s4638_s22  ;;  %v1647_v59 = vstv %s4641_s2  ;;  %s4761_s13 = sld [smem:[#allocation2 + $0x4b]] }
 0x189   :  { %v1613_v30 = vmul.f32 %v1611_v14, %v1603_v50  ;;  %v1619_v13 = vmul.f32 %v1617_v24, %v1603_v50  ;;  %v1625_v11 = vmul.f32 %v1623_v26, %v1603_v50  ;;  %v1631_v9 = vmul.f32 %v1629_v49, %v1603_v50  ;;  %s4763_s22 = sld [smem:[#allocation2 + $0x4c]] }
 0x18a   :  { %v1632_v43 = vadd.f32 %v1630_v58, %v1584_v21  ;;  %v1653_v22 = vstv %s4643_s6  ;;  %v1605_v1 = vsel %vm123_vm10, %v1593_v12, 0.0  ;;  %v1604_v56 = vsel %vm123_vm10, %v1591_v57, 0.0  ;;  %v2634_v57 = vld [vmem:[%s5246_s0 + $0x40] sm:$0xff]  ;;  %s4768_s2 = sld [smem:[#allocation2 + $0x4d]] }
 0x18b   :  { %v1615_v37 = vadd.f32 %v1613_v30, %v1567_v31  ;;  %v1621_v38 = vadd.f32 %v1619_v13, %v1573_v44  ;;  %v1627_v32 = vadd.f32 %v1625_v11, %v1579_v63  ;;  %v1659_v41 = vstv %s4650_s7  ;;  %v1597_v30 = vpop.permute.xlu0 %1596  ;;  %s4770_s6 = sld [smem:[#allocation2 + $0x4e]] }
 0x18c   :  { %v1633_v54 = vadd.f32 %v1631_v9, %v1585_v7  ;;  %v1637_v5 = vmul.f32 %v1635_v10, %v1605_v1  ;;  %v1643_v14 = vmul.f32 %v1641_v33, %v1605_v1  ;;  %v1649_v24 = vmul.f32 %v1647_v59, %v1605_v1  ;;  %s4888_s7 = sld [smem:[#allocation2 + $0x63]] }
 0x18d   :  { %v1636_v34 = vmul.f32 %v1635_v10, %v1604_v56  ;;  %v1642_v40 = vmul.f32 %v1641_v33, %v1604_v56  ;;  %v1648_v55 = vmul.f32 %v1647_v59, %v1604_v56  ;;  %v1654_v48 = vmul.f32 %v1653_v22, %v1604_v56  ;;  %v1599_v59 = vpop.permute.xlu1 %1598 }
 0x18e   :  { %v4701_v25 = vadd.f32 %v1637_v5, %v1615_v37  ;;  %v4703_v62 = vadd.f32 %v1643_v14, %v1621_v38  ;;  %v4705_v51 = vadd.f32 %v1649_v24, %v1627_v32  ;;  %v1655_v15 = vmul.f32 %v1653_v22, %v1605_v1  ;;  %v2635_v1 = vld [vmem:[%s5246_s0 + $0x50] sm:$0xff]  ;;  %v2636_v14 = vld [vmem:[%s5246_s0 + $0x48] sm:$0xff] }
 0x18f   :  { %v1638_v26 = vadd.f32 %v1636_v34, %v1614_v2  ;;  %v1644_v45 = vadd.f32 %v1642_v40, %v1620_v52  ;;  %v1650_v4 = vadd.f32 %v1648_v55, %v1626_v27  ;;  %v1656_v6 = vadd.f32 %v1654_v48, %v1632_v43 }
 0x190   :  { %v1665_v18 = vstv %s4656_s5  ;;  %v1671_v36 = vstv %s4658_s10  ;;  %v1677_v49 = vstv %s4665_s12  ;;  %v1606_v20 = vsel %vm123_vm10, %v1595_v28, 0.0  ;;  %s4775_s10 = sld [smem:[#allocation2 + $0x4f]] }
 0x191   :  { %v1660_v21 = vmul.f32 %v1659_v41, %v1606_v20  ;;  %v1666_v16 = vmul.f32 %v1665_v18, %v1606_v20  ;;  %v1672_v47 = vmul.f32 %v1671_v36, %v1606_v20  ;;  %v1678_v60 = vmul.f32 %v1677_v49, %v1606_v20  ;;  %s4783_s12 = sld [smem:[#allocation2 + $0x50]] }
 0x192   :  { %v1657_v61 = vadd.f32 %v1655_v15, %v1633_v54  ;;  %v1683_v23 = vstv %s4668_s8  ;;  %v1689_v39 = vstv %s4670_s11  ;;  %v1695_v8 = vstv %s4672_s29  ;;  %s4808_s8 = sld [smem:[#allocation2 + $0x53]] }
 0x193   :  { %v1662_v2 = vadd.f32 %v1660_v21, %v1638_v26  ;;  %v1668_v52 = vadd.f32 %v1666_v16, %v1644_v45  ;;  %v1674_v27 = vadd.f32 %v1672_v47, %v1650_v4  ;;  %v1701_v58 = vstv %s4674_s30  ;;  %s4819_s30 = sld [smem:[#allocation2 + $0x54]] }
 0x194   :  { %v1707_v31 = vstv %s4676_s14  ;;  %v1713_v44 = vstv %s4683_s15  ;;  %v1719_v63 = vstv %s4685_s21  ;;  %v1725_v7 = vstv %s4692_s3  ;;  %s4788_s14 = sld [smem:[#allocation2 + $0x51]] }
 0x195   :  { %v1680_v12 = vadd.f32 %v1678_v60, %v1656_v6  ;;  %v1708_v50 = vmul.f32 %v2634_v57, %v1707_v31  ;;  %v1714_v10 = vmul.f32 %v2634_v57, %v1713_v44  ;;  %v1720_v33 = vmul.f32 %v2634_v57, %v1719_v63  ;;  %s4798_s15 = sld [smem:[#allocation2 + $0x52]] }
 0x196   :  { %v1731_v13 = vstv %s4695_s4  ;;  %v1737_v11 = vstv %s4697_s1  ;;  %v1743_v9 = vstv %s4699_s9  ;;  %v1749_v43 = vstv %s4707_s28  ;;  %s4824_s4 = sld [smem:[#allocation2 + $0x55]] }
 0x197   :  { %v1726_v22 = vmul.f32 %v2634_v57, %v1725_v7  ;;  %v1732_v56 = vmul.f32 %v2635_v1, %v1731_v13  ;;  %v1738_v37 = vmul.f32 %v2635_v1, %v1737_v11  ;;  %v1744_v38 = vmul.f32 %v2635_v1, %v1743_v9  ;;  %v1601_v57 = vpop.permute.xlu2 %1600  ;;  %s4828_s1 = sld [smem:[#allocation2 + $0x56]] }
 0x198   :  { %v4736_v32 = vmul.f32 %v2635_v1, %v1749_v43  ;;  %v1608_v54 = vsel %vm123_vm10, %v1599_v59, 0.0  ;;  %v1607_v5 = vsel %vm123_vm10, %v1597_v30, 0.0  ;;  %v4745_v24 = vmul.f32 %v2636_v14, %v1707_v31  ;;  %s4831_s9 = sld [smem:[#allocation2 + $0x57]] }
 0x199   :  { %v1684_v34 = vmul.f32 %v1683_v23, %v1608_v54  ;;  %v1690_v40 = vmul.f32 %v1689_v39, %v1608_v54  ;;  %v1696_v55 = vmul.f32 %v1695_v8, %v1608_v54  ;;  %v1702_v48 = vmul.f32 %v1701_v58, %v1608_v54  ;;  %s4833_s28 = sld [smem:[#allocation2 + $0x58]] }
 0x19a   :  { %v1661_v28 = vmul.f32 %v1659_v41, %v1607_v5  ;;  %v1667_v15 = vmul.f32 %v1665_v18, %v1607_v5  ;;  %v1673_v26 = vmul.f32 %v1671_v36, %v1607_v5  ;;  %v1679_v45 = vmul.f32 %v1677_v49, %v1607_v5  ;;  %v1805_v5 = vpop.permute.xlu1 %1804  ;;  %s4895_s5 = sld [smem:[#allocation2 + $0x64]] }
 0x19b   :  { %v1686_v4 = vadd.f32 %v1684_v34, %v1662_v2  ;;  %v1692_v6 = vadd.f32 %v1690_v40, %v1668_v52  ;;  %v1698_v20 = vadd.f32 %v1696_v55, %v1674_v27  ;;  %v1704_v21 = vadd.f32 %v1702_v48, %v1680_v12  ;;  %v2639_v48 = vld [vmem:[%s5246_s0 + $0x78] sm:$0xff]  ;;  %s4914_s21 = sld [smem:[#allocation2 + $0x69]] }
 0x19c   :  { %v1663_v16 = vadd.f32 %v1661_v28, %v4701_v25  ;;  %v1669_v47 = vadd.f32 %v1667_v15, %v4703_v62  ;;  %v1675_v60 = vadd.f32 %v1673_v26, %v4705_v51  ;;  %v1715_v31 = vmul.f32 %v2636_v14, %v1713_v44  ;;  %v2637_v62 = vld [vmem:[%s5246_s0 + $0x58] sm:$0xff]  ;;  %s4916_s3 = sld [smem:[#allocation2 + $0x6a]] }
 0x19d   :  { %v1710_v41 = vadd.f32 %v1708_v50, %v1686_v4  ;;  %v1716_v18 = vadd.f32 %v1714_v10, %v1692_v6  ;;  %v1722_v36 = vadd.f32 %v1720_v33, %v1698_v20  ;;  %v1681_v49 = vadd.f32 %v1679_v45, %v1657_v61  ;;  %s4920_s11 = sld [smem:[#allocation2 + $0x6c]] }
 0x19e   :  { %v1728_v2 = vadd.f32 %v1726_v22, %v1704_v21  ;;  %v1721_v52 = vmul.f32 %v2636_v14, %v1719_v63  ;;  %v1727_v25 = vmul.f32 %v2636_v14, %v1725_v7  ;;  %v1733_v51 = vmul.f32 %v2637_v62, %v1731_v13  ;;  %s4927_s29 = sld [smem:[#allocation2 + $0x6d]] }
 0x19f   :  { %v4777_v27 = vadd.f32 %v1732_v56, %v1710_v41  ;;  %v4779_v61 = vadd.f32 %v1738_v37, %v1716_v18  ;;  %v4781_v44 = vadd.f32 %v1744_v38, %v1722_v36  ;;  %v1739_v63 = vmul.f32 %v2637_v62, %v1737_v11  ;;  %v2638_v11 = vld [vmem:[%s5246_s0 + $0x68] sm:$0xff]  ;;  %v1807_v41 = vpop.permute.xlu2 %1806 }
 0x1a0   :  { %v1745_v7 = vmul.f32 %v2637_v62, %v1743_v9  ;;  %v1751_v12 = vmul.f32 %v2637_v62, %v1749_v43  ;;  %v1609_v50 = vsel %vm123_vm10, %v1601_v57, 0.0  ;;  %v1755_v10 = vstv %s4734_s18  ;;  %s4963_s18 = sld [smem:[#allocation2 + $0x77]] }
 0x1a1   :  { %v1685_v33 = vmul.f32 %v1683_v23, %v1609_v50  ;;  %v1691_v59 = vmul.f32 %v1689_v39, %v1609_v50  ;;  %v1697_v30 = vmul.f32 %v1695_v8, %v1609_v50  ;;  %v1703_v13 = vmul.f32 %v1701_v58, %v1609_v50 }
 0x1a2   :  { %v1757_v9 = vmul.f32 %v2638_v11, %v1755_v10  ;;  %v1761_v43 = vstv %s4747_s27  ;;  %v1767_v22 = vstv %s4757_s17  ;;  %v1773_v1 = vstv %s4761_s13  ;;  %s4869_s27 = sld [smem:[#allocation2 + $0x5d]] }
 0x1a3   :  { %v1687_v56 = vadd.f32 %v1685_v33, %v1663_v16  ;;  %v1693_v23 = vadd.f32 %v1691_v59, %v1669_v47  ;;  %v1699_v39 = vadd.f32 %v1697_v30, %v1675_v60  ;;  %v1705_v8 = vadd.f32 %v1703_v13, %v1681_v49  ;;  %v1803_v16 = vpop.permute.xlu0 %1802  ;;  %v2640_v13 = vld [vmem:[%s5246_s0 + $0x60] sm:$0xff]  ;;  %s4872_s17 = sld [smem:[#allocation2 + $0x5e]] }
 0x1a4   :  { %v1763_v58 = vmul.f32 %v2638_v11, %v1761_v43  ;;  %v1769_v37 = vmul.f32 %v2638_v11, %v1767_v22  ;;  %v1775_v38 = vmul.f32 %v2638_v11, %v1773_v1  ;;  %v1779_v54 = vstv %s4763_s22  ;;  %s4878_s13 = sld [smem:[#allocation2 + $0x5f]] }
 0x1a5   :  { %v1711_v14 = vadd.f32 %v4745_v24, %v1687_v56  ;;  %v1717_v34 = vadd.f32 %v1715_v31, %v1693_v23  ;;  %v1723_v40 = vadd.f32 %v1721_v52, %v1699_v39  ;;  %v1729_v55 = vadd.f32 %v1727_v25, %v1705_v8  ;;  %s4880_s22 = sld [smem:[#allocation2 + $0x60]] }
 0x1a6   :  { %v1781_v28 = vmul.f32 %v2639_v48, %v1779_v54  ;;  %v1785_v15 = vstv %s4768_s2  ;;  %v1791_v26 = vstv %s4770_s6  ;;  %v1797_v45 = vstv %s4775_s10  ;;  %s4884_s2 = sld [smem:[#allocation2 + $0x61]] }
 0x1a7   :  { %v1735_v4 = vadd.f32 %v1733_v51, %v1711_v14  ;;  %v1741_v6 = vadd.f32 %v1739_v63, %v1717_v34  ;;  %v1747_v20 = vadd.f32 %v1745_v7, %v1723_v40  ;;  %v1753_v21 = vadd.f32 %v1751_v12, %v1729_v55  ;;  %s4886_s6 = sld [smem:[#allocation2 + $0x62]] }
 0x1a8   :  { %v1752_v24 = vadd.f32 %v4736_v32, %v1728_v2  ;;  %v1787_v47 = vmul.f32 %v2639_v48, %v1785_v15  ;;  %v1793_v60 = vmul.f32 %v2639_v48, %v1791_v26  ;;  %v1799_v31 = vmul.f32 %v2639_v48, %v1797_v45  ;;  %s4897_s10 = sld [smem:[#allocation2 + $0x65]] }
 0x1a9   :  { %v1827_v18 = vstv %s4783_s12  ;;  %v1833_v36 = vstv %s4788_s14  ;;  %v1839_v49 = vstv %s4798_s15  ;;  %v1759_v57 = vadd.f32 %v1757_v9, %v1735_v4  ;;  %s4902_s12 = sld [smem:[#allocation2 + $0x66]] }
 0x1aa   :  { %v1765_v52 = vadd.f32 %v1763_v58, %v1741_v6  ;;  %v1771_v25 = vadd.f32 %v1769_v37, %v1747_v20  ;;  %v1777_v62 = vadd.f32 %v1775_v38, %v1753_v21  ;;  %v1819_v32 = vsel %vm122_vm11, %v1805_v5, 0.0  ;;  %v1811_v37 = vpop.permute.xlu1 %1810  ;;  %v1813_v20 = vpop.permute.xlu2 %1812  ;;  %s4905_s14 = sld [smem:[#allocation2 + $0x67]] }
 0x1ab   :  { %v1845_v2 = vstv %s4808_s8  ;;  %v1783_v51 = vadd.f32 %v1781_v28, %v1759_v57  ;;  %v1829_v63 = vmul.f32 %v1827_v18, %v1819_v32  ;;  %v1835_v7 = vmul.f32 %v1833_v36, %v1819_v32  ;;  %s4911_s15 = sld [smem:[#allocation2 + $0x68]] }
 0x1ac   :  { %v1789_v12 = vadd.f32 %v1787_v47, %v1765_v52  ;;  %v1795_v50 = vadd.f32 %v1793_v60, %v1771_v25  ;;  %v1801_v33 = vadd.f32 %v1799_v31, %v1777_v62  ;;  %v1841_v59 = vmul.f32 %v1839_v49, %v1819_v32  ;;  %s4918_s8 = sld [smem:[#allocation2 + $0x6b]] }
 0x1ad   :  { %v1847_v30 = vmul.f32 %v1845_v2, %v1819_v32  ;;  %v1756_v11 = vmul.f32 %v2640_v13, %v1755_v10  ;;  %v1762_v9 = vmul.f32 %v2640_v13, %v1761_v43  ;;  %v1768_v56 = vmul.f32 %v2640_v13, %v1767_v22  ;;  %v2641_v22 = vld [vmem:[%s5246_s0 + $0x70] sm:$0xff]  ;;  %s4866_s0 = sld [smem:[#allocation2 + $0x5c]] }
 0x1ae   :  { %v4842_v23 = vadd.f32 %v1829_v63, %v1783_v51  ;;  %v4844_v39 = vadd.f32 %v1835_v7, %v1789_v12  ;;  %v4846_v8 = vadd.f32 %v1841_v59, %v1795_v50  ;;  %v1774_v58 = vmul.f32 %v2640_v13, %v1773_v1 }
 0x1af   :  { %v1758_v38 = vadd.f32 %v1756_v11, %v4777_v27  ;;  %v1764_v10 = vadd.f32 %v1762_v9, %v4779_v61  ;;  %v1770_v43 = vadd.f32 %v1768_v56, %v4781_v44  ;;  %v1780_v5 = vmul.f32 %v2641_v22, %v1779_v54  ;;  %v1809_v44 = vpop.permute.xlu0 %1808 }
 0x1b0   :  { %v1776_v14 = vadd.f32 %v1774_v58, %v1752_v24  ;;  %v1786_v34 = vmul.f32 %v2641_v22, %v1785_v15  ;;  %v1792_v1 = vmul.f32 %v2641_v22, %v1791_v26  ;;  %v1798_v40 = vmul.f32 %v2641_v22, %v1797_v45 }
 0x1b1   :  { %v1782_v55 = vadd.f32 %v1780_v5, %v1758_v38  ;;  %v1818_v27 = vsel %vm122_vm11, %v1803_v16, 0.0  ;;  %v1851_v61 = vstv %s4819_s30  ;;  %v1857_v48 = vstv %s4824_s4  ;;  %s4929_s30 = sld [smem:[#allocation2 + $0x6e]] }
 0x1b2   :  { %v1788_v28 = vadd.f32 %v1786_v34, %v1764_v10  ;;  %v1794_v4 = vadd.f32 %v1792_v1, %v1770_v43  ;;  %v1800_v6 = vadd.f32 %v1798_v40, %v1776_v14  ;;  %v1828_v54 = vmul.f32 %v1827_v18, %v1818_v27  ;;  %s4934_s4 = sld [smem:[#allocation2 + $0x6f]] }
 0x1b3   :  { %v1834_v21 = vmul.f32 %v1833_v36, %v1818_v27  ;;  %v1840_v24 = vmul.f32 %v1839_v49, %v1818_v27  ;;  %v1846_v15 = vmul.f32 %v1845_v2, %v1818_v27  ;;  %v1863_v26 = vstv %s4828_s1  ;;  %s4937_s1 = sld [smem:[#allocation2 + $0x70]] }
 0x1b4   :  { %v1849_v45 = vadd.f32 %v1847_v30, %v1801_v33  ;;  %v1830_v47 = vadd.f32 %v1828_v54, %v1782_v55  ;;  %v1869_v60 = vstv %s4831_s9  ;;  %v1820_v16 = vsel %vm122_vm11, %v1807_v41, 0.0  ;;  %v1817_v33 = vpop.permute.xlu1 %1816  ;;  %v1947_v55 = vpop.permute.xlu2 %1946  ;;  %s4945_s9 = sld [smem:[#allocation2 + $0x71]] }
 0x1b5   :  { %v1836_v31 = vadd.f32 %v1834_v21, %v1788_v28  ;;  %v1842_v57 = vadd.f32 %v1840_v24, %v1794_v4  ;;  %v1848_v52 = vadd.f32 %v1846_v15, %v1800_v6  ;;  %v1875_v18 = vstv %s4833_s28  ;;  %s4948_s28 = sld [smem:[#allocation2 + $0x72]] }
 0x1b6   :  { %v1852_v36 = vmul.f32 %v1851_v61, %v1820_v16  ;;  %v1858_v49 = vmul.f32 %v1857_v48, %v1820_v16  ;;  %v1864_v25 = vmul.f32 %v1863_v26, %v1820_v16  ;;  %v1881_v62 = vstv %s4840_s24  ;;  %s4954_s24 = sld [smem:[#allocation2 + $0x75]] }
 0x1b7   :  { %v1870_v32 = vmul.f32 %v1869_v60, %v1820_v16  ;;  %v1887_v2 = vstv %s4848_s26  ;;  %v1893_v51 = vstv %s4856_s20  ;;  %v1822_v41 = vsel %vm122_vm11, %v1811_v37, 0.0  ;;  %v1815_v5 = vpop.permute.xlu0 %1814  ;;  %s4956_s26 = sld [smem:[#allocation2 + $0x76]] }
 0x1b8   :  { %v1854_v63 = vadd.f32 %v1852_v36, %v1830_v47  ;;  %v1860_v7 = vadd.f32 %v1858_v49, %v1836_v31  ;;  %v1866_v12 = vadd.f32 %v1864_v25, %v1842_v57  ;;  %v1876_v50 = vmul.f32 %v1875_v18, %v1822_v41  ;;  %s4969_s20 = sld [smem:[#allocation2 + $0x79]] }
 0x1b9   :  { %v1872_v59 = vadd.f32 %v1870_v32, %v1848_v52  ;;  %v1882_v30 = vmul.f32 %v1881_v62, %v1822_v41  ;;  %v1888_v13 = vmul.f32 %v1887_v2, %v1822_v41  ;;  %v1821_v11 = vsel %vm122_vm11, %v1809_v44, 0.0 }
 0x1ba   :  { %v1894_v9 = vmul.f32 %v1893_v51, %v1822_v41  ;;  %v1853_v56 = vmul.f32 %v1851_v61, %v1821_v11  ;;  %v1859_v58 = vmul.f32 %v1857_v48, %v1821_v11  ;;  %v1865_v37 = vmul.f32 %v1863_v26, %v1821_v11 }
 0x1bb   :  { %v1878_v38 = vadd.f32 %v1876_v50, %v1854_v63  ;;  %v1884_v10 = vadd.f32 %v1882_v30, %v1860_v7  ;;  %v1890_v43 = vadd.f32 %v1888_v13, %v1866_v12  ;;  %v1871_v22 = vmul.f32 %v1869_v60, %v1821_v11 }
 0x1bc   :  { %v1855_v14 = vadd.f32 %v1853_v56, %v4842_v23  ;;  %v1861_v34 = vadd.f32 %v1859_v58, %v4844_v39  ;;  %v1867_v1 = vadd.f32 %v1865_v37, %v4846_v8  ;;  %v1823_v40 = vsel %vm122_vm11, %v1813_v20, 0.0  ;;  %v1951_v36 = vpop.permute.xlu1 %1950  ;;  %v1953_v56 = vpop.permute.xlu2 %1952 }
 0x1bd   :  { %v1873_v27 = vadd.f32 %v1871_v22, %v1849_v45  ;;  %v1877_v61 = vmul.f32 %v1875_v18, %v1823_v40  ;;  %v1883_v48 = vmul.f32 %v1881_v62, %v1823_v40  ;;  %v1889_v44 = vmul.f32 %v1887_v2, %v1823_v40 }
 0x1be   :  { %v1895_v28 = vmul.f32 %v1893_v51, %v1823_v40  ;;  %v1899_v4 = vstv %s4866_s0  ;;  %v1905_v23 = vstv %s4869_s27  ;;  %v1911_v39 = vstv %s4872_s17  ;;  %s4977_s0 = sld [smem:[#allocation2 + $0x7a]] }
 0x1bf   :  { %v1896_v8 = vadd.f32 %v1894_v9, %v1872_v59  ;;  %v1879_v6 = vadd.f32 %v1877_v61, %v1855_v14  ;;  %v1885_v54 = vadd.f32 %v1883_v48, %v1861_v34  ;;  %v1917_v20 = vstv %s4878_s13  ;;  %v1949_v59 = vpop.permute.xlu0 %1948  ;;  %s4986_s27 = sld [smem:[#allocation2 + $0x7b]] }
 0x1c0   :  { %v1891_v21 = vadd.f32 %v1889_v44, %v1867_v1  ;;  %v1897_v24 = vadd.f32 %v1895_v28, %v1873_v27  ;;  %v1825_v15 = vsel %vm122_vm11, %v1817_v33, 0.0  ;;  %v1824_v26 = vsel %vm122_vm11, %v1815_v5, 0.0  ;;  %s4988_s17 = sld [smem:[#allocation2 + $0x7c]] }
 0x1c1   :  { %v1901_v45 = vmul.f32 %v1899_v4, %v1825_v15  ;;  %v1907_v47 = vmul.f32 %v1905_v23, %v1825_v15  ;;  %v1913_v60 = vmul.f32 %v1911_v39, %v1825_v15  ;;  %v1971_v16 = vstv %s4880_s22  ;;  %s4994_s13 = sld [smem:[#allocation2 + $0x7d]] }
 0x1c2   :  { %v1900_v31 = vmul.f32 %v1899_v4, %v1824_v26  ;;  %v1906_v57 = vmul.f32 %v1905_v23, %v1824_v26  ;;  %v1912_v52 = vmul.f32 %v1911_v39, %v1824_v26  ;;  %v1918_v18 = vmul.f32 %v1917_v20, %v1824_v26  ;;  %s4996_s22 = sld [smem:[#allocation2 + $0x7e]] }
 0x1c3   :  { %v1903_v49 = vadd.f32 %v1901_v45, %v1879_v6  ;;  %v1909_v25 = vadd.f32 %v1907_v47, %v1885_v54  ;;  %v1915_v62 = vadd.f32 %v1913_v60, %v1891_v21  ;;  %v1919_v32 = vmul.f32 %v1917_v20, %v1825_v15 }
 0x1c4   :  { %v1902_v2 = vadd.f32 %v1900_v31, %v1878_v38  ;;  %v1908_v51 = vadd.f32 %v1906_v57, %v1884_v10  ;;  %v1914_v41 = vadd.f32 %v1912_v52, %v1890_v43  ;;  %v1920_v63 = vadd.f32 %v1918_v18, %v1896_v8  ;;  %v1957_v21 = vpop.permute.xlu1 %1956 }
 0x1c5   :  { %v1977_v7 = vstv %s4884_s2  ;;  %v1983_v12 = vstv %s4886_s6  ;;  %v1989_v50 = vstv %s4888_s7  ;;  %v1962_v33 = vsel %vm123_vm10, %v1947_v55, 0.0  ;;  %s5008_s2 = sld [smem:[#allocation2 + $0x7f]] }
 0x1c6   :  { %v1972_v30 = vmul.f32 %v1971_v16, %v1962_v33  ;;  %v1978_v13 = vmul.f32 %v1977_v7, %v1962_v33  ;;  %v1984_v11 = vmul.f32 %v1983_v12, %v1962_v33  ;;  %v1990_v9 = vmul.f32 %v1989_v50, %v1962_v33  ;;  %s5016_s6 = sld [smem:[#allocation2 + $0x80]] }
 0x1c7   :  { %v1921_v58 = vadd.f32 %v1919_v32, %v1897_v24  ;;  %v1995_v37 = vstv %s4895_s5  ;;  %v2001_v38 = vstv %s4897_s10  ;;  %v2007_v10 = vstv %s4902_s12  ;;  %s5028_s7 = sld [smem:[#allocation2 + $0x81]] }
 0x1c8   :  { %v1974_v43 = vadd.f32 %v1972_v30, %v1902_v2  ;;  %v1980_v22 = vadd.f32 %v1978_v13, %v1908_v51  ;;  %v1986_v5 = vadd.f32 %v1984_v11, %v1914_v41  ;;  %v2013_v14 = vstv %s4905_s14  ;;  %s5037_s5 = sld [smem:[#allocation2 + $0x82]] }
 0x1c9   :  { %v1992_v34 = vadd.f32 %v1990_v9, %v1920_v63  ;;  %v1964_v1 = vsel %vm123_vm10, %v1951_v36, 0.0  ;;  %v1963_v40 = vsel %vm123_vm10, %v1949_v59, 0.0  ;;  %v1965_v55 = vsel %vm123_vm10, %v1953_v56, 0.0  ;;  %s5047_s10 = sld [smem:[#allocation2 + $0x83]] }
 0x1ca   :  { %v1996_v27 = vmul.f32 %v1995_v37, %v1964_v1  ;;  %v2002_v61 = vmul.f32 %v2001_v38, %v1964_v1  ;;  %v2008_v48 = vmul.f32 %v2007_v10, %v1964_v1  ;;  %v2019_v44 = vstv %s4911_s15  ;;  %s5093_s12 = sld [smem:[#allocation2 + $0x84]] }
 0x1cb   :  { %v1973_v28 = vmul.f32 %v1971_v16, %v1963_v40  ;;  %v1979_v4 = vmul.f32 %v1977_v7, %v1963_v40  ;;  %v1985_v23 = vmul.f32 %v1983_v12, %v1963_v40  ;;  %v1991_v39 = vmul.f32 %v1989_v50, %v1963_v40  ;;  %s5105_s14 = sld [smem:[#allocation2 + $0x85]] }
 0x1cc   :  { %v1998_v8 = vadd.f32 %v1996_v27, %v1974_v43  ;;  %v2004_v6 = vadd.f32 %v2002_v61, %v1980_v22  ;;  %v2010_v54 = vadd.f32 %v2008_v48, %v1986_v5  ;;  %v2014_v20 = vmul.f32 %v2013_v14, %v1964_v1  ;;  %s5128_s15 = sld [smem:[#allocation2 + $0x86]] }
 0x1cd   :  { %v1975_v24 = vadd.f32 %v1973_v28, %v1903_v49  ;;  %v1981_v15 = vadd.f32 %v1979_v4, %v1909_v25  ;;  %v1987_v26 = vadd.f32 %v1985_v23, %v1915_v62  ;;  %v1993_v45 = vadd.f32 %v1991_v39, %v1921_v58  ;;  %v1955_v49 = vpop.permute.xlu0 %1954 }
 0x1ce   :  { %v1997_v47 = vmul.f32 %v1995_v37, %v1965_v55  ;;  %v2003_v60 = vmul.f32 %v2001_v38, %v1965_v55  ;;  %v2009_v16 = vmul.f32 %v2007_v10, %v1965_v55  ;;  %v2015_v31 = vmul.f32 %v2013_v14, %v1965_v55 }
 0x1cf   :  { %v2025_v57 = vstv %s4914_s21  ;;  %v2031_v52 = vstv %s4916_s3  ;;  %v2037_v18 = vstv %s4918_s8  ;;  %v1967_v36 = vsel %vm123_vm10, %v1957_v21, 0.0  ;;  %s5150_s21 = sld [smem:[#allocation2 + $0x87]] }
 0x1d0   :  { %v2016_v25 = vadd.f32 %v2014_v20, %v1992_v34  ;;  %v1999_v62 = vadd.f32 %v1997_v47, %v1975_v24  ;;  %v2005_v32 = vadd.f32 %v2003_v60, %v1981_v15  ;;  %v2011_v2 = vadd.f32 %v2009_v16, %v1987_v26  ;;  %s5165_s3 = sld [smem:[#allocation2 + $0x88]] }
 0x1d1   :  { %v4967_v51 = vadd.f32 %v2015_v31, %v1993_v45  ;;  %v2021_v41 = vmul.f32 %v2019_v44, %v1967_v36  ;;  %v2027_v63 = vmul.f32 %v2025_v57, %v1967_v36  ;;  %v2033_v7 = vmul.f32 %v2031_v52, %v1967_v36  ;;  %s5167_s8 = sld [smem:[#allocation2 + $0x89]] }
 0x1d2   :  { %v4971_v12 = vmul.f32 %v2037_v18, %v1967_v36  ;;  %v1966_v50 = vsel %vm123_vm10, %v1955_v49, 0.0  ;;  %v2043_v33 = vstv %s4920_s11  ;;  %v2049_v59 = vstv %s4927_s29  ;;  %s5176_s11 = sld [smem:[#allocation2 + $0x8a]] }
 0x1d3   :  { %v4979_v30 = vadd.f32 %v2021_v41, %v1999_v62  ;;  %v4981_v13 = vadd.f32 %v2027_v63, %v2005_v32  ;;  %v4983_v11 = vadd.f32 %v2033_v7, %v2011_v2  ;;  %v2055_v9 = vstv %s4929_s30  ;;  %s5178_s29 = sld [smem:[#allocation2 + $0x8b]] }
 0x1d4   :  { %v2020_v56 = vmul.f32 %v2019_v44, %v1966_v50  ;;  %v2026_v58 = vmul.f32 %v2025_v57, %v1966_v50  ;;  %v2032_v37 = vmul.f32 %v2031_v52, %v1966_v50  ;;  %v2038_v38 = vmul.f32 %v2037_v18, %v1966_v50  ;;  %v1959_v44 = vpop.permute.xlu2 %1958  ;;  %s5187_s30 = sld [smem:[#allocation2 + $0x8c]] }
 0x1d5   :  { %v2061_v10 = vstv %s4934_s4  ;;  %v2067_v43 = vstv %s4937_s1  ;;  %v2073_v22 = vstv %s4945_s9  ;;  %v2079_v5 = vstv %s4948_s28  ;;  %s5189_s4 = sld [smem:[#allocation2 + $0x8d]] }
 0x1d6   :  { %v2022_v14 = vadd.f32 %v2020_v56, %v1998_v8  ;;  %v2028_v34 = vadd.f32 %v2026_v58, %v2004_v6  ;;  %v2034_v1 = vadd.f32 %v2032_v37, %v2010_v54  ;;  %v2040_v40 = vadd.f32 %v2038_v38, %v2016_v25  ;;  %s5198_s1 = sld [smem:[#allocation2 + $0x8e]] }
 0x1d7   :  { %v2068_v55 = vmul.f32 %v2067_v43, %v4272_v42  ;;  %v2074_v27 = vmul.f32 %v2073_v22, %v4272_v42  ;;  %v2080_v61 = vmul.f32 %v2079_v5, %v4272_v42  ;;  %v2085_v48 = vstv %s4950_s23  ;;  %s5200_s9 = sld [smem:[#allocation2 + $0x8f]] }
 0x1d8   :  { %v2086_v28 = vmul.f32 %v2085_v48, %v4272_v42  ;;  %v2091_v4 = vstv %s4952_s16  ;;  %v2097_v23 = vstv %s4954_s24  ;;  %v2103_v39 = vstv %s4956_s26 }
 0x1d9   :  { %v2092_v8 = vmul.f32 %v2091_v4, %v4063_v29  ;;  %v2098_v6 = vmul.f32 %v2097_v23, %v4063_v29  ;;  %v2104_v42 = vmul.f32 %v2103_v39, %v4063_v29  ;;  %v2109_v54 = vstv %s4963_s18 }
 0x1da   :  { %v2110_v20 = vmul.f32 %v2109_v54, %v4063_v29  ;;  %v1968_v21 = vsel %vm123_vm10, %v1959_v44, 0.0  ;;  %v2115_v24 = vstv %s4965_s19  ;;  %v2121_v15 = vstv %s4969_s20 }
 0x1db   :  { %v2044_v26 = vmul.f32 %v2043_v33, %v1968_v21  ;;  %v2050_v45 = vmul.f32 %v2049_v59, %v1968_v21  ;;  %v2056_v47 = vmul.f32 %v2055_v9, %v1968_v21  ;;  %v2062_v60 = vmul.f32 %v2061_v10, %v1968_v21  ;;  %v2163_v21 = vpop.permute.xlu1 %2162 }
 0x1dc   :  { %v2116_v29 = vmul.f32 %v2115_v24, %v4220_v19  ;;  %v2122_v16 = vmul.f32 %v2121_v15, %v4220_v19  ;;  %v2127_v31 = vstv %s4977_s0  ;;  %v2133_v57 = vstv %s4986_s27 }
 0x1dd   :  { %v2046_v52 = vadd.f32 %v2044_v26, %v2022_v14  ;;  %v2052_v18 = vadd.f32 %v2050_v45, %v2028_v34  ;;  %v2058_v36 = vadd.f32 %v2056_v47, %v2034_v1  ;;  %v2064_v49 = vadd.f32 %v2062_v60, %v2040_v40 }
 0x1de   :  { %v2128_v25 = vmul.f32 %v2127_v31, %v4220_v19  ;;  %v2134_v62 = vmul.f32 %v2133_v57, %v4220_v19  ;;  %v2139_v32 = vstv %s4988_s17  ;;  %v2145_v2 = vstv %s4994_s13 }
 0x1df   :  { %v2070_v41 = vadd.f32 %v2068_v55, %v2046_v52  ;;  %v2076_v63 = vadd.f32 %v2074_v27, %v2052_v18  ;;  %v2082_v7 = vadd.f32 %v2080_v61, %v2058_v36  ;;  %v2088_v50 = vadd.f32 %v2086_v28, %v2064_v49  ;;  %v1961_v18 = vpop.permute.xlu0 %1960 }
 0x1e0   :  { %v2140_v56 = vmul.f32 %v2139_v32, %v4394_v53  ;;  %v2146_v58 = vmul.f32 %v2145_v2, %v4394_v53  ;;  %v2151_v37 = vstv %s4996_s22  ;;  %v2157_v38 = vstv %s5008_s2 }
 0x1e1   :  { %v2094_v19 = vadd.f32 %v2092_v8, %v2070_v41  ;;  %v2100_v14 = vadd.f32 %v2098_v6, %v2076_v63  ;;  %v2106_v34 = vadd.f32 %v2104_v42, %v2082_v7  ;;  %v2112_v1 = vadd.f32 %v2110_v20, %v2088_v50  ;;  %v2165_v41 = vpop.permute.xlu2 %2164 }
 0x1e2   :  { %v2152_v40 = vmul.f32 %v2151_v37, %v4394_v53  ;;  %v2158_v55 = vmul.f32 %v2157_v38, %v4394_v53  ;;  %v2187_v27 = vstv %s5016_s6  ;;  %v2193_v61 = vstv %s5028_s7 }
 0x1e3   :  { %v2199_v44 = vstv %s5037_s5  ;;  %v2205_v28 = vstv %s5047_s10  ;;  %v2118_v26 = vadd.f32 %v2116_v29, %v2094_v19  ;;  %v2124_v45 = vadd.f32 %v2122_v16, %v2100_v14 }
 0x1e4   :  { %v2041_v8 = vadd.f32 %v4971_v12, %v4967_v51  ;;  %v2130_v6 = vadd.f32 %v2128_v25, %v2106_v34  ;;  %v2136_v42 = vadd.f32 %v2134_v62, %v2112_v1  ;;  %v2178_v20 = vsel %vm122_vm11, %v2163_v21, 0.0  ;;  %v2169_v21 = vpop.permute.xlu1 %2168 }
 0x1e5   :  { %v2142_v53 = vadd.f32 %v2140_v56, %v2118_v26  ;;  %v2148_v47 = vadd.f32 %v2146_v58, %v2124_v45  ;;  %v2188_v60 = vmul.f32 %v2187_v27, %v2178_v20  ;;  %v2194_v52 = vmul.f32 %v2193_v61, %v2178_v20 }
 0x1e6   :  { %v2154_v29 = vadd.f32 %v2152_v40, %v2130_v6  ;;  %v2160_v16 = vadd.f32 %v2158_v55, %v2136_v42  ;;  %v2200_v51 = vmul.f32 %v2199_v44, %v2178_v20  ;;  %v2206_v12 = vmul.f32 %v2205_v28, %v2178_v20 }
 0x1e7   :  { %v5095_v36 = vadd.f32 %v2188_v60, %v2142_v53  ;;  %v5097_v49 = vadd.f32 %v2194_v52, %v2148_v47  ;;  %v2069_v25 = vmul.f32 %v2067_v43, %v4085_v35  ;;  %v2075_v62 = vmul.f32 %v2073_v22, %v4085_v35  ;;  %v2167_v26 = vpop.permute.xlu0 %2166 }
 0x1e8   :  { %v5107_v63 = vadd.f32 %v2200_v51, %v2154_v29  ;;  %v5109_v7 = vadd.f32 %v2206_v12, %v2160_v16  ;;  %v2081_v50 = vmul.f32 %v2079_v5, %v4085_v35  ;;  %v2087_v43 = vmul.f32 %v2085_v48, %v4085_v35 }
 0x1e9   :  { %v2093_v22 = vmul.f32 %v2091_v4, %v4337_v0  ;;  %v2099_v56 = vmul.f32 %v2097_v23, %v4337_v0  ;;  %v2105_v58 = vmul.f32 %v2103_v39, %v4337_v0  ;;  %v1969_v19 = vsel %vm123_vm10, %v1961_v18, 0.0  ;;  %v2171_v6 = vpop.permute.xlu2 %2170 }
 0x1ea   :  { %v2045_v5 = vmul.f32 %v2043_v33, %v1969_v19  ;;  %v2051_v35 = vmul.f32 %v2049_v59, %v1969_v19  ;;  %v2057_v48 = vmul.f32 %v2055_v9, %v1969_v19  ;;  %v2063_v4 = vmul.f32 %v2061_v10, %v1969_v19 }
 0x1eb   :  { %v2111_v23 = vmul.f32 %v2109_v54, %v4337_v0  ;;  %v2117_v39 = vmul.f32 %v2115_v24, %v4232_v46  ;;  %v2123_v14 = vmul.f32 %v2121_v15, %v4232_v46  ;;  %v2129_v34 = vmul.f32 %v2127_v31, %v4232_v46 }
 0x1ec   :  { %v2047_v33 = vadd.f32 %v2045_v5, %v4979_v30  ;;  %v2053_v59 = vadd.f32 %v2051_v35, %v4981_v13  ;;  %v2059_v0 = vadd.f32 %v2057_v48, %v4983_v11  ;;  %v2065_v9 = vadd.f32 %v2063_v4, %v2041_v8 }
 0x1ed   :  { %v2135_v10 = vmul.f32 %v2133_v57, %v4232_v46  ;;  %v2141_v54 = vmul.f32 %v2139_v32, %v4286_v17  ;;  %v2147_v24 = vmul.f32 %v2145_v2, %v4286_v17  ;;  %v2153_v15 = vmul.f32 %v2151_v37, %v4286_v17 }
 0x1ee   :  { %v2071_v30 = vadd.f32 %v2069_v25, %v2047_v33  ;;  %v2077_v31 = vadd.f32 %v2075_v62, %v2053_v59  ;;  %v2083_v13 = vadd.f32 %v2081_v50, %v2059_v0  ;;  %v2089_v11 = vadd.f32 %v2087_v43, %v2065_v9 }
 0x1ef   :  { %v2159_v46 = vmul.f32 %v2157_v38, %v4286_v17  ;;  %v2179_v57 = vsel %vm122_vm11, %v2165_v41, 0.0  ;;  %v2211_v32 = vstv %s5093_s12  ;;  %v2217_v2 = vstv %s5105_s14 }
 0x1f0   :  { %v2095_v37 = vadd.f32 %v2093_v22, %v2071_v30  ;;  %v2101_v1 = vadd.f32 %v2099_v56, %v2077_v31  ;;  %v2107_v40 = vadd.f32 %v2105_v58, %v2083_v13  ;;  %v2113_v55 = vadd.f32 %v2111_v23, %v2089_v11  ;;  %v2173_v30 = vpop.permute.xlu0 %2172 }
 0x1f1   :  { %v2189_v45 = vmul.f32 %v2187_v27, %v2179_v57  ;;  %v2195_v17 = vmul.f32 %v2193_v61, %v2179_v57  ;;  %v2201_v38 = vmul.f32 %v2199_v44, %v2179_v57  ;;  %v2223_v8 = vstv %s5128_s15  ;;  %v2177_v31 = vpop.permute.xlu2 %2176 }
 0x1f2   :  { %v2119_v42 = vadd.f32 %v2117_v39, %v2095_v37  ;;  %v2125_v20 = vadd.f32 %v2123_v14, %v2101_v1  ;;  %v2131_v53 = vadd.f32 %v2129_v34, %v2107_v40  ;;  %v2137_v47 = vadd.f32 %v2135_v10, %v2113_v55  ;;  %v2175_v10 = vpop.permute.xlu1 %2174 }
 0x1f3   :  { %v2207_v60 = vmul.f32 %v2205_v28, %v2179_v57  ;;  %v2229_v52 = vstv %s5150_s21  ;;  %v2181_v27 = vsel %vm122_vm11, %v2169_v21, 0.0  ;;  %v2180_v61 = vsel %vm122_vm11, %v2167_v26, 0.0 }
 0x1f4   :  { %v2143_v44 = vadd.f32 %v2141_v54, %v2119_v42  ;;  %v2149_v29 = vadd.f32 %v2147_v24, %v2125_v20  ;;  %v2155_v16 = vadd.f32 %v2153_v15, %v2131_v53  ;;  %v2161_v51 = vadd.f32 %v2159_v46, %v2137_v47 }
 0x1f5   :  { %v2213_v12 = vmul.f32 %v2211_v32, %v2181_v27  ;;  %v2219_v18 = vmul.f32 %v2217_v2, %v2181_v27  ;;  %v2225_v25 = vmul.f32 %v2223_v8, %v2181_v27  ;;  %v2235_v62 = vstv %s5165_s3 }
 0x1f6   :  { %v2191_v28 = vadd.f32 %v2189_v45, %v2143_v44  ;;  %v2197_v41 = vadd.f32 %v2195_v17, %v2149_v29  ;;  %v2203_v50 = vadd.f32 %v2201_v38, %v2155_v16  ;;  %v2231_v43 = vmul.f32 %v2229_v52, %v2181_v27 }
 0x1f7   :  { %v2212_v22 = vmul.f32 %v2211_v32, %v2180_v61  ;;  %v2218_v56 = vmul.f32 %v2217_v2, %v2180_v61  ;;  %v2224_v58 = vmul.f32 %v2223_v8, %v2180_v61  ;;  %v2230_v19 = vmul.f32 %v2229_v52, %v2180_v61 }
 0x1f8   :  { %v2209_v5 = vadd.f32 %v2207_v60, %v2161_v51  ;;  %v2215_v35 = vadd.f32 %v2213_v12, %v2191_v28  ;;  %v2221_v48 = vadd.f32 %v2219_v18, %v2197_v41  ;;  %v2227_v4 = vadd.f32 %v2225_v25, %v2203_v50 }
 0x1f9   :  { %v2214_v23 = vadd.f32 %v2212_v22, %v5095_v36  ;;  %v2220_v39 = vadd.f32 %v2218_v56, %v5097_v49  ;;  %v2226_v14 = vadd.f32 %v2224_v58, %v5107_v63  ;;  %v2232_v34 = vadd.f32 %v2230_v19, %v5109_v7 }
 0x1fa   :  { %v2241_v33 = vstv %s5167_s8  ;;  %v2247_v59 = vstv %s5176_s11  ;;  %v2253_v0 = vstv %s5178_s29  ;;  %v2182_v9 = vsel %vm122_vm11, %v2171_v6, 0.0 }
 0x1fb   :  { %v2236_v54 = vmul.f32 %v2235_v62, %v2182_v9  ;;  %v2242_v24 = vmul.f32 %v2241_v33, %v2182_v9  ;;  %v2248_v15 = vmul.f32 %v2247_v59, %v2182_v9  ;;  %v2254_v36 = vmul.f32 %v2253_v0, %v2182_v9 }
 0x1fc   :  { %v2259_v49 = vstv %s5187_s30  ;;  %v2265_v13 = vstv %s5189_s4  ;;  %v2271_v11 = vstv %s5198_s1  ;;  %v2277_v63 = vstv %s5200_s9 }
 0x1fd   :  { %v2233_v46 = vadd.f32 %v2231_v43, %v2209_v5  ;;  %v2238_v57 = vadd.f32 %v2236_v54, %v2214_v23  ;;  %v2244_v7 = vadd.f32 %v2242_v24, %v2220_v39  ;;  %v2250_v32 = vadd.f32 %v2248_v15, %v2226_v14 }
 0x1fe   :  { %v2256_v2 = vadd.f32 %v2254_v36, %v2232_v34  ;;  %v2184_v37 = vsel %vm122_vm11, %v2175_v10, 0.0  ;;  %v2183_v1 = vsel %vm122_vm11, %v2173_v30, 0.0  ;;  %v2185_v40 = vsel %vm122_vm11, %v2177_v31, 0.0 }
 0x1ff   :  { %v2260_v55 = vmul.f32 %v2259_v49, %v2184_v37  ;;  %v2266_v21 = vmul.f32 %v2265_v13, %v2184_v37  ;;  %v2272_v26 = vmul.f32 %v2271_v11, %v2184_v37  ;;  %v2278_v45 = vmul.f32 %v2277_v63, %v2184_v37 }
 0x200   :  { %v2237_v17 = vmul.f32 %v2235_v62, %v2183_v1  ;;  %v2243_v38 = vmul.f32 %v2241_v33, %v2183_v1  ;;  %v2249_v8 = vmul.f32 %v2247_v59, %v2183_v1  ;;  %v2255_v6 = vmul.f32 %v2253_v0, %v2183_v1 }
 0x201   :  { %v2262_v42 = vadd.f32 %v2260_v55, %v2238_v57  ;;  %v2268_v20 = vadd.f32 %v2266_v21, %v2244_v7  ;;  %v2274_v53 = vadd.f32 %v2272_v26, %v2250_v32  ;;  %v2280_v47 = vadd.f32 %v2278_v45, %v2256_v2 }
 0x202   :  { %v2239_v60 = vadd.f32 %v2237_v17, %v2215_v35  ;;  %v2245_v52 = vadd.f32 %v2243_v38, %v2221_v48  ;;  %v2251_v27 = vadd.f32 %v2249_v8, %v2227_v4  ;;  %v2257_v61 = vadd.f32 %v2255_v6, %v2233_v46 }
 0x203   :  { %2606 = vst [vmem:[%s5483_s25 + $0x40] sm:$0xff] %v2262_v42  ;;  %v2261_v3 = vmul.f32 %v2259_v49, %v2185_v40  ;;  %v2267_v44 = vmul.f32 %v2265_v13, %v2185_v40  ;;  %v2273_v29 = vmul.f32 %v2271_v11, %v2185_v40  ;;  %v2279_v16 = vmul.f32 %v2277_v63, %v2185_v40 }
 0x204   :  { %2608 = vst [vmem:[%s5483_s25 + $0x50] sm:$0xff] %v2268_v20 }
 0x205   :  { %2610 = vst [vmem:[%s5483_s25 + $0x60] sm:$0xff] %v2274_v53  ;;  %v2263_v51 = vadd.f32 %v2261_v3, %v2239_v60  ;;  %v2269_v12 = vadd.f32 %v2267_v44, %v2245_v52  ;;  %v2275_v18 = vadd.f32 %v2273_v29, %v2251_v27  ;;  %v2281_v25 = vadd.f32 %v2279_v16, %v2257_v61 }
 0x206   :  { %2612 = vst [vmem:[%s5483_s25 + $0x70] sm:$0xff] %v2280_v47 }
 0x207   :  { %2607 = vst [vmem:[%s5483_s25 + $0x48] sm:$0xff] %v2263_v51 }
 0x208   :  { %2609 = vst [vmem:[%s5483_s25 + $0x58] sm:$0xff] %v2269_v12 }
 0x209   :  { %2611 = vst [vmem:[%s5483_s25 + $0x68] sm:$0xff] %v2275_v18 }
 0x20a   :  { %2613 = vst [vmem:[%s5483_s25 + $0x78] sm:$0xff] %v2281_v25 }
 0x20b   :  { %2298 = vsyncpa [#allocation3], 1 }
 0x20c   :  { %2299 = vsyncpa [#allocation5], 1 }

</bundles_post_ra>
